<compile_context>
chip_gen: v6e
topology: v6e:2x2x1
jax: 0.10.0
libtpu: 0.0.40
codegen_flags: <defaults>
</compile_context>

<pallas_src>
import jax
import jax.numpy as jnp
from jax import lax
from jax.experimental import pallas as pl
from jax.experimental.pallas import tpu as pltpu

K = 5       # conv kernel size (both convs)
NPOOL = 4   # number of 2x2 pool-window offsets


def _vmem():
    # Whole-array block resident in VMEM (no grid -> single program).
    return pl.BlockSpec(memory_space=pltpu.MemorySpace.VMEM)


def _round_up(n, m):
    return ((n + m - 1) // m) * m


# ------------------------------ Pallas kernels ------------------------------

def conv_relu_pool_kernel(p_ref, w_ref, o_ref):
    """Conv2d(5x5, VALID, bias=False) + ReLU + MaxPool2d(2) for the whole batch.

    p_ref: (R, 4*GW) im2col patches; the 4 pool-window offsets are stacked along
           the lane axis in 128-aligned groups of width GW.
    w_ref: (Cout, R)
    o_ref: (Cout, GW)   with lane = (y*Wp + x)*B + b  (zero padding at the end).
    """
    gw = o_ref.shape[1]
    y = jnp.dot(w_ref[...], p_ref[...], preferred_element_type=jnp.float32)
    m01 = jnp.maximum(y[:, 0:gw], y[:, gw:2 * gw])
    m23 = jnp.maximum(y[:, 2 * gw:3 * gw], y[:, 3 * gw:4 * gw])
    # relu(max) == max(relu): ReLU is monotone, so this equals maxpool(relu(conv)).
    o_ref[...] = jnp.maximum(jnp.maximum(m01, m23), 0.0)


def conv_pool_mlp_kernel(p_ref, wc_ref, w1s_ref, b1_ref, w2_ref, b2_ref,
                         w3_ref, b3_ref, o_ref):
    """Fused conv2 block + flatten + classifier (everything after conv1's pool).

    p_ref : (150, 4*GW2) conv2 patches, pool offsets in 128-aligned lane groups,
            lane within a group = s*B + b  (s = pooled spatial index, b = image).
    wc_ref: (16, 150) conv2 weight.
    w1s_ref: (S2, 120, 16) fc1 weight permuted per pooled pixel, so the PyTorch
            flatten (ci*S2 + s feature order) needs no in-kernel relayout.
    b1/b2/b3: column biases (H, 1); w2: (84, 120); w3: (ncls, 84).
    o_ref : (ncls, B) transposed logits.
    """
    ncls, B = o_ref.shape
    gw = p_ref.shape[1] // NPOOL

    # conv2 + ReLU + maxpool: one MXU matmul, then VPU max over the 4 lane groups.
    y = jnp.dot(wc_ref[...], p_ref[...], preferred_element_type=jnp.float32)
    m01 = jnp.maximum(y[:, 0:gw], y[:, gw:2 * gw])
    m23 = jnp.maximum(y[:, 2 * gw:3 * gw], y[:, 3 * gw:4 * gw])
    pooled = jnp.maximum(jnp.maximum(m01, m23), 0.0)          # (16, GW2)

    # fc1 with the flatten folded into the permuted weight: one tiny matmul per
    # pooled spatial position, each consuming a contiguous B-lane slice.
    S2, H1, _ = w1s_ref.shape
    h = jnp.zeros((H1, B), jnp.float32)
    for s in range(S2):
        h = h + jnp.dot(w1s_ref[s], pooled[:, s * B:(s + 1) * B],
                        preferred_element_type=jnp.float32)
    h = jnp.maximum(h + b1_ref[...], 0.0)                      # (120, B)

    h = jnp.maximum(jnp.dot(w2_ref[...], h, preferred_element_type=jnp.float32)
                    + b2_ref[...], 0.0)                        # (84, B)
    o_ref[...] = (jnp.dot(w3_ref[...], h, preferred_element_type=jnp.float32)
                  + b3_ref[...])                               # (ncls, B)


# ------------------------------ XLA-side patch builders ----------------------
# Exact f32 im2col from static shifted slices (no conv / no MXU / no bf16 rounding).

def _conv1_pool_patches(x):
    """x: (B, C, H, W) -> (C*K*K, 4*GW) patches grouped by 2x2 pool offset.

    Group lane order: (y*Wp + x)*B + b — matches kernel 1's output layout so the
    conv2 patch builder consumes it with NO transpose."""
    B, C, H, W = x.shape
    Hp, Wp = (H - K + 1) // 2, (W - K + 1) // 2
    taps = [x[:, :, dh:dh + 2 * Hp, dw:dw + 2 * Wp]
            for dh in range(K) for dw in range(K)]             # each (B, C, 2Hp, 2Wp)
    t = jnp.stack(taps, axis=0)                                # (KK, B, C, 2Hp, 2Wp)
    t = t.transpose(2, 0, 1, 3, 4)                             # (C, KK, B, 2Hp, 2Wp)
    t = t.reshape(C * K * K, B, Hp, 2, Wp, 2)                  # (r, b, y, p, x, q)
    t = t.transpose(0, 3, 5, 2, 4, 1)                          # (r, p, q, y, x, b)
    m = Hp * Wp * B
    gw = _round_up(m, 128)
    t = t.reshape(C * K * K, NPOOL, m)
    if gw > m:
        t = jnp.pad(t, ((0, 0), (0, 0), (0, gw - m)))
    return t.reshape(C * K * K, NPOOL * gw), Hp, Wp, gw


def _conv2_pool_patches(a):
    """a: (C, H, W, B) pooled conv1 maps -> (C*K*K, 4*GW2) conv2 patches.

    Group lane order: (u*Wp2 + v)*B + b — contiguous per-pixel B-lane slices so the
    fused kernel's fc1 loop needs no relayout."""
    C, H, W, B = a.shape
    Hp, Wp = (H - K + 1) // 2, (W - K + 1) // 2
    taps = [a[:, dh:dh + 2 * Hp, dw:dw + 2 * Wp, :]
            for dh in range(K) for dw in range(K)]             # each (C, 2Hp, 2Wp, B)
    t = jnp.stack(taps, axis=1)                                # (C, KK, 2Hp, 2Wp, B)
    t = t.reshape(C * K * K, Hp, 2, Wp, 2, B)                  # (r, u, p, v, q, b)
    t = t.transpose(0, 2, 4, 1, 3, 5)                          # (r, p, q, u, v, b)
    m = Hp * Wp * B
    gw = _round_up(m, 128)
    t = t.reshape(C * K * K, NPOOL, m)
    if gw > m:
        t = jnp.pad(t, ((0, 0), (0, 0), (0, gw - m)))
    return t.reshape(C * K * K, NPOOL * gw), Hp, Wp, gw


# ------------------------------ forward -------------------------------------

def _forward_batch(x, pp):
    B = x.shape[0]
    c1out = pp["conv1_w2d"].shape[0]
    c2out = pp["conv2_w2d"].shape[0]
    ncls = pp["fc3_w"].shape[0]

    # conv1 block -------------------------------------------------------------
    p1, hp1, wp1, gw1 = _conv1_pool_patches(x)                 # (25, 3584)
    r1 = pp["conv1_w2d"].shape[1]
    y1 = pl.pallas_call(
        conv_relu_pool_kernel,
        out_shape=jax.ShapeDtypeStruct((c1out, gw1), jnp.float32),
        in_specs=[_vmem(), _vmem()],
        out_specs=_vmem(),
        cost_estimate=pl.CostEstimate(
            flops=2 * c1out * r1 * NPOOL * gw1, transcendentals=0,
            bytes_accessed=4 * (p1.size + c1out * r1 + c1out * gw1)),
    )(p1, pp["conv1_w2d"])                                     # (6, 896)

    # kernel-1 output is consumed in its natural (Cout, y, x, b) layout: no transpose.
    a1 = y1[:, :B * hp1 * wp1].reshape(c1out, hp1, wp1, B)     # (6, 14, 14, B)

    # fused conv2 + pool + flatten + MLP ---------------------------------------
    p2, hp2, wp2, gw2 = _conv2_pool_patches(a1)                # (150, 512)
    assert pp["fc1_ws"].shape[0] == hp2 * wp2, "fc1 permutation must match pooled grid"
    assert pp["fc1_ws"].shape[2] == c2out
    r2 = pp["conv2_w2d"].shape[1]
    h1 = pp["fc1_ws"].shape[1]
    h2 = pp["fc2_w"].shape[0]
    flops2 = (2 * c2out * r2 * NPOOL * gw2 + 2 * hp2 * wp2 * h1 * c2out * B
              + 2 * h2 * h1 * B + 2 * ncls * h2 * B)
    bytes2 = 4 * (p2.size + c2out * r2 + pp["fc1_ws"].size + h1 + h2 * h1 + h2
                  + ncls * h2 + ncls + ncls * B)
    out_t = pl.pallas_call(
        conv_pool_mlp_kernel,
        out_shape=jax.ShapeDtypeStruct((ncls, B), jnp.float32),
        in_specs=[_vmem()] * 8,
        out_specs=_vmem(),
        cost_estimate=pl.CostEstimate(flops=flops2, transcendentals=0,
                                      bytes_accessed=bytes2),
    )(p2, pp["conv2_w2d"], pp["fc1_ws"], pp["fc1_b"], pp["fc2_w"], pp["fc2_b"],
      pp["fc3_w"], pp["fc3_b"])
    return out_t                                               # (ncls, B)


@jax.jit
def lenet5_siamese_forward(x1, x2, packed_params):
    n = x1.shape[0]
    x = jnp.concatenate([x1, x2], axis=0)                      # siamese batch fusion
    logits = _forward_batch(x, packed_params).T                # (2n, ncls)
    return logits[:n], logits[n:]


# ------------------------------ params, packing, reference -------------------

def init_params(key, input_channels=1, num_classes=2, feat_dim=16 * 5 * 5):
    # TODO(synk): original module hard-codes feat_dim = 16*53*53 (224x224 inputs);
    # we use the value implied by the forward at the 32x32 demo shape.
    def unif(k, shape, fan_in):
        b = 1.0 / (fan_in ** 0.5)
        return jax.random.uniform(k, shape, jnp.float32, -b, b)
    ks = jax.random.split(key, 8)
    return {
        "conv1_w": unif(ks[0], (6, input_channels, K, K), input_channels * K * K),
        "conv2_w": unif(ks[1], (16, 6, K, K), 6 * K * K),
        "fc1_w": unif(ks[2], (120, feat_dim), feat_dim),
        "fc1_b": unif(ks[3], (120,), feat_dim),
        "fc2_w": unif(ks[4], (84, 120), 120),
        "fc2_b": unif(ks[5], (84,), 120),
        "fc3_w": unif(ks[6], (num_classes, 84), 84),
        "fc3_b": unif(ks[7], (84,), 84)[:num_classes] * 0 + unif(ks[7], (num_classes,), 84),
    }


def pack_params(p):
    """One-time repacking: flatten conv weights; permute fc1 so the flatten matches
    the fused kernel's (channel-sublane, spatial*batch-lane) layout; column biases."""
    c2 = p["conv2_w"].shape[0]
    s2 = p["fc1_w"].shape[1] // c2
    fc1_ws = p["fc1_w"].reshape(-1, c2, s2).transpose(2, 0, 1)   # (S2, 120, 16)
    return {
        "conv1_w2d": p["conv1_w"].reshape(p["conv1_w"].shape[0], -1),
        "conv2_w2d": p["conv2_w"].reshape(c2, -1),
        "fc1_ws": fc1_ws,
        "fc1_b": p["fc1_b"][:, None],
        "fc2_w": p["fc2_w"],
        "fc2_b": p["fc2_b"][:, None],
        "fc3_w": p["fc3_w"],
        "fc3_b": p["fc3_b"][:, None],
    }


def _ref_forward_once(x, p):
    dn = ("NCHW", "OIHW", "NCHW")

    def conv(a, w):
        return lax.conv_general_dilated(a, w, (1, 1), "VALID", dimension_numbers=dn,
                                        precision=lax.Precision.HIGHEST)

    def pool(a):
        n, c, h, w = a.shape
        return a.reshape(n, c, h // 2, 2, w // 2, 2).max(axis=(3, 5))

    mm = lambda a, b: jnp.dot(a, b, precision=lax.Precision.HIGHEST)
    y = pool(jnp.maximum(conv(x, p["conv1_w"]), 0.0))
    y = pool(jnp.maximum(conv(y, p["conv2_w"]), 0.0))
    y = y.reshape(y.shape[0], -1)
    y = jnp.maximum(mm(y, p["fc1_w"].T) + p["fc1_b"], 0.0)
    y = jnp.maximum(mm(y, p["fc2_w"].T) + p["fc2_b"], 0.0)
    return mm(y, p["fc3_w"].T) + p["fc3_b"]


if __name__ == "__main__":
    key = jax.random.PRNGKey(0)
    k_params, k_x1, k_x2 = jax.random.split(key, 3)
    params = init_params(k_params)
    packed = pack_params(params)

    N, C, H, W = 2, 1, 32, 32
    x1 = jax.random.normal(k_x1, (N, C, H, W), jnp.float32)
    x2 = jax.random.normal(k_x2, (N, C, H, W), jnp.float32)

    out1, out2 = lenet5_siamese_forward(x1, x2, packed)
    jax.block_until_ready((out1, out2))

    ref1 = _ref_forward_once(x1, params)
    ref2 = _ref_forward_once(x2, params)
    assert out1.shape == (N, 2) and out2.shape == (N, 2)
    assert jnp.allclose(out1, ref1, atol=2e-2, rtol=2e-2)
    assert jnp.allclose(out2, ref2, atol=2e-2, rtol=2e-2)
    print("KERNEL_OK")
</pallas_src>

<mosaic_0001>
module attributes {stable_mosaic.version = 11 : i64} {
  func.func @conv_relu_pool_kernel(%arg0: memref<25x3584xf32, #tpu.memory_space<vmem>>, %arg1: memref<6x25xf32, #tpu.memory_space<vmem>>, %arg2: memref<6x896xf32, #tpu.memory_space<vmem>>) attributes {dimension_semantics = [], scalar_prefetch = 0 : i64, scratch_operands = 0 : i64, tpu.core_type = #tpu.core_type<tc>} {
    %c0 = arith.constant 0 : index
    %c0_0 = arith.constant 0 : index
    %0 = vector.load %arg1[%c0, %c0_0] : memref<6x25xf32, #tpu.memory_space<vmem>>, vector<6x25xf32>
    %c0_1 = arith.constant 0 : index
    %c0_2 = arith.constant 0 : index
    %1 = vector.load %arg0[%c0_1, %c0_2] : memref<25x3584xf32, #tpu.memory_space<vmem>>, vector<25x3584xf32>
    %cst = arith.constant dense<0.000000e+00> : vector<6x3584xf32>
    %2 = tpu.matmul %0, %1, %cst {dimension_numbers = #tpu.dot_dimension_numbers<[1], [0], [0], [1], [0, 0, 1, 1], [], []>} : vector<6x25xf32>, vector<25x3584xf32>, vector<6x3584xf32> -> vector<6x3584xf32>
    %3 = vector.extract_strided_slice %2 {offsets = [0, 0], sizes = [6, 896], strides = [1, 1]} : vector<6x3584xf32> to vector<6x896xf32>
    %4 = vector.extract_strided_slice %2 {offsets = [0, 896], sizes = [6, 896], strides = [1, 1]} : vector<6x3584xf32> to vector<6x896xf32>
    %5 = arith.maximumf %3, %4 : vector<6x896xf32>
    %6 = vector.extract_strided_slice %2 {offsets = [0, 1792], sizes = [6, 896], strides = [1, 1]} : vector<6x3584xf32> to vector<6x896xf32>
    %7 = vector.extract_strided_slice %2 {offsets = [0, 2688], sizes = [6, 896], strides = [1, 1]} : vector<6x3584xf32> to vector<6x896xf32>
    %8 = arith.maximumf %6, %7 : vector<6x896xf32>
    %9 = arith.maximumf %5, %8 : vector<6x896xf32>
    %cst_3 = arith.constant 0.000000e+00 : f32
    %10 = vector.broadcast %cst_3 : f32 to vector<6x896xf32>
    %11 = arith.maximumf %9, %10 : vector<6x896xf32>
    %c0_4 = arith.constant 0 : index
    %c0_5 = arith.constant 0 : index
    %12 = vector.load %arg2[%c0_4, %c0_5] : memref<6x896xf32, #tpu.memory_space<vmem>>, vector<6x896xf32>
    tpu.vector_store %arg2[%c0_4, %c0_5], %11 {strides = array<i32>} : memref<6x896xf32, #tpu.memory_space<vmem>>, vector<6x896xf32>,
    return
  }
}

module attributes {stable_mosaic.version = 11 : i64} {
  func.func @conv_pool_mlp_kernel(%arg0: memref<150x512xf32, #tpu.memory_space<vmem>>, %arg1: memref<16x150xf32, #tpu.memory_space<vmem>>, %arg2: memref<25x120x16xf32, #tpu.memory_space<vmem>>, %arg3: memref<120x1xf32, #tpu.memory_space<vmem>>, %arg4: memref<84x120xf32, #tpu.memory_space<vmem>>, %arg5: memref<84x1xf32, #tpu.memory_space<vmem>>, %arg6: memref<2x84xf32, #tpu.memory_space<vmem>>, %arg7: memref<2x1xf32, #tpu.memory_space<vmem>>, %arg8: memref<2x4xf32, #tpu.memory_space<vmem>>) attributes {dimension_semantics = [], scalar_prefetch = 0 : i64, scratch_operands = 0 : i64, tpu.core_type = #tpu.core_type<tc>} {
    %c0 = arith.constant 0 : index
    %c0_0 = arith.constant 0 : index
    %0 = vector.load %arg1[%c0, %c0_0] : memref<16x150xf32, #tpu.memory_space<vmem>>, vector<16x150xf32>
    %c0_1 = arith.constant 0 : index
    %c0_2 = arith.constant 0 : index
    %1 = vector.load %arg0[%c0_1, %c0_2] : memref<150x512xf32, #tpu.memory_space<vmem>>, vector<150x512xf32>
    %cst = arith.constant dense<0.000000e+00> : vector<16x512xf32>
    %2 = tpu.matmul %0, %1, %cst {dimension_numbers = #tpu.dot_dimension_numbers<[1], [0], [0], [1], [0, 0, 1, 1], [], []>} : vector<16x150xf32>, vector<150x512xf32>, vector<16x512xf32> -> vector<16x512xf32>
    %3 = vector.extract_strided_slice %2 {offsets = [0, 0], sizes = [16, 128], strides = [1, 1]} : vector<16x512xf32> to vector<16x128xf32>
    %4 = vector.extract_strided_slice %2 {offsets = [0, 128], sizes = [16, 128], strides = [1, 1]} : vector<16x512xf32> to vector<16x128xf32>
    %5 = arith.maximumf %3, %4 : vector<16x128xf32>
    %6 = vector.extract_strided_slice %2 {offsets = [0, 256], sizes = [16, 128], strides = [1, 1]} : vector<16x512xf32> to vector<16x128xf32>
    %7 = vector.extract_strided_slice %2 {offsets = [0, 384], sizes = [16, 128], strides = [1, 1]} : vector<16x512xf32> to vector<16x128xf32>
    %8 = arith.maximumf %6, %7 : vector<16x128xf32>
    %9 = arith.maximumf %5, %8 : vector<16x128xf32>
    %cst_3 = arith.constant 0.000000e+00 : f32
    %10 = vector.broadcast %cst_3 : f32 to vector<16x128xf32>
    %11 = arith.maximumf %9, %10 : vector<16x128xf32>
    %cst_4 = arith.constant 0.000000e+00 : f32
    %12 = vector.broadcast %cst_4 : f32 to vector<120x4xf32>
    %c0_5 = arith.constant 0 : index
    %c0_6 = arith.constant 0 : index
    %c0_7 = arith.constant 0 : index
    %13 = vector.load %arg2[%c0_5, %c0_6, %c0_7] : memref<25x120x16xf32, #tpu.memory_space<vmem>>, vector<1x120x16xf32>
    %14 = vector.shape_cast %13 : vector<1x120x16xf32> to vector<120x16xf32>
    %15 = vector.extract_strided_slice %11 {offsets = [0, 0], sizes = [16, 4], strides = [1, 1]} : vector<16x128xf32> to vector<16x4xf32>
    %cst_8 = arith.constant dense<0.000000e+00> : vector<120x4xf32>
    %16 = tpu.matmul %14, %15, %cst_8 {dimension_numbers = #tpu.dot_dimension_numbers<[1], [0], [0], [1], [0, 0, 1, 1], [], []>} : vector<120x16xf32>, vector<16x4xf32>, vector<120x4xf32> -> vector<120x4xf32>
    %17 = arith.addf %12, %16 : vector<120x4xf32>
    %c1 = arith.constant 1 : index
    %c0_9 = arith.constant 0 : index
    %c0_10 = arith.constant 0 : index
    %18 = vector.load %arg2[%c1, %c0_9, %c0_10] : memref<25x120x16xf32, #tpu.memory_space<vmem>>, vector<1x120x16xf32>
    %19 = vector.shape_cast %18 : vector<1x120x16xf32> to vector<120x16xf32>
    %20 = vector.extract_strided_slice %11 {offsets = [0, 4], sizes = [16, 4], strides = [1, 1]} : vector<16x128xf32> to vector<16x4xf32>
    %cst_11 = arith.constant dense<0.000000e+00> : vector<120x4xf32>
    %21 = tpu.matmul %19, %20, %cst_11 {dimension_numbers = #tpu.dot_dimension_numbers<[1], [0], [0], [1], [0, 0, 1, 1], [], []>} : vector<120x16xf32>, vector<16x4xf32>, vector<120x4xf32> -> vector<120x4xf32>
    %22 = arith.addf %17, %21 : vector<120x4xf32>
    %c2 = arith.constant 2 : index
    %c0_12 = arith.constant 0 : index
    %c0_13 = arith.constant 0 : index
    %23 = vector.load %arg2[%c2, %c0_12, %c0_13] : memref<25x120x16xf32, #tpu.memory_space<vmem>>, vector<1x120x16xf32>
    %24 = vector.shape_cast %23 : vector<1x120x16xf32> to vector<120x16xf32>
    %25 = vector.extract_strided_slice %11 {offsets = [0, 8], sizes = [16, 4], strides = [1, 1]} : vector<16x128xf32> to vector<16x4xf32>
    %cst_14 = arith.constant dense<0.000000e+00> : vector<120x4xf32>
    %26 = tpu.matmul %24, %25, %cst_14 {dimension_numbers = #tpu.dot_dimension_numbers<[1], [0], [0], [1], [0, 0, 1, 1], [], []>} : vector<120x16xf32>, vector<16x4xf32>, vector<120x4xf32> -> vector<120x4xf32>
    %27 = arith.addf %22, %26 : vector<120x4xf32>
    %c3 = arith.constant 3 : index
    %c0_15 = arith.constant 0 : index
    %c0_16 = arith.constant 0 : index
    %28 = vector.load %arg2[%c3, %c0_15, %c0_16] : memref<25x120x16xf32, #tpu.memory_space<vmem>>, vector<1x120x16xf32>
    %29 = vector.shape_cast %28 : vector<1x120x16xf32> to vector<120x16xf32>
    %30 = vector.extract_strided_slice %11 {offsets = [0, 12], sizes = [16, 4], strides = [1, 1]} : vector<16x128xf32> to vector<16x4xf32>
    %cst_17 = arith.constant dense<0.000000e+00> : vector<120x4xf32>
    %31 = tpu.matmul %29, %30, %cst_17 {dimension_numbers = #tpu.dot_dimension_numbers<[1], [0], [0], [1], [0, 0, 1, 1], [], []>} : vector<120x16xf32>, vector<16x4xf32>, vector<120x4xf32> -> vector<120x4xf32>
    %32 = arith.addf %27, %31 : vector<120x4xf32>
    %c4 = arith.constant 4 : index
    %c0_18 = arith.constant 0 : index
    %c0_19 = arith.constant 0 : index
    %33 = vector.load %arg2[%c4, %c0_18, %c0_19] : memref<25x120x16xf32, #tpu.memory_space<vmem>>, vector<1x120x16xf32>
    %34 = vector.shape_cast %33 : vector<1x120x16xf32> to vector<120x16xf32>
    %35 = vector.extract_strided_slice %11 {offsets = [0, 16], sizes = [16, 4], strides = [1, 1]} : vector<16x128xf32> to vector<16x4xf32>
    %cst_20 = arith.constant dense<0.000000e+00> : vector<120x4xf32>
    %36 = tpu.matmul %34, %35, %cst_20 {dimension_numbers = #tpu.dot_dimension_numbers<[1], [0], [0], [1], [0, 0, 1, 1], [], []>} : vector<120x16xf32>, vector<16x4xf32>, vector<120x4xf32> -> vector<120x4xf32>
    %37 = arith.addf %32, %36 : vector<120x4xf32>
    %c5 = arith.constant 5 : index
    %c0_21 = arith.constant 0 : index
    %c0_22 = arith.constant 0 : index
    %38 = vector.load %arg2[%c5, %c0_21, %c0_22] : memref<25x120x16xf32, #tpu.memory_space<vmem>>, vector<1x120x16xf32>
    %39 = vector.shape_cast %38 : vector<1x120x16xf32> to vector<120x16xf32>
    %40 = vector.extract_strided_slice %11 {offsets = [0, 20], sizes = [16, 4], strides = [1, 1]} : vector<16x128xf32> to vector<16x4xf32>
    %cst_23 = arith.constant dense<0.000000e+00> : vector<120x4xf32>
    %41 = tpu.matmul %39, %40, %cst_23 {dimension_numbers = #tpu.dot_dimension_numbers<[1], [0], [0], [1], [0, 0, 1, 1], [], []>} : vector<120x16xf32>, vector<16x4xf32>, vector<120x4xf32> -> vector<120x4xf32>
    %42 = arith.addf %37, %41 : vector<120x4xf32>
    %c6 = arith.constant 6 : index
    %c0_24 = arith.constant 0 : index
    %c0_25 = arith.constant 0 : index
    %43 = vector.load %arg2[%c6, %c0_24, %c0_25] : memref<25x120x16xf32, #tpu.memory_space<vmem>>, vector<1x120x16xf32>
    %44 = vector.shape_cast %43 : vector<1x120x16xf32> to vector<120x16xf32>
    %45 = vector.extract_strided_slice %11 {offsets = [0, 24], sizes = [16, 4], strides = [1, 1]} : vector<16x128xf32> to vector<16x4xf32>
    %cst_26 = arith.constant dense<0.000000e+00> : vector<120x4xf32>
    %46 = tpu.matmul %44, %45, %cst_26 {dimension_numbers = #tpu.dot_dimension_numbers<[1], [0], [0], [1], [0, 0, 1, 1], [], []>} : vector<120x16xf32>, vector<16x4xf32>, vector<120x4xf32> -> vector<120x4xf32>
    %47 = arith.addf %42, %46 : vector<120x4xf32>
    %c7 = arith.constant 7 : index
    %c0_27 = arith.constant 0 : index
    %c0_28 = arith.constant 0 : index
    %48 = vector.load %arg2[%c7, %c0_27, %c0_28] : memref<25x120x16xf32, #tpu.memory_space<vmem>>, vector<1x120x16xf32>
    %49 = vector.shape_cast %48 : vector<1x120x16xf32> to vector<120x16xf32>
    %50 = vector.extract_strided_slice %11 {offsets = [0, 28], sizes = [16, 4], strides = [1, 1]} : vector<16x128xf32> to vector<16x4xf32>
    %cst_29 = arith.constant dense<0.000000e+00> : vector<120x4xf32>
    %51 = tpu.matmul %49, %50, %cst_29 {dimension_numbers = #tpu.dot_dimension_numbers<[1], [0], [0], [1], [0, 0, 1, 1], [], []>} : vector<120x16xf32>, vector<16x4xf32>, vector<120x4xf32> -> vector<120x4xf32>
    %52 = arith.addf %47, %51 : vector<120x4xf32>
    %c8 = arith.constant 8 : index
    %c0_30 = arith.constant 0 : index
    %c0_31 = arith.constant 0 : index
    %53 = vector.load %arg2[%c8, %c0_30, %c0_31] : memref<25x120x16xf32, #tpu.memory_space<vmem>>, vector<1x120x16xf32>
    %54 = vector.shape_cast %53 : vector<1x120x16xf32> to vector<120x16xf32>
    %55 = vector.extract_strided_slice %11 {offsets = [0, 32], sizes = [16, 4], strides = [1, 1]} : vector<16x128xf32> to vector<16x4xf32>
    %cst_32 = arith.constant dense<0.000000e+00> : vector<120x4xf32>
    %56 = tpu.matmul %54, %55, %cst_32 {dimension_numbers = #tpu.dot_dimension_numbers<[1], [0], [0], [1], [0, 0, 1, 1], [], []>} : vector<120x16xf32>, vector<16x4xf32>, vector<120x4xf32> -> vector<120x4xf32>
    %57 = arith.addf %52, %56 : vector<120x4xf32>
    %c9 = arith.constant 9 : index
    %c0_33 = arith.constant 0 : index
    %c0_34 = arith.constant 0 : index
    %58 = vector.load %arg2[%c9, %c0_33, %c0_34] : memref<25x120x16xf32, #tpu.memory_space<vmem>>, vector<1x120x16xf32>
    %59 = vector.shape_cast %58 : vector<1x120x16xf32> to vector<120x16xf32>
    %60 = vector.extract_strided_slice %11 {offsets = [0, 36], sizes = [16, 4], strides = [1, 1]} : vector<16x128xf32> to vector<16x4xf32>
    %cst_35 = arith.constant dense<0.000000e+00> : vector<120x4xf32>
    %61 = tpu.matmul %59, %60, %cst_35 {dimension_numbers = #tpu.dot_dimension_numbers<[1], [0], [0], [1], [0, 0, 1, 1], [], []>} : vector<120x16xf32>, vector<16x4xf32>, vector<120x4xf32> -> vector<120x4xf32>
    %62 = arith.addf %57, %61 : vector<120x4xf32>
    %c10 = arith.constant 10 : index
    %c0_36 = arith.constant 0 : index
    %c0_37 = arith.constant 0 : index
    %63 = vector.load %arg2[%c10, %c0_36, %c0_37] : memref<25x120x16xf32, #tpu.memory_space<vmem>>, vector<1x120x16xf32>
    %64 = vector.shape_cast %63 : vector<1x120x16xf32> to vector<120x16xf32>
    %65 = vector.extract_strided_slice %11 {offsets = [0, 40], sizes = [16, 4], strides = [1, 1]} : vector<16x128xf32> to vector<16x4xf32>
    %cst_38 = arith.constant dense<0.000000e+00> : vector<120x4xf32>
    %66 = tpu.matmul %64, %65, %cst_38 {dimension_numbers = #tpu.dot_dimension_numbers<[1], [0], [0], [1], [0, 0, 1, 1], [], []>} : vector<120x16xf32>, vector<16x4xf32>, vector<120x4xf32> -> vector<120x4xf32>
    %67 = arith.addf %62, %66 : vector<120x4xf32>
    %c11 = arith.constant 11 : index
    %c0_39 = arith.constant 0 : index
    %c0_40 = arith.constant 0 : index
    %68 = vector.load %arg2[%c11, %c0_39, %c0_40] : memref<25x120x16xf32, #tpu.memory_space<vmem>>, vector<1x120x16xf32>
    %69 = vector.shape_cast %68 : vector<1x120x16xf32> to vector<120x16xf32>
    %70 = vector.extract_strided_slice %11 {offsets = [0, 44], sizes = [16, 4], strides = [1, 1]} : vector<16x128xf32> to vector<16x4xf32>
    %cst_41 = arith.constant dense<0.000000e+00> : vector<120x4xf32>
    %71 = tpu.matmul %69, %70, %cst_41 {dimension_numbers = #tpu.dot_dimension_numbers<[1], [0], [0], [1], [0, 0, 1, 1], [], []>} : vector<120x16xf32>, vector<16x4xf32>, vector<120x4xf32> -> vector<120x4xf32>
    %72 = arith.addf %67, %71 : vector<120x4xf32>
    %c12 = arith.constant 12 : index
    %c0_42 = arith.constant 0 : index
    %c0_43 = arith.constant 0 : index
    %73 = vector.load %arg2[%c12, %c0_42, %c0_43] : memref<25x120x16xf32, #tpu.memory_space<vmem>>, vector<1x120x16xf32>
    %74 = vector.shape_cast %73 : vector<1x120x16xf32> to vector<120x16xf32>
    %75 = vector.extract_strided_slice %11 {offsets = [0, 48], sizes = [16, 4], strides = [1, 1]} : vector<16x128xf32> to vector<16x4xf32>
    %cst_44 = arith.constant dense<0.000000e+00> : vector<120x4xf32>
    %76 = tpu.matmul %74, %75, %cst_44 {dimension_numbers = #tpu.dot_dimension_numbers<[1], [0], [0], [1], [0, 0, 1, 1], [], []>} : vector<120x16xf32>, vector<16x4xf32>, vector<120x4xf32> -> vector<120x4xf32>
    %77 = arith.addf %72, %76 : vector<120x4xf32>
    %c13 = arith.constant 13 : index
    %c0_45 = arith.constant 0 : index
    %c0_46 = arith.constant 0 : index
    %78 = vector.load %arg2[%c13, %c0_45, %c0_46] : memref<25x120x16xf32, #tpu.memory_space<vmem>>, vector<1x120x16xf32>
    %79 = vector.shape_cast %78 : vector<1x120x16xf32> to vector<120x16xf32>
    %80 = vector.extract_strided_slice %11 {offsets = [0, 52], sizes = [16, 4], strides = [1, 1]} : vector<16x128xf32> to vector<16x4xf32>
    %cst_47 = arith.constant dense<0.000000e+00> : vector<120x4xf32>
    %81 = tpu.matmul %79, %80, %cst_47 {dimension_numbers = #tpu.dot_dimension_numbers<[1], [0], [0], [1], [0, 0, 1, 1], [], []>} : vector<120x16xf32>, vector<16x4xf32>, vector<120x4xf32> -> vector<120x4xf32>
    %82 = arith.addf %77, %81 : vector<120x4xf32>
    %c14 = arith.constant 14 : index
    %c0_48 = arith.constant 0 : index
    %c0_49 = arith.constant 0 : index
    %83 = vector.load %arg2[%c14, %c0_48, %c0_49] : memref<25x120x16xf32, #tpu.memory_space<vmem>>, vector<1x120x16xf32>
    %84 = vector.shape_cast %83 : vector<1x120x16xf32> to vector<120x16xf32>
    %85 = vector.extract_strided_slice %11 {offsets = [0, 56], sizes = [16, 4], strides = [1, 1]} : vector<16x128xf32> to vector<16x4xf32>
    %cst_50 = arith.constant dense<0.000000e+00> : vector<120x4xf32>
    %86 = tpu.matmul %84, %85, %cst_50 {dimension_numbers = #tpu.dot_dimension_numbers<[1], [0], [0], [1], [0, 0, 1, 1], [], []>} : vector<120x16xf32>, vector<16x4xf32>, vector<120x4xf32> -> vector<120x4xf32>
    %87 = arith.addf %82, %86 : vector<120x4xf32>
    %c15 = arith.constant 15 : index
    %c0_51 = arith.constant 0 : index
    %c0_52 = arith.constant 0 : index
    %88 = vector.load %arg2[%c15, %c0_51, %c0_52] : memref<25x120x16xf32, #tpu.memory_space<vmem>>, vector<1x120x16xf32>
    %89 = vector.shape_cast %88 : vector<1x120x16xf32> to vector<120x16xf32>
    %90 = vector.extract_strided_slice %11 {offsets = [0, 60], sizes = [16, 4], strides = [1, 1]} : vector<16x128xf32> to vector<16x4xf32>
    %cst_53 = arith.constant dense<0.000000e+00> : vector<120x4xf32>
    %91 = tpu.matmul %89, %90, %cst_53 {dimension_numbers = #tpu.dot_dimension_numbers<[1], [0], [0], [1], [0, 0, 1, 1], [], []>} : vector<120x16xf32>, vector<16x4xf32>, vector<120x4xf32> -> vector<120x4xf32>
    %92 = arith.addf %87, %91 : vector<120x4xf32>
    %c16 = arith.constant 16 : index
    %c0_54 = arith.constant 0 : index
    %c0_55 = arith.constant 0 : index
    %93 = vector.load %arg2[%c16, %c0_54, %c0_55] : memref<25x120x16xf32, #tpu.memory_space<vmem>>, vector<1x120x16xf32>
    %94 = vector.shape_cast %93 : vector<1x120x16xf32> to vector<120x16xf32>
    %95 = vector.extract_strided_slice %11 {offsets = [0, 64], sizes = [16, 4], strides = [1, 1]} : vector<16x128xf32> to vector<16x4xf32>
    %cst_56 = arith.constant dense<0.000000e+00> : vector<120x4xf32>
    %96 = tpu.matmul %94, %95, %cst_56 {dimension_numbers = #tpu.dot_dimension_numbers<[1], [0], [0], [1], [0, 0, 1, 1], [], []>} : vector<120x16xf32>, vector<16x4xf32>, vector<120x4xf32> -> vector<120x4xf32>
    %97 = arith.addf %92, %96 : vector<120x4xf32>
    %c17 = arith.constant 17 : index
    %c0_57 = arith.constant 0 : index
    %c0_58 = arith.constant 0 : index
    %98 = vector.load %arg2[%c17, %c0_57, %c0_58] : memref<25x120x16xf32, #tpu.memory_space<vmem>>, vector<1x120x16xf32>
    %99 = vector.shape_cast %98 : vector<1x120x16xf32> to vector<120x16xf32>
    %100 = vector.extract_strided_slice %11 {offsets = [0, 68], sizes = [16, 4], strides = [1, 1]} : vector<16x128xf32> to vector<16x4xf32>
    %cst_59 = arith.constant dense<0.000000e+00> : vector<120x4xf32>
    %101 = tpu.matmul %99, %100, %cst_59 {dimension_numbers = #tpu.dot_dimension_numbers<[1], [0], [0], [1], [0, 0, 1, 1], [], []>} : vector<120x16xf32>, vector<16x4xf32>, vector<120x4xf32> -> vector<120x4xf32>
    %102 = arith.addf %97, %101 : vector<120x4xf32>
    %c18 = arith.constant 18 : index
    %c0_60 = arith.constant 0 : index
    %c0_61 = arith.constant 0 : index
    %103 = vector.load %arg2[%c18, %c0_60, %c0_61] : memref<25x120x16xf32, #tpu.memory_space<vmem>>, vector<1x120x16xf32>
    %104 = vector.shape_cast %103 : vector<1x120x16xf32> to vector<120x16xf32>
    %105 = vector.extract_strided_slice %11 {offsets = [0, 72], sizes = [16, 4], strides = [1, 1]} : vector<16x128xf32> to vector<16x4xf32>
    %cst_62 = arith.constant dense<0.000000e+00> : vector<120x4xf32>
    %106 = tpu.matmul %104, %105, %cst_62 {dimension_numbers = #tpu.dot_dimension_numbers<[1], [0], [0], [1], [0, 0, 1, 1], [], []>} : vector<120x16xf32>, vector<16x4xf32>, vector<120x4xf32> -> vector<120x4xf32>
    %107 = arith.addf %102, %106 : vector<120x4xf32>
    %c19 = arith.constant 19 : index
    %c0_63 = arith.constant 0 : index
    %c0_64 = arith.constant 0 : index
    %108 = vector.load %arg2[%c19, %c0_63, %c0_64] : memref<25x120x16xf32, #tpu.memory_space<vmem>>, vector<1x120x16xf32>
    %109 = vector.shape_cast %108 : vector<1x120x16xf32> to vector<120x16xf32>
    %110 = vector.extract_strided_slice %11 {offsets = [0, 76], sizes = [16, 4], strides = [1, 1]} : vector<16x128xf32> to vector<16x4xf32>
    %cst_65 = arith.constant dense<0.000000e+00> : vector<120x4xf32>
    %111 = tpu.matmul %109, %110, %cst_65 {dimension_numbers = #tpu.dot_dimension_numbers<[1], [0], [0], [1], [0, 0, 1, 1], [], []>} : vector<120x16xf32>, vector<16x4xf32>, vector<120x4xf32> -> vector<120x4xf32>
    %112 = arith.addf %107, %111 : vector<120x4xf32>
    %c20 = arith.constant 20 : index
    %c0_66 = arith.constant 0 : index
    %c0_67 = arith.constant 0 : index
    %113 = vector.load %arg2[%c20, %c0_66, %c0_67] : memref<25x120x16xf32, #tpu.memory_space<vmem>>, vector<1x120x16xf32>
    %114 = vector.shape_cast %113 : vector<1x120x16xf32> to vector<120x16xf32>
    %115 = vector.extract_strided_slice %11 {offsets = [0, 80], sizes = [16, 4], strides = [1, 1]} : vector<16x128xf32> to vector<16x4xf32>
    %cst_68 = arith.constant dense<0.000000e+00> : vector<120x4xf32>
    %116 = tpu.matmul %114, %115, %cst_68 {dimension_numbers = #tpu.dot_dimension_numbers<[1], [0], [0], [1], [0, 0, 1, 1], [], []>} : vector<120x16xf32>, vector<16x4xf32>, vector<120x4xf32> -> vector<120x4xf32>
    %117 = arith.addf %112, %116 : vector<120x4xf32>
    %c21 = arith.constant 21 : index
    %c0_69 = arith.constant 0 : index
    %c0_70 = arith.constant 0 : index
    %118 = vector.load %arg2[%c21, %c0_69, %c0_70] : memref<25x120x16xf32, #tpu.memory_space<vmem>>, vector<1x120x16xf32>
    %119 = vector.shape_cast %118 : vector<1x120x16xf32> to vector<120x16xf32>
    %120 = vector.extract_strided_slice %11 {offsets = [0, 84], sizes = [16, 4], strides = [1, 1]} : vector<16x128xf32> to vector<16x4xf32>
    %cst_71 = arith.constant dense<0.000000e+00> : vector<120x4xf32>
    %121 = tpu.matmul %119, %120, %cst_71 {dimension_numbers = #tpu.dot_dimension_numbers<[1], [0], [0], [1], [0, 0, 1, 1], [], []>} : vector<120x16xf32>, vector<16x4xf32>, vector<120x4xf32> -> vector<120x4xf32>
    %122 = arith.addf %117, %121 : vector<120x4xf32>
    %c22 = arith.constant 22 : index
    %c0_72 = arith.constant 0 : index
    %c0_73 = arith.constant 0 : index
    %123 = vector.load %arg2[%c22, %c0_72, %c0_73] : memref<25x120x16xf32, #tpu.memory_space<vmem>>, vector<1x120x16xf32>
    %124 = vector.shape_cast %123 : vector<1x120x16xf32> to vector<120x16xf32>
    %125 = vector.extract_strided_slice %11 {offsets = [0, 88], sizes = [16, 4], strides = [1, 1]} : vector<16x128xf32> to vector<16x4xf32>
    %cst_74 = arith.constant dense<0.000000e+00> : vector<120x4xf32>
    %126 = tpu.matmul %124, %125, %cst_74 {dimension_numbers = #tpu.dot_dimension_numbers<[1], [0], [0], [1], [0, 0, 1, 1], [], []>} : vector<120x16xf32>, vector<16x4xf32>, vector<120x4xf32> -> vector<120x4xf32>
    %127 = arith.addf %122, %126 : vector<120x4xf32>
    %c23 = arith.constant 23 : index
    %c0_75 = arith.constant 0 : index
    %c0_76 = arith.constant 0 : index
    %128 = vector.load %arg2[%c23, %c0_75, %c0_76] : memref<25x120x16xf32, #tpu.memory_space<vmem>>, vector<1x120x16xf32>
    %129 = vector.shape_cast %128 : vector<1x120x16xf32> to vector<120x16xf32>
    %130 = vector.extract_strided_slice %11 {offsets = [0, 92], sizes = [16, 4], strides = [1, 1]} : vector<16x128xf32> to vector<16x4xf32>
    %cst_77 = arith.constant dense<0.000000e+00> : vector<120x4xf32>
    %131 = tpu.matmul %129, %130, %cst_77 {dimension_numbers = #tpu.dot_dimension_numbers<[1], [0], [0], [1], [0, 0, 1, 1], [], []>} : vector<120x16xf32>, vector<16x4xf32>, vector<120x4xf32> -> vector<120x4xf32>
    %132 = arith.addf %127, %131 : vector<120x4xf32>
    %c24 = arith.constant 24 : index
    %c0_78 = arith.constant 0 : index
    %c0_79 = arith.constant 0 : index
    %133 = vector.load %arg2[%c24, %c0_78, %c0_79] : memref<25x120x16xf32, #tpu.memory_space<vmem>>, vector<1x120x16xf32>
    %134 = vector.shape_cast %133 : vector<1x120x16xf32> to vector<120x16xf32>
    %135 = vector.extract_strided_slice %11 {offsets = [0, 96], sizes = [16, 4], strides = [1, 1]} : vector<16x128xf32> to vector<16x4xf32>
    %cst_80 = arith.constant dense<0.000000e+00> : vector<120x4xf32>
    %136 = tpu.matmul %134, %135, %cst_80 {dimension_numbers = #tpu.dot_dimension_numbers<[1], [0], [0], [1], [0, 0, 1, 1], [], []>} : vector<120x16xf32>, vector<16x4xf32>, vector<120x4xf32> -> vector<120x4xf32>
    %137 = arith.addf %132, %136 : vector<120x4xf32>
    %c0_81 = arith.constant 0 : index
    %c0_82 = arith.constant 0 : index
    %138 = vector.load %arg3[%c0_81, %c0_82] : memref<120x1xf32, #tpu.memory_space<vmem>>, vector<120x1xf32>
    %139 = vector.broadcast %138 : vector<120x1xf32> to vector<120x4xf32>
    %140 = arith.addf %137, %139 : vector<120x4xf32>
    %cst_83 = arith.constant 0.000000e+00 : f32
    %141 = vector.broadcast %cst_83 : f32 to vector<120x4xf32>
    %142 = arith.maximumf %140, %141 : vector<120x4xf32>
    %c0_84 = arith.constant 0 : index
    %c0_85 = arith.constant 0 : index
    %143 = vector.load %arg4[%c0_84, %c0_85] : memref<84x120xf32, #tpu.memory_space<vmem>>, vector<84x120xf32>
    %cst_86 = arith.constant dense<0.000000e+00> : vector<84x4xf32>
    %144 = tpu.matmul %143, %142, %cst_86 {dimension_numbers = #tpu.dot_dimension_numbers<[1], [0], [0], [1], [0, 0, 1, 1], [], []>} : vector<84x120xf32>, vector<120x4xf32>, vector<84x4xf32> -> vector<84x4xf32>
    %c0_87 = arith.constant 0 : index
    %c0_88 = arith.constant 0 : index
    %145 = vector.load %arg5[%c0_87, %c0_88] : memref<84x1xf32, #tpu.memory_space<vmem>>, vector<84x1xf32>
    %146 = vector.broadcast %145 : vector<84x1xf32> to vector<84x4xf32>
    %147 = arith.addf %144, %146 : vector<84x4xf32>
    %cst_89 = arith.constant 0.000000e+00 : f32
    %148 = vector.broadcast %cst_89 : f32 to vector<84x4xf32>
    %149 = arith.maximumf %147, %148 : vector<84x4xf32>
    %c0_90 = arith.constant 0 : index
    %c0_91 = arith.constant 0 : index
    %150 = vector.load %arg6[%c0_90, %c0_91] : memref<2x84xf32, #tpu.memory_space<vmem>>, vector<2x84xf32>
    %cst_92 = arith.constant dense<0.000000e+00> : vector<2x4xf32>
    %151 = tpu.matmul %150, %149, %cst_92 {dimension_numbers = #tpu.dot_dimension_numbers<[1], [0], [0], [1], [0, 0, 1, 1], [], []>} : vector<2x84xf32>, vector<84x4xf32>, vector<2x4xf32> -> vector<2x4xf32>
    %c0_93 = arith.constant 0 : index
    %c0_94 = arith.constant 0 : index
    %152 = vector.load %arg7[%c0_93, %c0_94] : memref<2x1xf32, #tpu.memory_space<vmem>>, vector<2x1xf32>
    %153 = vector.broadcast %152 : vector<2x1xf32> to vector<2x4xf32>
    %154 = arith.addf %151, %153 : vector<2x4xf32>
    %c0_95 = arith.constant 0 : index
    %c0_96 = arith.constant 0 : index
    %155 = vector.load %arg8[%c0_95, %c0_96] : memref<2x4xf32, #tpu.memory_space<vmem>>, vector<2x4xf32>
    tpu.vector_store %arg8[%c0_95, %c0_96], %154 {strides = array<i32>} : memref<2x4xf32, #tpu.memory_space<vmem>>, vector<2x4xf32>,
    return
  }
}

</mosaic_0001>

<bundles_post_ra>
// kernel: lenet5_siamese_forward.2
= control target key start
LH: loop header
LB: loop body
LE: loop exit
PB: predicated region body
PF: predicated region fallthrough
CT: control target
= control target key end

     0   :  { %vm128_vm0 = vcmask 1040384   ;;  %v1289_v3 = vmov 0.0   ;;  %vm124_vm1 = vcmask 203776   ;;  %s1737_s0 = inlined_call_operand.vmem [shape: f32[25,3584], index: 0, kind: input, shape index: {}]   ;;  %s1738_s1 = inlined_call_operand.vmem [shape: f32[6,25], index: 1, kind: input, shape index: {}]   ;;  %s1739_s2 = inlined_call_operand.vmem [shape: f32[6,896], index: 2, kind: output, shape index: {}]  }
   0x1   :  { %v97_v0 = vld [vmem:[%s1737_s0 + $0x2a8] sm:$0x1]  ;;  %v99_v1 = vld [vmem:[%s1737_s0 + $0x2b8] sm:$0x1]  ;;  %v96_v2 = vld [vmem:[%s1737_s0 + $0x2a0] sm:$0x1]  ;;  %277 = vmatprep.mubr.f32.mxu0 %v1289_v3  ;;  %348 = vmatprep.mubr.f32.mxu1 %v1289_v3 }
   0x2   :  { %1246 = vmatprep.subr.msk.mxu0 %vm128_vm0, %v97_v0  ;;  %1249 = vmatprep.subr.msk.mxu1 %vm128_vm0, %v99_v1  ;;  %v98_v4 = vld [vmem:[%s1737_s0 + $0x2b0] sm:$0x1]  ;;  %v69_v5 = vld [vmem:[%s1737_s0 + $0x1c8] sm:$0xff]  ;;  %v71_v6 = vld [vmem:[%s1737_s0 + $0x1d8] sm:$0xff] }
   0x3   :  { %1247 = vmatpush1.msk.msra.mxu0 %vm128_vm0, %v96_v2  ;;  %1250 = vmatpush1.msk.msra.mxu1 %vm128_vm0, %v98_v4  ;;  %v68_v7 = vld [vmem:[%s1737_s0 + $0x1c0] sm:$0xff]  ;;  %v70_v8 = vld [vmem:[%s1737_s0 + $0x1d0] sm:$0xff]  ;;  %v41_v9 = vld [vmem:[%s1737_s0 + $0xe8] sm:$0xff] }
   0x4   :  { %239 = vmatprep.subr.mxu0 %v69_v5  ;;  %310 = vmatprep.subr.mxu1 %v71_v6  ;;  %v43_v10 = vld [vmem:[%s1737_s0 + $0xf8] sm:$0xff]  ;;  %v40_v11 = vld [vmem:[%s1737_s0 + $0xe0] sm:$0xff]  ;;  %v42_v12 = vld [vmem:[%s1737_s0 + $0xf0] sm:$0xff] }
   0x5   :  { %240 = vmatpush1.msra.mxu0 %v68_v7  ;;  %311 = vmatpush1.msra.mxu1 %v70_v8  ;;  %v13_v13 = vld [vmem:[%s1737_s0 + $0x8] sm:$0xff]  ;;  %v15_v14 = vld [vmem:[%s1737_s0 + $0x18] sm:$0xff]  ;;  %v12_v15 = vld [vmem:[%s1737_s0] sm:$0xff] }
   0x6   :  { %241 = vmatprep.subr.mxu0 %v41_v9  ;;  %312 = vmatprep.subr.mxu1 %v43_v10  ;;  %v14_v16 = vld [vmem:[%s1737_s0 + $0x10] sm:$0xff]  ;;  %v1362_v17 = vld [vmem:[%s1738_s1] sm:$0x3f]  ;;  %v101_v18 = vld [vmem:[%s1737_s0 + $0x2c8] sm:$0x1] }
   0x7   :  { %242 = vmatpush1.msra.mxu0 %v40_v11  ;;  %313 = vmatpush1.msra.mxu1 %v42_v12  ;;  %v103_v19 = vld [vmem:[%s1737_s0 + $0x2d8] sm:$0x1]  ;;  %v100_v20 = vld [vmem:[%s1737_s0 + $0x2c0] sm:$0x1]  ;;  %v102_v21 = vld [vmem:[%s1737_s0 + $0x2d0] sm:$0x1] }
   0x8   :  { %243 = vmatprep.subr.mxu0 %v13_v13  ;;  %314 = vmatprep.subr.mxu1 %v15_v14  ;;  %v73_v22 = vld [vmem:[%s1737_s0 + $0x1e8] sm:$0xff]  ;;  %v75_v23 = vld [vmem:[%s1737_s0 + $0x1f8] sm:$0xff]  ;;  %v72_v24 = vld [vmem:[%s1737_s0 + $0x1e0] sm:$0xff] }
   0x9   :  { %244 = vmatpush1.msra.mxu0 %v12_v15  ;;  %315 = vmatpush1.msra.mxu1 %v14_v16  ;;  %v74_v25 = vld [vmem:[%s1737_s0 + $0x1f0] sm:$0xff]  ;;  %v45_v26 = vld [vmem:[%s1737_s0 + $0x108] sm:$0xff]  ;;  %v47_v27 = vld [vmem:[%s1737_s0 + $0x118] sm:$0xff] }
   0xa   :  { %1248 = vmatmul.mubr.msk.f32.vlgmr.msra.gmra.mxu0 %vm124_vm1, %v1362_v17  ;;  %1251 = vmatmul.mubr.msk.f32.vlgmr.msra.gmra.mxu1 %vm124_vm1, %v1362_v17  ;;  %v44_v28 = vld [vmem:[%s1737_s0 + $0x100] sm:$0xff]  ;;  %v46_v29 = vld [vmem:[%s1737_s0 + $0x110] sm:$0xff]  ;;  %v17_v30 = vld [vmem:[%s1737_s0 + $0x28] sm:$0xff] }
   0xb   :  { %1252 = vmatprep.subr.msk.mxu0 %vm128_vm0, %v101_v18  ;;  %1255 = vmatprep.subr.msk.mxu1 %vm128_vm0, %v103_v19  ;;  %v19_v31 = vld [vmem:[%s1737_s0 + $0x38] sm:$0xff]  ;;  %v16_v32 = vld [vmem:[%s1737_s0 + $0x20] sm:$0xff]  ;;  %v18_v33 = vld [vmem:[%s1737_s0 + $0x30] sm:$0xff] }
   0xc   :  { %1253 = vmatpush1.msk.msra.mxu0 %vm128_vm0, %v100_v20  ;;  %1256 = vmatpush1.msk.msra.mxu1 %vm128_vm0, %v102_v21  ;;  %v105_v34 = vld [vmem:[%s1737_s0 + $0x2e8] sm:$0x1]  ;;  %v107_v35 = vld [vmem:[%s1737_s0 + $0x2f8] sm:$0x1]  ;;  %v104_v36 = vld [vmem:[%s1737_s0 + $0x2e0] sm:$0x1] }
   0xd   :  { %381 = vmatprep.subr.mxu0 %v73_v22  ;;  %452 = vmatprep.subr.mxu1 %v75_v23  ;;  %v106_v37 = vld [vmem:[%s1737_s0 + $0x2f0] sm:$0x1]  ;;  %v77_v38 = vld [vmem:[%s1737_s0 + $0x208] sm:$0xff]  ;;  %v79_v39 = vld [vmem:[%s1737_s0 + $0x218] sm:$0xff] }
   0xe   :  { %382 = vmatpush1.msra.mxu0 %v72_v24  ;;  %453 = vmatpush1.msra.mxu1 %v74_v25  ;;  %v76_v40 = vld [vmem:[%s1737_s0 + $0x200] sm:$0xff]  ;;  %v78_v41 = vld [vmem:[%s1737_s0 + $0x210] sm:$0xff]  ;;  %v49_v42 = vld [vmem:[%s1737_s0 + $0x128] sm:$0xff] }
   0xf   :  { %383 = vmatprep.subr.mxu0 %v45_v26  ;;  %454 = vmatprep.subr.mxu1 %v47_v27  ;;  %v51_v43 = vld [vmem:[%s1737_s0 + $0x138] sm:$0xff]  ;;  %v48_v44 = vld [vmem:[%s1737_s0 + $0x120] sm:$0xff]  ;;  %v50_v45 = vld [vmem:[%s1737_s0 + $0x130] sm:$0xff] }
  0x10   :  { %384 = vmatpush1.msra.mxu0 %v44_v28  ;;  %455 = vmatpush1.msra.mxu1 %v46_v29  ;;  %v21_v46 = vld [vmem:[%s1737_s0 + $0x48] sm:$0xff]  ;;  %v23_v47 = vld [vmem:[%s1737_s0 + $0x58] sm:$0xff]  ;;  %v20_v48 = vld [vmem:[%s1737_s0 + $0x40] sm:$0xff] }
  0x11   :  { %385 = vmatprep.subr.mxu0 %v17_v30  ;;  %456 = vmatprep.subr.mxu1 %v19_v31  ;;  %v22_v49 = vld [vmem:[%s1737_s0 + $0x50] sm:$0xff]  ;;  %v109_v50 = vld [vmem:[%s1737_s0 + $0x308] sm:$0x1]  ;;  %v111_v51 = vld [vmem:[%s1737_s0 + $0x318] sm:$0x1] }
  0x12   :  { %386 = vmatpush1.msra.mxu0 %v16_v32  ;;  %419 = vmatprep.mubr.f32.mxu0 %v1289_v3  ;;  %v108_v52 = vld [vmem:[%s1737_s0 + $0x300] sm:$0x1]  ;;  %v110_v53 = vld [vmem:[%s1737_s0 + $0x310] sm:$0x1]  ;;  %v81_v54 = vld [vmem:[%s1737_s0 + $0x228] sm:$0xff] }
  0x13   :  { %457 = vmatpush1.msra.mxu1 %v18_v33  ;;  %490 = vmatprep.mubr.f32.mxu1 %v1289_v3  ;;  %v83_v55 = vld [vmem:[%s1737_s0 + $0x238] sm:$0xff]  ;;  %v80_v56 = vld [vmem:[%s1737_s0 + $0x220] sm:$0xff]  ;;  %v82_v57 = vld [vmem:[%s1737_s0 + $0x230] sm:$0xff] }
  0x14   :  { %1254 = vmatmul.mubr.msk.f32.vlgmr.msra.gmra.mxu0 %vm124_vm1, %v1362_v17  ;;  %1257 = vmatmul.mubr.msk.f32.vlgmr.msra.gmra.mxu1 %vm124_vm1, %v1362_v17  ;;  %v53_v58 = vld [vmem:[%s1737_s0 + $0x148] sm:$0xff]  ;;  %v55_v59 = vld [vmem:[%s1737_s0 + $0x158] sm:$0xff]  ;;  %v52_v60 = vld [vmem:[%s1737_s0 + $0x140] sm:$0xff] }
  0x15   :  { %1258 = vmatprep.subr.msk.mxu0 %vm128_vm0, %v105_v34  ;;  %1261 = vmatprep.subr.msk.mxu1 %vm128_vm0, %v107_v35  ;;  %v54_v61 = vld [vmem:[%s1737_s0 + $0x150] sm:$0xff]  ;;  %v25_v62 = vld [vmem:[%s1737_s0 + $0x68] sm:$0xff]  ;;  %v27_v63 = vld [vmem:[%s1737_s0 + $0x78] sm:$0xff] }
  0x16   :  { %1259 = vmatpush1.msk.msra.mxu0 %vm128_vm0, %v104_v36  ;;  %1262 = vmatpush1.msk.msra.mxu1 %vm128_vm0, %v106_v37  ;;  %v24_v0 = vld [vmem:[%s1737_s0 + $0x60] sm:$0xff]  ;;  %v26_v1 = vld [vmem:[%s1737_s0 + $0x70] sm:$0xff]  ;;  %v113_v2 = vld [vmem:[%s1737_s0 + $0x328] sm:$0x1] }
  0x17   :  { %523 = vmatprep.subr.mxu0 %v77_v38  ;;  %594 = vmatprep.subr.mxu1 %v79_v39  ;;  %v115_v4 = vld [vmem:[%s1737_s0 + $0x338] sm:$0x1]  ;;  %v112_v5 = vld [vmem:[%s1737_s0 + $0x320] sm:$0x1]  ;;  %v114_v6 = vld [vmem:[%s1737_s0 + $0x330] sm:$0x1] }
  0x18   :  { %524 = vmatpush1.msra.mxu0 %v76_v40  ;;  %595 = vmatpush1.msra.mxu1 %v78_v41  ;;  %v85_v7 = vld [vmem:[%s1737_s0 + $0x248] sm:$0xff]  ;;  %v87_v8 = vld [vmem:[%s1737_s0 + $0x258] sm:$0xff]  ;;  %v84_v9 = vld [vmem:[%s1737_s0 + $0x240] sm:$0xff] }
  0x19   :  { %525 = vmatprep.subr.mxu0 %v49_v42  ;;  %596 = vmatprep.subr.mxu1 %v51_v43  ;;  %v86_v10 = vld [vmem:[%s1737_s0 + $0x250] sm:$0xff]  ;;  %v57_v11 = vld [vmem:[%s1737_s0 + $0x168] sm:$0xff]  ;;  %v59_v12 = vld [vmem:[%s1737_s0 + $0x178] sm:$0xff] }
  0x1a   :  { %526 = vmatpush1.msra.mxu0 %v48_v44  ;;  %597 = vmatpush1.msra.mxu1 %v50_v45  ;;  %v56_v13 = vld [vmem:[%s1737_s0 + $0x160] sm:$0xff]  ;;  %v58_v14 = vld [vmem:[%s1737_s0 + $0x170] sm:$0xff]  ;;  %v29_v15 = vld [vmem:[%s1737_s0 + $0x88] sm:$0xff] }
  0x1b   :  { %527 = vmatprep.subr.mxu0 %v21_v46  ;;  %598 = vmatprep.subr.mxu1 %v23_v47  ;;  %v31_v16 = vld [vmem:[%s1737_s0 + $0x98] sm:$0xff]  ;;  %v28_v18 = vld [vmem:[%s1737_s0 + $0x80] sm:$0xff]  ;;  %v30_v19 = vld [vmem:[%s1737_s0 + $0x90] sm:$0xff] }
  0x1c   :  { %528 = vmatpush1.msra.mxu0 %v20_v48  ;;  %561 = vmatprep.mubr.f32.mxu0 %v1289_v3  ;;  %v117_v20 = vld [vmem:[%s1737_s0 + $0x348] sm:$0x1]  ;;  %v119_v21 = vld [vmem:[%s1737_s0 + $0x358] sm:$0x1]  ;;  %v116_v22 = vld [vmem:[%s1737_s0 + $0x340] sm:$0x1] }
  0x1d   :  { %599 = vmatpush1.msra.mxu1 %v22_v49  ;;  %632 = vmatprep.mubr.f32.mxu1 %v1289_v3  ;;  %v118_v23 = vld [vmem:[%s1737_s0 + $0x350] sm:$0x1]  ;;  %v89_v24 = vld [vmem:[%s1737_s0 + $0x268] sm:$0xff]  ;;  %v91_v25 = vld [vmem:[%s1737_s0 + $0x278] sm:$0xff] }
  0x1e   :  { %1260 = vmatmul.mubr.msk.f32.vlgmr.msra.gmra.mxu0 %vm124_vm1, %v1362_v17  ;;  %1263 = vmatmul.mubr.msk.f32.vlgmr.msra.gmra.mxu1 %vm124_vm1, %v1362_v17  ;;  %v88_v26 = vld [vmem:[%s1737_s0 + $0x260] sm:$0xff]  ;;  %v90_v27 = vld [vmem:[%s1737_s0 + $0x270] sm:$0xff]  ;;  %v61_v28 = vld [vmem:[%s1737_s0 + $0x188] sm:$0xff] }
  0x1f   :  { %1264 = vmatprep.subr.msk.mxu0 %vm128_vm0, %v109_v50  ;;  %1267 = vmatprep.subr.msk.mxu1 %vm128_vm0, %v111_v51  ;;  %v63_v29 = vld [vmem:[%s1737_s0 + $0x198] sm:$0xff]  ;;  %v60_v30 = vld [vmem:[%s1737_s0 + $0x180] sm:$0xff]  ;;  %v62_v31 = vld [vmem:[%s1737_s0 + $0x190] sm:$0xff] }
  0x20   :  { %1265 = vmatpush1.msk.msra.mxu0 %vm128_vm0, %v108_v52  ;;  %1268 = vmatpush1.msk.msra.mxu1 %vm128_vm0, %v110_v53  ;;  %v33_v32 = vld [vmem:[%s1737_s0 + $0xa8] sm:$0xff]  ;;  %v35_v33 = vld [vmem:[%s1737_s0 + $0xb8] sm:$0xff]  ;;  %v32_v34 = vld [vmem:[%s1737_s0 + $0xa0] sm:$0xff] }
  0x21   :  { %665 = vmatprep.subr.mxu0 %v81_v54  ;;  %736 = vmatprep.subr.mxu1 %v83_v55  ;;  %v34_v35 = vld [vmem:[%s1737_s0 + $0xb0] sm:$0xff]  ;;  %v121_v36 = vld [vmem:[%s1737_s0 + $0x368] sm:$0x1]  ;;  %v123_v37 = vld [vmem:[%s1737_s0 + $0x378] sm:$0x1] }
  0x22   :  { %666 = vmatpush1.msra.mxu0 %v80_v56  ;;  %737 = vmatpush1.msra.mxu1 %v82_v57  ;;  %v120_v38 = vld [vmem:[%s1737_s0 + $0x360] sm:$0x1]  ;;  %v122_v39 = vld [vmem:[%s1737_s0 + $0x370] sm:$0x1]  ;;  %v93_v40 = vld [vmem:[%s1737_s0 + $0x288] sm:$0xff] }
  0x23   :  { %667 = vmatprep.subr.mxu0 %v53_v58  ;;  %738 = vmatprep.subr.mxu1 %v55_v59  ;;  %v95_v41 = vld [vmem:[%s1737_s0 + $0x298] sm:$0xff]  ;;  %v92_v42 = vld [vmem:[%s1737_s0 + $0x280] sm:$0xff]  ;;  %v94_v43 = vld [vmem:[%s1737_s0 + $0x290] sm:$0xff] }
  0x24   :  { %668 = vmatpush1.msra.mxu0 %v52_v60  ;;  %739 = vmatpush1.msra.mxu1 %v54_v61  ;;  %v65_v44 = vld [vmem:[%s1737_s0 + $0x1a8] sm:$0xff]  ;;  %v67_v45 = vld [vmem:[%s1737_s0 + $0x1b8] sm:$0xff]  ;;  %v64_v46 = vld [vmem:[%s1737_s0 + $0x1a0] sm:$0xff] }
  0x25   :  { %669 = vmatprep.subr.mxu0 %v25_v62  ;;  %740 = vmatprep.subr.mxu1 %v27_v63  ;;  %v66_v47 = vld [vmem:[%s1737_s0 + $0x1b0] sm:$0xff]  ;;  %v37_v48 = vld [vmem:[%s1737_s0 + $0xc8] sm:$0xff]  ;;  %v39_v49 = vld [vmem:[%s1737_s0 + $0xd8] sm:$0xff] }
  0x26   :  { %670 = vmatpush1.msra.mxu0 %v24_v0  ;;  %703 = vmatprep.mubr.f32.mxu0 %v1289_v3  ;;  %v36_v50 = vld [vmem:[%s1737_s0 + $0xc0] sm:$0xff]  ;;  %v38_v51 = vld [vmem:[%s1737_s0 + $0xd0] sm:$0xff] }
  0x27   :  { %741 = vmatpush1.msra.mxu1 %v26_v1  ;;  %774 = vmatprep.mubr.f32.mxu1 %v1289_v3 }
  0x28   :  { %1266 = vmatmul.mubr.msk.f32.vlgmr.msra.gmra.mxu0 %vm124_vm1, %v1362_v17  ;;  %1269 = vmatmul.mubr.msk.f32.vlgmr.msra.gmra.mxu1 %vm124_vm1, %v1362_v17 }
  0x29   :  { %1270 = vmatprep.subr.msk.mxu0 %vm128_vm0, %v113_v2  ;;  %1273 = vmatprep.subr.msk.mxu1 %vm128_vm0, %v115_v4 }
  0x2a   :  { %1271 = vmatpush1.msk.msra.mxu0 %vm128_vm0, %v112_v5  ;;  %1274 = vmatpush1.msk.msra.mxu1 %vm128_vm0, %v114_v6 }
  0x2b   :  { %807 = vmatprep.subr.mxu0 %v85_v7  ;;  %878 = vmatprep.subr.mxu1 %v87_v8 }
  0x2c   :  { %808 = vmatpush1.msra.mxu0 %v84_v9  ;;  %879 = vmatpush1.msra.mxu1 %v86_v10 }
  0x2d   :  { %809 = vmatprep.subr.mxu0 %v57_v11  ;;  %880 = vmatprep.subr.mxu1 %v59_v12 }
  0x2e   :  { %810 = vmatpush1.msra.mxu0 %v56_v13  ;;  %881 = vmatpush1.msra.mxu1 %v58_v14 }
  0x2f   :  { %811 = vmatprep.subr.mxu0 %v29_v15  ;;  %882 = vmatprep.subr.mxu1 %v31_v16 }
  0x30   :  { %812 = vmatpush1.msra.mxu0 %v28_v18  ;;  %845 = vmatprep.mubr.f32.mxu0 %v1289_v3 }
  0x31   :  { %883 = vmatpush1.msra.mxu1 %v30_v19  ;;  %916 = vmatprep.mubr.f32.mxu1 %v1289_v3 }
  0x32   :  { %1272 = vmatmul.mubr.msk.f32.vlgmr.msra.gmra.mxu0 %vm124_vm1, %v1362_v17  ;;  %1275 = vmatmul.mubr.msk.f32.vlgmr.msra.gmra.mxu1 %vm124_vm1, %v1362_v17 }
  0x33   :  { %1276 = vmatprep.subr.msk.mxu0 %vm128_vm0, %v117_v20  ;;  %1279 = vmatprep.subr.msk.mxu1 %vm128_vm0, %v119_v21 }
  0x34   :  { %1277 = vmatpush1.msk.msra.mxu0 %vm128_vm0, %v116_v22  ;;  %1280 = vmatpush1.msk.msra.mxu1 %vm128_vm0, %v118_v23 }
  0x35   :  { %949 = vmatprep.subr.mxu0 %v89_v24  ;;  %1020 = vmatprep.subr.mxu1 %v91_v25 }
  0x36   :  { %950 = vmatpush1.msra.mxu0 %v88_v26  ;;  %1021 = vmatpush1.msra.mxu1 %v90_v27 }
  0x37   :  { %951 = vmatprep.subr.mxu0 %v61_v28  ;;  %1022 = vmatprep.subr.mxu1 %v63_v29 }
  0x38   :  { %952 = vmatpush1.msra.mxu0 %v60_v30  ;;  %1023 = vmatpush1.msra.mxu1 %v62_v31 }
  0x39   :  { %953 = vmatprep.subr.mxu0 %v33_v32  ;;  %1024 = vmatprep.subr.mxu1 %v35_v33 }
  0x3a   :  { %954 = vmatpush1.msra.mxu0 %v32_v34  ;;  %987 = vmatprep.mubr.f32.mxu0 %v1289_v3 }
  0x3b   :  { %1025 = vmatpush1.msra.mxu1 %v34_v35  ;;  %1058 = vmatprep.mubr.f32.mxu1 %v1289_v3 }
  0x3c   :  { %1278 = vmatmul.mubr.msk.f32.vlgmr.msra.gmra.mxu0 %vm124_vm1, %v1362_v17  ;;  %1281 = vmatmul.mubr.msk.f32.vlgmr.msra.gmra.mxu1 %vm124_vm1, %v1362_v17 }
  0x3d   :  { %1282 = vmatprep.subr.msk.mxu0 %vm128_vm0, %v121_v36  ;;  %1285 = vmatprep.subr.msk.mxu1 %vm128_vm0, %v123_v37 }
  0x3e   :  { %1283 = vmatpush1.msk.msra.mxu0 %vm128_vm0, %v120_v38  ;;  %1286 = vmatpush1.msk.msra.mxu1 %vm128_vm0, %v122_v39 }
  0x3f   :  { %1091 = vmatprep.subr.mxu0 %v93_v40  ;;  %1162 = vmatprep.subr.mxu1 %v95_v41 }
  0x40   :  { %1092 = vmatpush1.msra.mxu0 %v92_v42  ;;  %1163 = vmatpush1.msra.mxu1 %v94_v43 }
  0x41   :  { %1093 = vmatprep.subr.mxu0 %v65_v44  ;;  %1164 = vmatprep.subr.mxu1 %v67_v45 }
  0x42   :  { %1094 = vmatpush1.msra.mxu0 %v64_v46  ;;  %1165 = vmatpush1.msra.mxu1 %v66_v47 }
  0x43   :  { %1095 = vmatprep.subr.mxu0 %v37_v48  ;;  %1166 = vmatprep.subr.mxu1 %v39_v49 }
  0x44   :  { %1096 = vmatpush1.msra.mxu0 %v36_v50  ;;  %1129 = vmatprep.mubr.f32.mxu0 %v1289_v3 }
  0x45   :  { %1167 = vmatpush1.msra.mxu1 %v38_v51  ;;  %1200 = vmatprep.mubr.f32.mxu1 %v1289_v3 }
  0x46   :  { %1284 = vmatmul.mubr.msk.f32.vlgmr.msra.gmra.mxu0 %vm124_vm1, %v1362_v17  ;;  %1287 = vmatmul.mubr.msk.f32.vlgmr.msra.gmra.mxu1 %vm124_vm1, %v1362_v17 }
  0xca   :  { %v279_v52 = vpop.f32.mrf.mxu0  ;;  %v350_v53 = vpop.f32.mrf.mxu1 }
  0xcc   :  { %v281_v54 = vpop.f32.mrf.mxu0  ;;  %v352_v55 = vpop.f32.mrf.mxu1 }
  0xd4   :  { %v421_v56 = vpop.f32.mrf.mxu0  ;;  %v492_v57 = vpop.f32.mrf.mxu1 }
  0xd6   :  { %v423_v58 = vpop.f32.mrf.mxu0  ;;  %v494_v59 = vpop.f32.mrf.mxu1 }
  0xd7   :  { %v1207_v11 = vmax.f32 %v279_v52, %v494_v59 }
  0xde   :  { %v563_v60 = vpop.f32.mrf.mxu0  ;;  %v634_v61 = vpop.f32.mrf.mxu1 }
  0xdf   :  { %v1208_v9 = vmax.f32 %v281_v54, %v563_v60  ;;  %v1210_v26 = vmax.f32 %v352_v55, %v634_v61 }
  0xe0   :  { %v565_v62 = vpop.f32.mrf.mxu0  ;;  %v636_v63 = vpop.f32.mrf.mxu1 }
  0xe1   :  { %v1209_v14 = vmax.f32 %v350_v53, %v565_v62  ;;  %v1211_v30 = vmax.f32 %v421_v56, %v636_v63 }
  0xe8   :  { %v705_v0 = vpop.f32.mrf.mxu0  ;;  %v776_v3 = vpop.f32.mrf.mxu1 }
  0xe9   :  { %v1212_v27 = vmax.f32 %v423_v58, %v705_v0 }
  0xea   :  { %v707_v1 = vpop.f32.mrf.mxu0  ;;  %v778_v2 = vpop.f32.mrf.mxu1 }
  0xeb   :  { %v1213_v31 = vmax.f32 %v492_v57, %v707_v1 }
  0xf2   :  { %v847_v4 = vpop.f32.mrf.mxu0  ;;  %v918_v5 = vpop.f32.mrf.mxu1 }
  0xf4   :  { %v849_v6 = vpop.f32.mrf.mxu0  ;;  %v920_v17 = vpop.f32.mrf.mxu1 }
  0xfc   :  { %v989_v7 = vpop.f32.mrf.mxu0  ;;  %v1060_v8 = vpop.f32.mrf.mxu1 }
  0xfd   :  { %v1215_v10 = vmax.f32 %v778_v2, %v1060_v8 }
  0xfe   :  { %v991_v12 = vpop.f32.mrf.mxu0  ;;  %v1062_v13 = vpop.f32.mrf.mxu1 }
  0xff   :  { %v1222_v15 = vmax.f32 %v1208_v9, %v1215_v10  ;;  %v1214_v16 = vmax.f32 %v776_v3, %v991_v12  ;;  %v1216_v18 = vmax.f32 %v847_v4, %v1062_v13 }
 0x101   :  { %v1229_v19 = vmax.f32 %v1222_v15, 0.0  ;;  %v1221_v20 = vmax.f32 %v1207_v11, %v1214_v16  ;;  %v1223_v21 = vmax.f32 %v1209_v14, %v1216_v18 }
 0x103   :  { %1236 = vst [vmem:[%s1739_s2 + $0x8] sm:$0x3f] %v1229_v19  ;;  %v1228_v22 = vmax.f32 %v1221_v20, 0.0  ;;  %v1230_v23 = vmax.f32 %v1223_v21, 0.0 }
 0x105   :  { %1235 = vst [vmem:[%s1739_s2] sm:$0x3f] %v1228_v22  ;;  %1237 = vst [vmem:[%s1739_s2 + $0x10] sm:$0x3f] %v1230_v23 }
 0x106   :  { %v1131_v24 = vpop.f32.mrf.mxu0  ;;  %v1202_v25 = vpop.f32.mrf.mxu1 }
 0x107   :  { %v1217_v28 = vmax.f32 %v849_v6, %v1131_v24  ;;  %v1219_v29 = vmax.f32 %v920_v17, %v1202_v25 }
 0x108   :  { %v1133_v32 = vpop.f32.mrf.mxu0  ;;  %v1204_v33 = vpop.f32.mrf.mxu1 }
 0x109   :  { %v1224_v34 = vmax.f32 %v1210_v26, %v1217_v28  ;;  %v1226_v35 = vmax.f32 %v1212_v27, %v1219_v29  ;;  %v1218_v36 = vmax.f32 %v918_v5, %v1133_v32  ;;  %v1220_v37 = vmax.f32 %v989_v7, %v1204_v33 }
 0x10b   :  { %v1231_v38 = vmax.f32 %v1224_v34, 0.0  ;;  %v1233_v39 = vmax.f32 %v1226_v35, 0.0  ;;  %v1225_v40 = vmax.f32 %v1211_v30, %v1218_v36  ;;  %v1227_v41 = vmax.f32 %v1213_v31, %v1220_v37 }
 0x10d   :  { %1238 = vst [vmem:[%s1739_s2 + $0x18] sm:$0x3f] %v1231_v38  ;;  %1240 = vst [vmem:[%s1739_s2 + $0x28] sm:$0x3f] %v1233_v39  ;;  %v1232_v42 = vmax.f32 %v1225_v40, 0.0  ;;  %v1234_v43 = vmax.f32 %v1227_v41, 0.0 }
 0x10f   :  { %1239 = vst [vmem:[%s1739_s2 + $0x20] sm:$0x3f] %v1232_v42  ;;  %1241 = vst [vmem:[%s1739_s2 + $0x30] sm:$0x3f] %v1234_v43 }

// kernel: lenet5_siamese_forward.3
= control target key start
LH: loop header
LB: loop body
LE: loop exit
PB: predicated region body
PF: predicated region fallthrough
CT: control target
= control target key end

     0   :  { %vm116_vm0 = vcmask 1045504   ;;  %vm109_vm1 = vcmask 179200   ;;  %vm8826_vm2 = vmmov 0   ;;  %s8828_s10 = smov 124   ;;  %s8829_s11 = smov 116   ;;  %vm330_vm3 = vcmask 130048   ;;  %s12230_s0 = inlined_call_operand.vmem [shape: f32[150,512], index: 0, kind: input, shape index: {}]   ;;  %s12231_s1 = inlined_call_operand.vmem [shape: f32[16,150], index: 1, kind: input, shape index: {}]   ;;  %s12232_s2 = inlined_call_operand.vmem [shape: f32[25,120,16], index: 2, kind: input, shape index: {}]   ;;  %s12233_s3 = inlined_call_operand.vmem [shape: f32[120,1], index: 3, kind: input, shape index: {}]   ;;  %s12234_s5 = inlined_call_operand.vmem [shape: f32[84,1], index: 5, kind: input, shape index: {}]   ;;  %s12235_s7 = inlined_call_operand.vmem [shape: f32[2,1], index: 7, kind: input, shape index: {}]   ;;  %s12236_s4 = inlined_call_operand.vmem [shape: f32[84,120], index: 4, kind: input, shape index: {}]   ;;  %s12237_s6 = inlined_call_operand.vmem [shape: f32[2,84], index: 6, kind: input, shape index: {}]   ;;  %s12238_s8 = inlined_call_operand.vmem [shape: f32[2,4], index: 8, kind: output, shape index: {}]  }
   0x1   :  { %v94_v0 = vld [vmem:[%s12230_s0 + $0x1e8] sm:$0xff]  ;;  %v96_v1 = vld [vmem:[%s12230_s0 + $0x1f8] sm:$0xff]  ;;  %v93_v2 = vld [vmem:[%s12230_s0 + $0x1e0] sm:$0xff]  ;;  %s8830_s12 = smov 112   ;;  %s8831_s13 = smov 108   ;;  %vm6004_vm4 = vcmask 982016  }
   0x2   :  { %129 = vmatprep.subr.mxu0 %v94_v0  ;;  %206 = vmatprep.subr.mxu1 %v96_v1  ;;  %v95_v3 = vld [vmem:[%s12230_s0 + $0x1f0] sm:$0xff]  ;;  %v90_v4 = vld [vmem:[%s12230_s0 + $0x1c8] sm:$0xff]  ;;  %v92_v5 = vld [vmem:[%s12230_s0 + $0x1d8] sm:$0xff]  ;;  %s8832_s14 = smov 104   ;;  %s8833_s15 = smov 100   ;;  %vm6180_vm5 = vcmask 1043456  }
   0x3   :  { %130 = vmatpush1.msra.mxu0 %v93_v2  ;;  %207 = vmatpush1.msra.mxu1 %v95_v3  ;;  %v89_v6 = vld [vmem:[%s12230_s0 + $0x1c0] sm:$0xff]  ;;  %v91_v7 = vld [vmem:[%s12230_s0 + $0x1d0] sm:$0xff]  ;;  %v86_v8 = vld [vmem:[%s12230_s0 + $0x1a8] sm:$0xff]  ;;  %s8834_s16 = smov 96   ;;  %s8835_s17 = smov 92   ;;  %vm6176_vm6 = vcmask 687104  }
   0x4   :  { %131 = vmatprep.subr.mxu0 %v90_v4  ;;  %208 = vmatprep.subr.mxu1 %v92_v5  ;;  %v88_v9 = vld [vmem:[%s12230_s0 + $0x1b8] sm:$0xff]  ;;  %v85_v10 = vld [vmem:[%s12230_s0 + $0x1a0] sm:$0xff]  ;;  %v87_v11 = vld [vmem:[%s12230_s0 + $0x1b0] sm:$0xff]  ;;  %s8836_s18 = smov 88   ;;  %s8837_s19 = smov 84   ;;  %vm6254_vm7 = vcmask 25600  }
   0x5   :  { %132 = vmatpush1.msra.mxu0 %v89_v6  ;;  %209 = vmatpush1.msra.mxu1 %v91_v7  ;;  %v82_v12 = vld [vmem:[%s12230_s0 + $0x188] sm:$0xff]  ;;  %v84_v13 = vld [vmem:[%s12230_s0 + $0x198] sm:$0xff]  ;;  %v81_v14 = vld [vmem:[%s12230_s0 + $0x180] sm:$0xff]  ;;  %s8838_s20 = smov 80   ;;  %s8839_s21 = smov 76  }
   0x6   :  { %133 = vmatprep.subr.mxu0 %v86_v8  ;;  %210 = vmatprep.subr.mxu1 %v88_v9  ;;  %v83_v15 = vld [vmem:[%s12230_s0 + $0x190] sm:$0xff]  ;;  %v78_v16 = vld [vmem:[%s12230_s0 + $0x168] sm:$0xff]  ;;  %v80_v17 = vld [vmem:[%s12230_s0 + $0x178] sm:$0xff]  ;;  %s8840_s22 = smov 72   ;;  %s8841_s23 = smov 68  }
   0x7   :  { %134 = vmatpush1.msra.mxu0 %v85_v10  ;;  %211 = vmatpush1.msra.mxu1 %v87_v11  ;;  %v77_v18 = vld [vmem:[%s12230_s0 + $0x160] sm:$0xff]  ;;  %v79_v19 = vld [vmem:[%s12230_s0 + $0x170] sm:$0xff]  ;;  %v74_v20 = vld [vmem:[%s12230_s0 + $0x148] sm:$0xff]  ;;  %s8842_s24 = smov 64   ;;  %s8843_s25 = smov 60  }
   0x8   :  { %135 = vmatprep.subr.mxu0 %v82_v12  ;;  %212 = vmatprep.subr.mxu1 %v84_v13  ;;  %v76_v21 = vld [vmem:[%s12230_s0 + $0x158] sm:$0xff]  ;;  %v73_v22 = vld [vmem:[%s12230_s0 + $0x140] sm:$0xff]  ;;  %v75_v23 = vld [vmem:[%s12230_s0 + $0x150] sm:$0xff]  ;;  %s8844_s26 = smov 56   ;;  %s8845_s27 = smov 52  }
   0x9   :  { %136 = vmatpush1.msra.mxu0 %v81_v14  ;;  %213 = vmatpush1.msra.mxu1 %v83_v15  ;;  %v70_v24 = vld [vmem:[%s12230_s0 + $0x128] sm:$0xff]  ;;  %v72_v25 = vld [vmem:[%s12230_s0 + $0x138] sm:$0xff]  ;;  %v69_v26 = vld [vmem:[%s12230_s0 + $0x120] sm:$0xff]  ;;  %s8846_s28 = smov 48   ;;  %s8847_s29 = smov 44  }
   0xa   :  { %137 = vmatprep.subr.mxu0 %v78_v16  ;;  %214 = vmatprep.subr.mxu1 %v80_v17  ;;  %v71_v27 = vld [vmem:[%s12230_s0 + $0x130] sm:$0xff]  ;;  %v66_v28 = vld [vmem:[%s12230_s0 + $0x108] sm:$0xff]  ;;  %v68_v29 = vld [vmem:[%s12230_s0 + $0x118] sm:$0xff]  ;;  %v8825_v16 = vmov 0.0   ;;  %s8848_s30 = smov 40   ;;  %s8849_s9 = smov 36  }
   0xb   :  { %138 = vmatpush1.msra.mxu0 %v77_v18  ;;  %215 = vmatpush1.msra.mxu1 %v79_v19  ;;  %v65_v30 = vld [vmem:[%s12230_s0 + $0x100] sm:$0xff]  ;;  %v67_v31 = vld [vmem:[%s12230_s0 + $0x110] sm:$0xff]  ;;  %v62_v32 = vld [vmem:[%s12230_s0 + $0xe8] sm:$0xff] }
   0xc   :  { %139 = vmatprep.subr.mxu0 %v74_v20  ;;  %216 = vmatprep.subr.mxu1 %v76_v21  ;;  %v64_v33 = vld [vmem:[%s12230_s0 + $0xf8] sm:$0xff]  ;;  %v61_v34 = vld [vmem:[%s12230_s0 + $0xe0] sm:$0xff]  ;;  %v63_v35 = vld [vmem:[%s12230_s0 + $0xf0] sm:$0xff] }
   0xd   :  { %140 = vmatpush1.msra.mxu0 %v73_v22  ;;  %217 = vmatpush1.msra.mxu1 %v75_v23  ;;  %v58_v36 = vld [vmem:[%s12230_s0 + $0xc8] sm:$0xff]  ;;  %v60_v37 = vld [vmem:[%s12230_s0 + $0xd8] sm:$0xff]  ;;  %v57_v38 = vld [vmem:[%s12230_s0 + $0xc0] sm:$0xff] }
   0xe   :  { %141 = vmatprep.subr.mxu0 %v70_v24  ;;  %218 = vmatprep.subr.mxu1 %v72_v25  ;;  %v59_v39 = vld [vmem:[%s12230_s0 + $0xd0] sm:$0xff]  ;;  %v54_v40 = vld [vmem:[%s12230_s0 + $0xa8] sm:$0xff]  ;;  %v56_v41 = vld [vmem:[%s12230_s0 + $0xb8] sm:$0xff] }
   0xf   :  { %142 = vmatpush1.msra.mxu0 %v69_v26  ;;  %219 = vmatpush1.msra.mxu1 %v71_v27  ;;  %v53_v42 = vld [vmem:[%s12230_s0 + $0xa0] sm:$0xff]  ;;  %v55_v43 = vld [vmem:[%s12230_s0 + $0xb0] sm:$0xff]  ;;  %v50_v44 = vld [vmem:[%s12230_s0 + $0x88] sm:$0xff] }
  0x10   :  { %143 = vmatprep.subr.mxu0 %v66_v28  ;;  %220 = vmatprep.subr.mxu1 %v68_v29  ;;  %v52_v45 = vld [vmem:[%s12230_s0 + $0x98] sm:$0xff]  ;;  %v49_v46 = vld [vmem:[%s12230_s0 + $0x80] sm:$0xff]  ;;  %v51_v47 = vld [vmem:[%s12230_s0 + $0x90] sm:$0xff] }
  0x11   :  { %144 = vmatpush1.msra.mxu0 %v65_v30  ;;  %221 = vmatpush1.msra.mxu1 %v67_v31  ;;  %v46_v48 = vld [vmem:[%s12230_s0 + $0x68] sm:$0xff]  ;;  %v48_v49 = vld [vmem:[%s12230_s0 + $0x78] sm:$0xff]  ;;  %v45_v50 = vld [vmem:[%s12230_s0 + $0x60] sm:$0xff] }
  0x12   :  { %145 = vmatprep.subr.mxu0 %v62_v32  ;;  %222 = vmatprep.subr.mxu1 %v64_v33  ;;  %v47_v51 = vld [vmem:[%s12230_s0 + $0x70] sm:$0xff]  ;;  %v42_v52 = vld [vmem:[%s12230_s0 + $0x48] sm:$0xff]  ;;  %v44_v53 = vld [vmem:[%s12230_s0 + $0x58] sm:$0xff] }
  0x13   :  { %146 = vmatpush1.msra.mxu0 %v61_v34  ;;  %223 = vmatpush1.msra.mxu1 %v63_v35  ;;  %v41_v54 = vld [vmem:[%s12230_s0 + $0x40] sm:$0xff]  ;;  %v43_v55 = vld [vmem:[%s12230_s0 + $0x50] sm:$0xff]  ;;  %v38_v56 = vld [vmem:[%s12230_s0 + $0x28] sm:$0xff] }
  0x14   :  { %147 = vmatprep.subr.mxu0 %v58_v36  ;;  %224 = vmatprep.subr.mxu1 %v60_v37  ;;  %v40_v57 = vld [vmem:[%s12230_s0 + $0x38] sm:$0xff]  ;;  %v37_v58 = vld [vmem:[%s12230_s0 + $0x20] sm:$0xff]  ;;  %v39_v59 = vld [vmem:[%s12230_s0 + $0x30] sm:$0xff] }
  0x15   :  { %148 = vmatpush1.msra.mxu0 %v57_v38  ;;  %225 = vmatpush1.msra.mxu1 %v59_v39  ;;  %v34_v60 = vld [vmem:[%s12230_s0 + $0x8] sm:$0xff]  ;;  %v36_v61 = vld [vmem:[%s12230_s0 + $0x18] sm:$0xff]  ;;  %v33_v62 = vld [vmem:[%s12230_s0] sm:$0xff] }
  0x16   :  { %149 = vmatprep.subr.mxu0 %v54_v40  ;;  %226 = vmatprep.subr.mxu1 %v56_v41  ;;  %v35_v63 = vld [vmem:[%s12230_s0 + $0x10] sm:$0xff]  ;;  %v106_v0 = vld [vmem:[%s12230_s0 + $0x248] sm:$0x3f]  ;;  %v108_v1 = vld [vmem:[%s12230_s0 + $0x258] sm:$0x3f] }
  0x17   :  { %150 = vmatpush1.msra.mxu0 %v53_v42  ;;  %227 = vmatpush1.msra.mxu1 %v55_v43  ;;  %v105_v2 = vld [vmem:[%s12230_s0 + $0x240] sm:$0x3f]  ;;  %v107_v3 = vld [vmem:[%s12230_s0 + $0x250] sm:$0x3f]  ;;  %v102_v4 = vld [vmem:[%s12230_s0 + $0x228] sm:$0xff] }
  0x18   :  { %151 = vmatprep.subr.mxu0 %v50_v44  ;;  %228 = vmatprep.subr.mxu1 %v52_v45  ;;  %v104_v5 = vld [vmem:[%s12230_s0 + $0x238] sm:$0xff]  ;;  %v101_v6 = vld [vmem:[%s12230_s0 + $0x220] sm:$0xff]  ;;  %v103_v7 = vld [vmem:[%s12230_s0 + $0x230] sm:$0xff] }
  0x19   :  { %152 = vmatpush1.msra.mxu0 %v49_v46  ;;  %229 = vmatpush1.msra.mxu1 %v51_v47  ;;  %v98_v8 = vld [vmem:[%s12230_s0 + $0x208] sm:$0xff]  ;;  %v100_v9 = vld [vmem:[%s12230_s0 + $0x218] sm:$0xff]  ;;  %v97_v10 = vld [vmem:[%s12230_s0 + $0x200] sm:$0xff] }
  0x1a   :  { %153 = vmatprep.subr.mxu0 %v46_v48  ;;  %230 = vmatprep.subr.mxu1 %v48_v49  ;;  %v30_v11 = vld [vmem:[%s12231_s1 + $0x8] sm:$0xff]  ;;  %v99_v12 = vld [vmem:[%s12230_s0 + $0x210] sm:$0xff]  ;;  %v29_v13 = vld [vmem:[%s12231_s1] sm:$0xff]  ;;  %s8850_s0 = smov 32  }
  0x1b   :  { %154 = vmatpush1.msra.mxu0 %v45_v50  ;;  %231 = vmatpush1.msra.mxu1 %v47_v51  ;;  %v32_v14 = vld [vmem:[%s12231_s1 + $0x18] sm:$0xff]  ;;  %v31_v15 = vld [vmem:[%s12231_s1 + $0x10] sm:$0xff]  ;;  %s8827_s1 = smov 120   ;;  %v6282_v36 = vld [vmem:[%s12232_s2 + $0xe8] sm:$0xff] }
  0x1c   :  { %155 = vmatprep.subr.mxu0 %v42_v52  ;;  %232 = vmatprep.subr.mxu1 %v44_v53  ;;  %v6268_v35 = vld [vmem:[%s12232_s2 + $0x78] sm:$0xff]  ;;  %v6269_v39 = vld [vmem:[%s12232_s2 + $0x80] sm:$0xff]  ;;  %v6270_v42 = vld [vmem:[%s12232_s2 + $0x88] sm:$0xff] }
  0x1d   :  { %156 = vmatpush1.msra.mxu0 %v41_v54  ;;  %233 = vmatpush1.msra.mxu1 %v43_v55  ;;  %v291_v40 = vld [vmem:[%s12232_s2] sm:$0xff]  ;;  %v292_v43 = vld [vmem:[%s12232_s2 + $0x8] sm:$0xff]  ;;  %v6271_v45 = vld [vmem:[%s12232_s2 + $0x90] sm:$0xff] }
  0x1e   :  { %157 = vmatprep.subr.mxu0 %v38_v56  ;;  %234 = vmatprep.subr.mxu1 %v40_v57  ;;  %v293_v46 = vld [vmem:[%s12232_s2 + $0x10] sm:$0xff]  ;;  %v6272_v47 = vld [vmem:[%s12232_s2 + $0x98] sm:$0xff]  ;;  %v6273_v49 = vld [vmem:[%s12232_s2 + $0xa0] sm:$0xff] }
  0x1f   :  { %158 = vmatpush1.msra.mxu0 %v37_v58  ;;  %235 = vmatpush1.msra.mxu1 %v39_v59  ;;  %v294_v48 = vld [vmem:[%s12232_s2 + $0x18] sm:$0xff]  ;;  %v295_v50 = vld [vmem:[%s12232_s2 + $0x20] sm:$0xff]  ;;  %v6274_v51 = vld [vmem:[%s12232_s2 + $0xa8] sm:$0xff] }
  0x20   :  { %159 = vmatprep.subr.mxu0 %v34_v60  ;;  %236 = vmatprep.subr.mxu1 %v36_v61  ;;  %v296_v52 = vld [vmem:[%s12232_s2 + $0x28] sm:$0xff]  ;;  %v6275_v53 = vld [vmem:[%s12232_s2 + $0xb0] sm:$0xff]  ;;  %v6276_v55 = vld [vmem:[%s12232_s2 + $0xb8] sm:$0xff] }
  0x21   :  { %160 = vmatpush1.msra.mxu0 %v33_v62  ;;  %237 = vmatpush1.msra.mxu1 %v35_v63  ;;  %v297_v54 = vld [vmem:[%s12232_s2 + $0x30] sm:$0xff]  ;;  %v298_v56 = vld [vmem:[%s12232_s2 + $0x38] sm:$0xff]  ;;  %v6277_v57 = vld [vmem:[%s12232_s2 + $0xc0] sm:$0xff] }
  0x22   :  { %6260 = vmatprep.subr.msk.mxu0 %vm116_vm0, %v106_v0  ;;  %6264 = vmatprep.subr.msk.mxu1 %vm116_vm0, %v108_v1  ;;  %v299_v58 = vld [vmem:[%s12232_s2 + $0x40] sm:$0xff]  ;;  %v6278_v59 = vld [vmem:[%s12232_s2 + $0xc8] sm:$0xff]  ;;  %v6279_v61 = vld [vmem:[%s12232_s2 + $0xd0] sm:$0xff] }
  0x23   :  { %6261 = vmatpush2.msk.msra.mxu0 %vm116_vm0, %v105_v2  ;;  %6265 = vmatpush2.msk.msra.mxu1 %vm116_vm0, %v107_v3  ;;  %v300_v60 = vld [vmem:[%s12232_s2 + $0x48] sm:$0xff]  ;;  %v301_v62 = vld [vmem:[%s12232_s2 + $0x50] sm:$0xff]  ;;  %v6280_v63 = vld [vmem:[%s12232_s2 + $0xd8] sm:$0xff] }
  0x24   :  { %189 = vmatprep.subr.mxu0 %v102_v4  ;;  %266 = vmatprep.subr.mxu1 %v104_v5  ;;  %v302_v0 = vld [vmem:[%s12232_s2 + $0x58] sm:$0xff]  ;;  %v6281_v1 = vld [vmem:[%s12232_s2 + $0xe0] sm:$0xff]  ;;  %v6313_v3 = vld [vmem:[%s12232_s2 + $0xf0] sm:$0xff] }
  0x25   :  { %190 = vmatpush2.msra.mxu0 %v101_v6  ;;  %267 = vmatpush2.msra.mxu1 %v103_v7  ;;  %v303_v2 = vld [vmem:[%s12232_s2 + $0x60] sm:$0xff]  ;;  %v304_v4 = vld [vmem:[%s12232_s2 + $0x68] sm:$0xff]  ;;  %v6314_v6 = vld [vmem:[%s12232_s2 + $0xf8] sm:$0xff] }
  0x26   :  { %191 = vmatprep.subr.mxu0 %v98_v8  ;;  %268 = vmatprep.subr.mxu1 %v100_v9  ;;  %v305_v8 = vld [vmem:[%s12232_s2 + $0x70] sm:$0xff]  ;;  %v6315_v9 = vld [vmem:[%s12232_s2 + $0x100] sm:$0xff] }
  0x27   :  { %192 = vmatpush2.msra.mxu0 %v97_v10  ;;  %6262 = vmatprep.mubr.msk.f32.mxu0 %vm109_vm1, %v30_v11  ;;  %v6343_v10 = vld [vmem:[%s12232_s2 + $0x168] sm:$0xff] }
  0x28   :  { %269 = vmatpush2.msra.mxu1 %v99_v12  ;;  %6266 = vmatprep.mubr.msk.f32.mxu1 %vm109_vm1, %v30_v11  ;;  %v6316_v12 = vld [vmem:[%s12232_s2 + $0x108] sm:$0xff] }
  0x29   :  { %194 = vmatmul.mubr.f32.vlgmr.msra.gmra.mxu0 %v29_v13  ;;  %271 = vmatmul.mubr.f32.vlgmr.msra.gmra.mxu1 %v29_v13  ;;  %v6344_v13 = vld [vmem:[%s12232_s2 + $0x170] sm:$0xff] }
  0x2a   :  { %6263 = vmatprep.mubr.msk.f32.mxu0 %vm109_vm1, %v32_v14  ;;  %6267 = vmatprep.mubr.msk.f32.mxu1 %vm109_vm1, %v32_v14 }
  0x2b   :  { %7479 = vmatprep.subr.mxu0 %v8825_v16  ;;  %8792 = vmatprep.subr.mxu1 %v8825_v16 }
  0x2d   :  { %200 = vmatmul.mubr.f32.gmra.mxu0 %v31_v15  ;;  %277 = vmatmul.mubr.f32.gmra.mxu1 %v31_v15  ;;  %v6317_v15 = vld [vmem:[%s12232_s2 + $0x110] sm:$0xff] }
  0x2e   :  { %7483 = vmatprep.mubr.msk.f32.mxu0 %vm8826_vm2, %v8825_v16  ;;  %7525 = vmatprep.mubr.msk.f32.mxu1 %vm8826_vm2, %v8825_v16 }
  0xe9   :  { %v195_v17 = vpop.f32.mrf.mxu0  ;;  %v272_v18 = vpop.f32.mrf.mxu1 }
  0xeb   :  { %v197_v19 = vpop.f32.mrf.mxu0  ;;  %v274_v20 = vpop.f32.mrf.mxu1 }
  0xec   :  { %v283_v25 = vmax.f32 %v195_v17, %v197_v19  ;;  %v285_v26 = vmax.f32 %v272_v18, %v274_v20  ;;  %v6345_v17 = vld [vmem:[%s12232_s2 + $0x178] sm:$0xff]  ;;  %v6346_v19 = vld [vmem:[%s12232_s2 + $0x180] sm:$0xff] }
  0xed   :  { %v201_v21 = vpop.f32.mrf.mxu0  ;;  %v278_v22 = vpop.f32.mrf.mxu1  ;;  %v6318_v18 = vld [vmem:[%s12232_s2 + $0x118] sm:$0xff]  ;;  %v6319_v20 = vld [vmem:[%s12232_s2 + $0x120] sm:$0xff] }
  0xee   :  { %v287_v30 = vmax.f32 %v283_v25, %v285_v26  ;;  %v6349_v25 = vld [vmem:[%s12232_s2 + $0x198] sm:$0xff] }
  0xef   :  { %v203_v23 = vpop.f32.mrf.mxu0  ;;  %v280_v24 = vpop.f32.mrf.mxu1  ;;  %v6322_v26 = vld [vmem:[%s12232_s2 + $0x138] sm:$0xff] }
  0xf0   :  { %v284_v27 = vmax.f32 %v201_v21, %v203_v23  ;;  %v286_v28 = vmax.f32 %v278_v22, %v280_v24  ;;  %v9151_v32 = vmax.f32 %v287_v30, 0.0  ;;  %v6347_v21 = vld [vmem:[%s12232_s2 + $0x188] sm:$0xff]  ;;  %v6348_v23 = vld [vmem:[%s12232_s2 + $0x190] sm:$0xff] }
  0xf1   :  { %v6320_v22 = vld [vmem:[%s12232_s2 + $0x128] sm:$0xff]  ;;  %v6321_v24 = vld [vmem:[%s12232_s2 + $0x130] sm:$0xff] }
  0xf2   :  { %v288_v29 = vmax.f32 %v284_v27, %v286_v28  ;;  %v6350_v27 = vld [vmem:[%s12232_s2 + $0x1a0] sm:$0xff]  ;;  %v6324_v30 = vld [vmem:[%s12232_s2 + $0x148] sm:$0xff] }
  0xf3   :  { %v6323_v28 = vld [vmem:[%s12232_s2 + $0x140] sm:$0xff] }
  0xf4   :  { %v9147_v31 = vmax.f32 %v288_v29, 0.0  ;;  %v6351_v29 = vld [vmem:[%s12232_s2 + $0x1a8] sm:$0xff] }
  0xf6   :  { %719 = vrot.lane.b32.xlu1 %v9147_v31, %s8827_s1  ;;  %326 = vrot.lane.b32.xlu0 %v9147_v31, %s8828_s10 }
  0xfa   :  { %717 = vrot.lane.b32.xlu1 %v9151_v32, %s8827_s1  ;;  %324 = vrot.lane.b32.xlu0 %v9151_v32, %s8828_s10 }
  0xfe   :  { %939 = vrot.lane.b32.xlu1 %v9151_v32, %s8829_s11  ;;  %941 = vrot.lane.b32.xlu0 %v9147_v31, %s8829_s11 }
 0x102   :  { %1161 = vrot.lane.b32.xlu1 %v9151_v32, %s8830_s12  ;;  %1163 = vrot.lane.b32.xlu0 %v9147_v31, %s8830_s12 }
 0x106   :  { %1383 = vrot.lane.b32.xlu1 %v9151_v32, %s8831_s13  ;;  %1385 = vrot.lane.b32.xlu0 %v9147_v31, %s8831_s13 }
 0x10a   :  { %1605 = vrot.lane.b32.xlu1 %v9151_v32, %s8832_s14  ;;  %1607 = vrot.lane.b32.xlu0 %v9147_v31, %s8832_s14 }
 0x10e   :  { %1827 = vrot.lane.b32.xlu1 %v9151_v32, %s8833_s15  ;;  %1829 = vrot.lane.b32.xlu0 %v9147_v31, %s8833_s15 }
 0x112   :  { %2049 = vrot.lane.b32.xlu1 %v9151_v32, %s8834_s16  ;;  %2051 = vrot.lane.b32.xlu0 %v9147_v31, %s8834_s16 }
 0x116   :  { %2271 = vrot.lane.b32.xlu1 %v9151_v32, %s8835_s17  ;;  %2273 = vrot.lane.b32.xlu0 %v9147_v31, %s8835_s17 }
 0x11a   :  { %2493 = vrot.lane.b32.xlu1 %v9151_v32, %s8836_s18  ;;  %2495 = vrot.lane.b32.xlu0 %v9147_v31, %s8836_s18 }
 0x11e   :  { %2715 = vrot.lane.b32.xlu1 %v9151_v32, %s8837_s19  ;;  %2717 = vrot.lane.b32.xlu0 %v9147_v31, %s8837_s19 }
 0x122   :  { %2937 = vrot.lane.b32.xlu1 %v9151_v32, %s8838_s20  ;;  %2939 = vrot.lane.b32.xlu0 %v9147_v31, %s8838_s20 }
 0x126   :  { %3159 = vrot.lane.b32.xlu1 %v9151_v32, %s8839_s21  ;;  %3161 = vrot.lane.b32.xlu0 %v9147_v31, %s8839_s21 }
 0x12a   :  { %3381 = vrot.lane.b32.xlu1 %v9151_v32, %s8840_s22  ;;  %3383 = vrot.lane.b32.xlu0 %v9147_v31, %s8840_s22 }
 0x12e   :  { %3603 = vrot.lane.b32.xlu1 %v9151_v32, %s8841_s23  ;;  %3605 = vrot.lane.b32.xlu0 %v9147_v31, %s8841_s23 }
 0x132   :  { %3825 = vrot.lane.b32.xlu1 %v9151_v32, %s8842_s24  ;;  %3827 = vrot.lane.b32.xlu0 %v9147_v31, %s8842_s24 }
 0x136   :  { %4047 = vrot.lane.b32.xlu1 %v9151_v32, %s8843_s25  ;;  %4049 = vrot.lane.b32.xlu0 %v9147_v31, %s8843_s25 }
 0x13a   :  { %4269 = vrot.lane.b32.xlu1 %v9151_v32, %s8844_s26  ;;  %4271 = vrot.lane.b32.xlu0 %v9147_v31, %s8844_s26 }
 0x13e   :  { %4491 = vrot.lane.b32.xlu1 %v9151_v32, %s8845_s27  ;;  %4493 = vrot.lane.b32.xlu0 %v9147_v31, %s8845_s27 }
 0x142   :  { %4713 = vrot.lane.b32.xlu1 %v9151_v32, %s8846_s28  ;;  %4715 = vrot.lane.b32.xlu0 %v9147_v31, %s8846_s28 }
 0x146   :  { %4935 = vrot.lane.b32.xlu1 %v9151_v32, %s8847_s29  ;;  %4937 = vrot.lane.b32.xlu0 %v9147_v31, %s8847_s29 }
 0x14a   :  { %5157 = vrot.lane.b32.xlu1 %v9151_v32, %s8848_s30  ;;  %5159 = vrot.lane.b32.xlu0 %v9147_v31, %s8848_s30 }
 0x14e   :  { %5379 = vrot.lane.b32.xlu1 %v9151_v32, %s8849_s9  ;;  %5381 = vrot.lane.b32.xlu0 %v9147_v31, %s8849_s9 }
 0x152   :  { %5601 = vrot.lane.b32.xlu1 %v9151_v32, %s8850_s0  ;;  %5603 = vrot.lane.b32.xlu0 %v9147_v31, %s8850_s0 }
 0x168   :  { %v327_v33 = vpop.permute.xlu0 %326  ;;  %v720_v34 = vpop.permute.xlu1 %719 }
 0x169   :  { %7480 = vmatpush3.msra.mxu0 %v327_v33  ;;  %8794 = vmatpush3.msra.mxu1 %v327_v33  ;;  %v6353_v33 = vld [vmem:[%s12232_s2 + $0x1b8] sm:$0xff] }
 0x16a   :  { %7481 = vmatprep.subr.mxu0 %v8825_v16  ;;  %8793 = vmatprep.subr.mxu1 %v8825_v16 }
 0x16c   :  { %v325_v37 = vpop.permute.xlu0 %324  ;;  %v718_v38 = vpop.permute.xlu1 %717 }
 0x16d   :  { %7482 = vmatpush3.msra.mxu0 %v325_v37  ;;  %8795 = vmatpush3.msra.mxu1 %v325_v37  ;;  %v6355_v37 = vld [vmem:[%s12232_s2 + $0x1c8] sm:$0xff] }
 0x16e   :  { %7484 = vmatmul.mubr.msk.f32.vlgmr.msra.gmra.mxu0 %vm330_vm3, %v6268_v35  ;;  %7526 = vmatmul.mubr.msk.f32.vlgmr.msra.gmra.mxu1 %vm330_vm3, %v6282_v36  ;;  %v6354_v35 = vld [vmem:[%s12232_s2 + $0x1c0] sm:$0xff] }
 0x16f   :  { %7528 = vmatprep.subr.mxu1 %v8825_v16  ;;  %7577 = vmatprep.subr.mxu0 %v8825_v16  ;;  %v6327_v36 = vld [vmem:[%s12232_s2 + $0x160] sm:$0xff] }
 0x170   :  { %7529 = vmatpush3.msra.mxu1 %v9147_v31  ;;  %7578 = vmatpush3.msra.mxu0 %v720_v34  ;;  %v942_v41 = vpop.permute.xlu0 %941  ;;  %v940_v44 = vpop.permute.xlu1 %939  ;;  %v6352_v31 = vld [vmem:[%s12232_s2 + $0x1b0] sm:$0xff]  ;;  %v6326_v34 = vld [vmem:[%s12232_s2 + $0x158] sm:$0xff] }
 0x171   :  { %7530 = vmatprep.subr.mxu1 %v8825_v16  ;;  %7579 = vmatprep.subr.mxu0 %v8825_v16 }
 0x172   :  { %7486 = vmatprep.mubr.msk.f32.mxu0 %vm8826_vm2, %v8825_v16  ;;  %7531 = vmatpush3.msra.mxu1 %v9151_v32  ;;  %v6325_v32 = vld [vmem:[%s12232_s2 + $0x150] sm:$0xff] }
 0x173   :  { %7532 = vmatprep.mubr.msk.f32.mxu1 %vm8826_vm2, %v8825_v16  ;;  %7580 = vmatpush3.msra.mxu0 %v718_v38  ;;  %v6373_v38 = vld [vmem:[%s12232_s2 + $0x1e0] sm:$0xff] }
 0x174   :  { %7487 = vmatmul.mubr.msk.f32.gmra.mxu0 %vm330_vm3, %v6269_v39  ;;  %7533 = vmatmul.mubr.msk.f32.vlgmr.msra.gmra.mxu1 %vm330_vm3, %v291_v40  ;;  %v1164_v5 = vpop.permute.xlu0 %1163  ;;  %v1162_v7 = vpop.permute.xlu1 %1161  ;;  %v6356_v39 = vld [vmem:[%s12232_s2 + $0x1d0] sm:$0xff] }
 0x175   :  { %7626 = vmatprep.subr.mxu1 %v8825_v16  ;;  %7489 = vmatprep.mubr.msk.f32.mxu0 %vm8826_vm2, %v8825_v16 }
 0x176   :  { %7627 = vmatpush3.msra.mxu1 %v942_v41  ;;  %7535 = vmatprep.mubr.msk.f32.mxu1 %vm8826_vm2, %v8825_v16  ;;  %v6374_v41 = vld [vmem:[%s12232_s2 + $0x1e8] sm:$0xff] }
 0x177   :  { %7628 = vmatprep.subr.mxu1 %v8825_v16  ;;  %7675 = vmatprep.subr.mxu0 %v8825_v16 }
 0x178   :  { %7629 = vmatpush3.msra.mxu1 %v940_v44  ;;  %7490 = vmatmul.mubr.msk.f32.gmra.mxu0 %vm330_vm3, %v6270_v42  ;;  %v1386_v11 = vpop.permute.xlu0 %1385  ;;  %v1384_v14 = vpop.permute.xlu1 %1383  ;;  %v6375_v44 = vld [vmem:[%s12232_s2 + $0x1f0] sm:$0xff] }
 0x179   :  { %7536 = vmatmul.mubr.msk.f32.gmra.mxu1 %vm330_vm3, %v292_v43  ;;  %7492 = vmatprep.mubr.msk.f32.mxu0 %vm8826_vm2, %v8825_v16  ;;  %v6357_v43 = vld [vmem:[%s12232_s2 + $0x1d8] sm:$0xff] }
 0x17a   :  { %7538 = vmatprep.mubr.msk.f32.mxu1 %vm8826_vm2, %v8825_v16  ;;  %7724 = vmatprep.subr.mxu1 %v8825_v16 }
 0x17c   :  { %7493 = vmatmul.mubr.msk.f32.gmra.mxu0 %vm330_vm3, %v6271_v45  ;;  %v1608_v40 = vpop.permute.xlu0 %1607  ;;  %v1606_v42 = vpop.permute.xlu1 %1605  ;;  %v6403_v45 = vld [vmem:[%s12232_s2 + $0x258] sm:$0xff] }
 0x17d   :  { %7539 = vmatmul.mubr.msk.f32.gmra.mxu1 %vm330_vm3, %v293_v46  ;;  %7495 = vmatprep.mubr.msk.f32.mxu0 %vm8826_vm2, %v8825_v16 }
 0x17e   :  { %7541 = vmatprep.mubr.msk.f32.mxu1 %vm8826_vm2, %v8825_v16 }
 0x180   :  { %7496 = vmatmul.mubr.msk.f32.gmra.mxu0 %vm330_vm3, %v6272_v47  ;;  %v1830_v46 = vpop.permute.xlu0 %1829  ;;  %v6376_v47 = vld [vmem:[%s12232_s2 + $0x1f8] sm:$0xff] }
 0x181   :  { %7542 = vmatmul.mubr.msk.f32.gmra.mxu1 %vm330_vm3, %v294_v48  ;;  %7498 = vmatprep.mubr.msk.f32.mxu0 %vm8826_vm2, %v8825_v16  ;;  %v6404_v48 = vld [vmem:[%s12232_s2 + $0x260] sm:$0xff] }
 0x182   :  { %7544 = vmatprep.mubr.msk.f32.mxu1 %vm8826_vm2, %v8825_v16 }
 0x184   :  { %7499 = vmatmul.mubr.msk.f32.gmra.mxu0 %vm330_vm3, %v6273_v49  ;;  %v1828_v49 = vpop.permute.xlu1 %1827 }
 0x185   :  { %7545 = vmatmul.mubr.msk.f32.gmra.mxu1 %vm330_vm3, %v295_v50  ;;  %7501 = vmatprep.mubr.msk.f32.mxu0 %vm8826_vm2, %v8825_v16  ;;  %v6377_v50 = vld [vmem:[%s12232_s2 + $0x200] sm:$0xff] }
 0x186   :  { %7547 = vmatprep.mubr.msk.f32.mxu1 %vm8826_vm2, %v8825_v16 }
 0x188   :  { %7502 = vmatmul.mubr.msk.f32.gmra.mxu0 %vm330_vm3, %v6274_v51  ;;  %v6405_v51 = vld [vmem:[%s12232_s2 + $0x268] sm:$0xff] }
 0x189   :  { %7548 = vmatmul.mubr.msk.f32.gmra.mxu1 %vm330_vm3, %v296_v52  ;;  %7504 = vmatprep.mubr.msk.f32.mxu0 %vm8826_vm2, %v8825_v16  ;;  %v6378_v52 = vld [vmem:[%s12232_s2 + $0x208] sm:$0xff] }
 0x18a   :  { %7550 = vmatprep.mubr.msk.f32.mxu1 %vm8826_vm2, %v8825_v16 }
 0x18c   :  { %7505 = vmatmul.mubr.msk.f32.gmra.mxu0 %vm330_vm3, %v6275_v53  ;;  %v6406_v53 = vld [vmem:[%s12232_s2 + $0x270] sm:$0xff] }
 0x18d   :  { %7551 = vmatmul.mubr.msk.f32.gmra.mxu1 %vm330_vm3, %v297_v54  ;;  %7507 = vmatprep.mubr.msk.f32.mxu0 %vm8826_vm2, %v8825_v16  ;;  %v6379_v54 = vld [vmem:[%s12232_s2 + $0x210] sm:$0xff] }
 0x18e   :  { %7553 = vmatprep.mubr.msk.f32.mxu1 %vm8826_vm2, %v8825_v16 }
 0x190   :  { %7508 = vmatmul.mubr.msk.f32.gmra.mxu0 %vm330_vm3, %v6276_v55  ;;  %v6407_v55 = vld [vmem:[%s12232_s2 + $0x278] sm:$0xff] }
 0x191   :  { %7554 = vmatmul.mubr.msk.f32.gmra.mxu1 %vm330_vm3, %v298_v56  ;;  %7510 = vmatprep.mubr.msk.f32.mxu0 %vm8826_vm2, %v8825_v16  ;;  %v6380_v56 = vld [vmem:[%s12232_s2 + $0x218] sm:$0xff] }
 0x192   :  { %7556 = vmatprep.mubr.msk.f32.mxu1 %vm8826_vm2, %v8825_v16 }
 0x194   :  { %7511 = vmatmul.mubr.msk.f32.gmra.mxu0 %vm330_vm3, %v6277_v57  ;;  %v6408_v57 = vld [vmem:[%s12232_s2 + $0x280] sm:$0xff] }
 0x195   :  { %7557 = vmatmul.mubr.msk.f32.gmra.mxu1 %vm330_vm3, %v299_v58  ;;  %7513 = vmatprep.mubr.msk.f32.mxu0 %vm8826_vm2, %v8825_v16  ;;  %v6381_v58 = vld [vmem:[%s12232_s2 + $0x220] sm:$0xff] }
 0x196   :  { %7559 = vmatprep.mubr.msk.f32.mxu1 %vm8826_vm2, %v8825_v16 }
 0x198   :  { %7514 = vmatmul.mubr.msk.f32.gmra.mxu0 %vm330_vm3, %v6278_v59  ;;  %v6409_v59 = vld [vmem:[%s12232_s2 + $0x288] sm:$0xff] }
 0x199   :  { %7560 = vmatmul.mubr.msk.f32.gmra.mxu1 %vm330_vm3, %v300_v60  ;;  %7516 = vmatprep.mubr.msk.f32.mxu0 %vm8826_vm2, %v8825_v16  ;;  %v6382_v60 = vld [vmem:[%s12232_s2 + $0x228] sm:$0xff] }
 0x19a   :  { %7562 = vmatprep.mubr.msk.f32.mxu1 %vm8826_vm2, %v8825_v16 }
 0x19c   :  { %7517 = vmatmul.mubr.msk.f32.gmra.mxu0 %vm330_vm3, %v6279_v61  ;;  %v6410_v61 = vld [vmem:[%s12232_s2 + $0x290] sm:$0xff] }
 0x19d   :  { %7563 = vmatmul.mubr.msk.f32.gmra.mxu1 %vm330_vm3, %v301_v62  ;;  %7519 = vmatprep.mubr.msk.f32.mxu0 %vm8826_vm2, %v8825_v16  ;;  %v6383_v62 = vld [vmem:[%s12232_s2 + $0x230] sm:$0xff] }
 0x19e   :  { %7565 = vmatprep.mubr.msk.f32.mxu1 %vm8826_vm2, %v8825_v16 }
 0x1a0   :  { %7520 = vmatmul.mubr.msk.f32.gmra.mxu0 %vm330_vm3, %v6280_v63  ;;  %v6411_v63 = vld [vmem:[%s12232_s2 + $0x298] sm:$0xff] }
 0x1a1   :  { %7566 = vmatmul.mubr.msk.f32.gmra.mxu1 %vm330_vm3, %v302_v0  ;;  %7522 = vmatprep.mubr.msk.f32.mxu0 %vm8826_vm2, %v8825_v16  ;;  %v6384_v0 = vld [vmem:[%s12232_s2 + $0x238] sm:$0xff] }
 0x1a2   :  { %7568 = vmatprep.mubr.msk.f32.mxu1 %vm8826_vm2, %v8825_v16 }
 0x1a4   :  { %7523 = vmatmul.mubr.msk.f32.gmra.mxu0 %vm330_vm3, %v6281_v1  ;;  %v6412_v1 = vld [vmem:[%s12232_s2 + $0x2a0] sm:$0xff] }
 0x1a5   :  { %7569 = vmatmul.mubr.msk.f32.gmra.mxu1 %vm330_vm3, %v303_v2  ;;  %7581 = vmatprep.mubr.msk.f32.mxu0 %vm8826_vm2, %v8825_v16  ;;  %v6385_v2 = vld [vmem:[%s12232_s2 + $0x240] sm:$0xff] }
 0x1a6   :  { %7571 = vmatprep.mubr.msk.f32.mxu1 %vm8826_vm2, %v8825_v16 }
 0x1a8   :  { %7582 = vmatmul.mubr.msk.f32.vlgmr.msra.gmra.mxu0 %vm330_vm3, %v6313_v3  ;;  %v6413_v3 = vld [vmem:[%s12232_s2 + $0x2a8] sm:$0xff] }
 0x1a9   :  { %7572 = vmatmul.mubr.msk.f32.gmra.mxu1 %vm330_vm3, %v304_v4  ;;  %7676 = vmatpush3.msra.mxu0 %v1164_v5  ;;  %v6386_v4 = vld [vmem:[%s12232_s2 + $0x248] sm:$0xff]  ;;  %v6414_v5 = vld [vmem:[%s12232_s2 + $0x2b0] sm:$0xff] }
 0x1aa   :  { %7677 = vmatprep.subr.mxu0 %v8825_v16  ;;  %7574 = vmatprep.mubr.msk.f32.mxu1 %vm8826_vm2, %v8825_v16 }
 0x1ab   :  { %7678 = vmatpush3.msra.mxu0 %v1162_v7  ;;  %7584 = vmatprep.mubr.msk.f32.mxu0 %vm8826_vm2, %v8825_v16  ;;  %v6415_v7 = vld [vmem:[%s12232_s2 + $0x2b8] sm:$0xff] }
 0x1ac   :  { %7585 = vmatmul.mubr.msk.f32.gmra.mxu0 %vm330_vm3, %v6314_v6  ;;  %7773 = vmatprep.subr.mxu0 %v8825_v16  ;;  %v6387_v6 = vld [vmem:[%s12232_s2 + $0x250] sm:$0xff] }
 0x1ad   :  { %7575 = vmatmul.mubr.msk.f32.gmra.mxu1 %vm330_vm3, %v305_v8  ;;  %7587 = vmatprep.mubr.msk.f32.mxu0 %vm8826_vm2, %v8825_v16  ;;  %v6433_v8 = vld [vmem:[%s12232_s2 + $0x2d0] sm:$0xff] }
 0x1ae   :  { %7630 = vmatprep.mubr.msk.f32.mxu1 %vm8826_vm2, %v8825_v16 }
 0x1b0   :  { %7588 = vmatmul.mubr.msk.f32.gmra.mxu0 %vm330_vm3, %v6315_v9  ;;  %v6416_v9 = vld [vmem:[%s12232_s2 + $0x2c0] sm:$0xff] }
 0x1b1   :  { %7631 = vmatmul.mubr.msk.f32.vlgmr.msra.gmra.mxu1 %vm330_vm3, %v6343_v10  ;;  %7590 = vmatprep.mubr.msk.f32.mxu0 %vm8826_vm2, %v8825_v16  ;;  %v2052_v10 = vpop.permute.xlu0 %2051 }
 0x1b2   :  { %7725 = vmatpush3.msra.mxu1 %v1386_v11  ;;  %7633 = vmatprep.mubr.msk.f32.mxu1 %vm8826_vm2, %v8825_v16  ;;  %v6434_v11 = vld [vmem:[%s12232_s2 + $0x2d8] sm:$0xff] }
 0x1b3   :  { %7726 = vmatprep.subr.mxu1 %v8825_v16 }
 0x1b4   :  { %7727 = vmatpush3.msra.mxu1 %v1384_v14  ;;  %7591 = vmatmul.mubr.msk.f32.gmra.mxu0 %vm330_vm3, %v6316_v12  ;;  %v2050_v12 = vpop.permute.xlu1 %2049  ;;  %v6435_v14 = vld [vmem:[%s12232_s2 + $0x2e0] sm:$0xff] }
 0x1b5   :  { %7634 = vmatmul.mubr.msk.f32.gmra.mxu1 %vm330_vm3, %v6344_v13  ;;  %7593 = vmatprep.mubr.msk.f32.mxu0 %vm8826_vm2, %v8825_v16  ;;  %v6417_v13 = vld [vmem:[%s12232_s2 + $0x2c8] sm:$0xff] }
 0x1b6   :  { %7636 = vmatprep.mubr.msk.f32.mxu1 %vm8826_vm2, %v8825_v16  ;;  %7822 = vmatprep.subr.mxu1 %v8825_v16 }
 0x1b8   :  { %7594 = vmatmul.mubr.msk.f32.gmra.mxu0 %vm330_vm3, %v6317_v15  ;;  %v6463_v15 = vld [vmem:[%s12232_s2 + $0x348] sm:$0xff] }
 0x1b9   :  { %7637 = vmatmul.mubr.msk.f32.gmra.mxu1 %vm330_vm3, %v6345_v17  ;;  %7596 = vmatprep.mubr.msk.f32.mxu0 %vm8826_vm2, %v8825_v16  ;;  %v2274_v17 = vpop.permute.xlu0 %2273 }
 0x1ba   :  { %7639 = vmatprep.mubr.msk.f32.mxu1 %vm8826_vm2, %v8825_v16 }
 0x1bc   :  { %7597 = vmatmul.mubr.msk.f32.gmra.mxu0 %vm330_vm3, %v6318_v18  ;;  %v6436_v18 = vld [vmem:[%s12232_s2 + $0x2e8] sm:$0xff] }
 0x1bd   :  { %7640 = vmatmul.mubr.msk.f32.gmra.mxu1 %vm330_vm3, %v6346_v19  ;;  %7599 = vmatprep.mubr.msk.f32.mxu0 %vm8826_vm2, %v8825_v16  ;;  %v6464_v19 = vld [vmem:[%s12232_s2 + $0x350] sm:$0xff] }
 0x1be   :  { %7642 = vmatprep.mubr.msk.f32.mxu1 %vm8826_vm2, %v8825_v16 }
 0x1c0   :  { %7600 = vmatmul.mubr.msk.f32.gmra.mxu0 %vm330_vm3, %v6319_v20  ;;  %v2272_v20 = vpop.permute.xlu1 %2271 }
 0x1c1   :  { %7643 = vmatmul.mubr.msk.f32.gmra.mxu1 %vm330_vm3, %v6347_v21  ;;  %7602 = vmatprep.mubr.msk.f32.mxu0 %vm8826_vm2, %v8825_v16  ;;  %v6437_v21 = vld [vmem:[%s12232_s2 + $0x2f0] sm:$0xff] }
 0x1c2   :  { %7645 = vmatprep.mubr.msk.f32.mxu1 %vm8826_vm2, %v8825_v16 }
 0x1c4   :  { %7603 = vmatmul.mubr.msk.f32.gmra.mxu0 %vm330_vm3, %v6320_v22 }
 0x1c5   :  { %7646 = vmatmul.mubr.msk.f32.gmra.mxu1 %vm330_vm3, %v6348_v23  ;;  %7605 = vmatprep.mubr.msk.f32.mxu0 %vm8826_vm2, %v8825_v16 }
 0x1c6   :  { %7648 = vmatprep.mubr.msk.f32.mxu1 %vm8826_vm2, %v8825_v16 }
 0x1c8   :  { %7606 = vmatmul.mubr.msk.f32.gmra.mxu0 %vm330_vm3, %v6321_v24  ;;  %v6465_v24 = vld [vmem:[%s12232_s2 + $0x358] sm:$0xff] }
 0x1c9   :  { %7649 = vmatmul.mubr.msk.f32.gmra.mxu1 %vm330_vm3, %v6349_v25  ;;  %7608 = vmatprep.mubr.msk.f32.mxu0 %vm8826_vm2, %v8825_v16 }
 0x1ca   :  { %7651 = vmatprep.mubr.msk.f32.mxu1 %vm8826_vm2, %v8825_v16 }
 0x1cc   :  { %7609 = vmatmul.mubr.msk.f32.gmra.mxu0 %vm330_vm3, %v6322_v26 }
 0x1cd   :  { %7652 = vmatmul.mubr.msk.f32.gmra.mxu1 %vm330_vm3, %v6350_v27  ;;  %7611 = vmatprep.mubr.msk.f32.mxu0 %vm8826_vm2, %v8825_v16  ;;  %v6438_v27 = vld [vmem:[%s12232_s2 + $0x2f8] sm:$0xff] }
 0x1ce   :  { %7654 = vmatprep.mubr.msk.f32.mxu1 %vm8826_vm2, %v8825_v16 }
 0x1d0   :  { %7612 = vmatmul.mubr.msk.f32.gmra.mxu0 %vm330_vm3, %v6323_v28  ;;  %v6466_v28 = vld [vmem:[%s12232_s2 + $0x360] sm:$0xff] }
 0x1d1   :  { %7655 = vmatmul.mubr.msk.f32.gmra.mxu1 %vm330_vm3, %v6351_v29  ;;  %7614 = vmatprep.mubr.msk.f32.mxu0 %vm8826_vm2, %v8825_v16 }
 0x1d2   :  { %7657 = vmatprep.mubr.msk.f32.mxu1 %vm8826_vm2, %v8825_v16 }
 0x1d4   :  { %7615 = vmatmul.mubr.msk.f32.gmra.mxu0 %vm330_vm3, %v6324_v30 }
 0x1d5   :  { %7658 = vmatmul.mubr.msk.f32.gmra.mxu1 %vm330_vm3, %v6352_v31  ;;  %7617 = vmatprep.mubr.msk.f32.mxu0 %vm8826_vm2, %v8825_v16 }
 0x1d6   :  { %7660 = vmatprep.mubr.msk.f32.mxu1 %vm8826_vm2, %v8825_v16 }
 0x1d8   :  { %7618 = vmatmul.mubr.msk.f32.gmra.mxu0 %vm330_vm3, %v6325_v32  ;;  %v6439_v32 = vld [vmem:[%s12232_s2 + $0x300] sm:$0xff] }
 0x1d9   :  { %7661 = vmatmul.mubr.msk.f32.gmra.mxu1 %vm330_vm3, %v6353_v33  ;;  %7620 = vmatprep.mubr.msk.f32.mxu0 %vm8826_vm2, %v8825_v16 }
 0x1da   :  { %7663 = vmatprep.mubr.msk.f32.mxu1 %vm8826_vm2, %v8825_v16 }
 0x1dc   :  { %7621 = vmatmul.mubr.msk.f32.gmra.mxu0 %vm330_vm3, %v6326_v34 }
 0x1dd   :  { %7664 = vmatmul.mubr.msk.f32.gmra.mxu1 %vm330_vm3, %v6354_v35  ;;  %7623 = vmatprep.mubr.msk.f32.mxu0 %vm8826_vm2, %v8825_v16  ;;  %v6467_v35 = vld [vmem:[%s12232_s2 + $0x368] sm:$0xff] }
 0x1de   :  { %7666 = vmatprep.mubr.msk.f32.mxu1 %vm8826_vm2, %v8825_v16 }
 0x1e0   :  { %7624 = vmatmul.mubr.msk.f32.gmra.mxu0 %vm330_vm3, %v6327_v36 }
 0x1e1   :  { %7667 = vmatmul.mubr.msk.f32.gmra.mxu1 %vm330_vm3, %v6355_v37  ;;  %7679 = vmatprep.mubr.msk.f32.mxu0 %vm8826_vm2, %v8825_v16 }
 0x1e2   :  { %7669 = vmatprep.mubr.msk.f32.mxu1 %vm8826_vm2, %v8825_v16 }
 0x1e4   :  { %7680 = vmatmul.mubr.msk.f32.vlgmr.msra.gmra.mxu0 %vm330_vm3, %v6373_v38  ;;  %v6440_v38 = vld [vmem:[%s12232_s2 + $0x308] sm:$0xff] }
 0x1e5   :  { %7670 = vmatmul.mubr.msk.f32.gmra.mxu1 %vm330_vm3, %v6356_v39  ;;  %7774 = vmatpush3.msra.mxu0 %v1608_v40 }
 0x1e6   :  { %7775 = vmatprep.subr.mxu0 %v8825_v16  ;;  %7672 = vmatprep.mubr.msk.f32.mxu1 %vm8826_vm2, %v8825_v16 }
 0x1e7   :  { %7776 = vmatpush3.msra.mxu0 %v1606_v42  ;;  %7682 = vmatprep.mubr.msk.f32.mxu0 %vm8826_vm2, %v8825_v16 }
 0x1e8   :  { %7683 = vmatmul.mubr.msk.f32.gmra.mxu0 %vm330_vm3, %v6374_v41  ;;  %7871 = vmatprep.subr.mxu0 %v8825_v16  ;;  %v6468_v41 = vld [vmem:[%s12232_s2 + $0x370] sm:$0xff] }
 0x1e9   :  { %7673 = vmatmul.mubr.msk.f32.gmra.mxu1 %vm330_vm3, %v6357_v43  ;;  %7685 = vmatprep.mubr.msk.f32.mxu0 %vm8826_vm2, %v8825_v16 }
 0x1ea   :  { %7728 = vmatprep.mubr.msk.f32.mxu1 %vm8826_vm2, %v8825_v16 }
 0x1ec   :  { %7686 = vmatmul.mubr.msk.f32.gmra.mxu0 %vm330_vm3, %v6375_v44 }
 0x1ed   :  { %7729 = vmatmul.mubr.msk.f32.vlgmr.msra.gmra.mxu1 %vm330_vm3, %v6403_v45  ;;  %7688 = vmatprep.mubr.msk.f32.mxu0 %vm8826_vm2, %v8825_v16  ;;  %v6441_v45 = vld [vmem:[%s12232_s2 + $0x310] sm:$0xff] }
 0x1ee   :  { %7823 = vmatpush3.msra.mxu1 %v1830_v46  ;;  %7731 = vmatprep.mubr.msk.f32.mxu1 %vm8826_vm2, %v8825_v16 }
 0x1ef   :  { %7824 = vmatprep.subr.mxu1 %v8825_v16 }
 0x1f0   :  { %7825 = vmatpush3.msra.mxu1 %v1828_v49  ;;  %7689 = vmatmul.mubr.msk.f32.gmra.mxu0 %vm330_vm3, %v6376_v47 }
 0x1f1   :  { %7732 = vmatmul.mubr.msk.f32.gmra.mxu1 %vm330_vm3, %v6404_v48  ;;  %7691 = vmatprep.mubr.msk.f32.mxu0 %vm8826_vm2, %v8825_v16  ;;  %v6469_v48 = vld [vmem:[%s12232_s2 + $0x378] sm:$0xff] }
 0x1f2   :  { %7734 = vmatprep.mubr.msk.f32.mxu1 %vm8826_vm2, %v8825_v16  ;;  %7920 = vmatprep.subr.mxu1 %v8825_v16 }
 0x1f4   :  { %7692 = vmatmul.mubr.msk.f32.gmra.mxu0 %vm330_vm3, %v6377_v50 }
 0x1f5   :  { %7735 = vmatmul.mubr.msk.f32.gmra.mxu1 %vm330_vm3, %v6405_v51  ;;  %7694 = vmatprep.mubr.msk.f32.mxu0 %vm8826_vm2, %v8825_v16 }
 0x1f6   :  { %7737 = vmatprep.mubr.msk.f32.mxu1 %vm8826_vm2, %v8825_v16 }
 0x1f8   :  { %7695 = vmatmul.mubr.msk.f32.gmra.mxu0 %vm330_vm3, %v6378_v52  ;;  %v6442_v52 = vld [vmem:[%s12232_s2 + $0x318] sm:$0xff] }
 0x1f9   :  { %7738 = vmatmul.mubr.msk.f32.gmra.mxu1 %vm330_vm3, %v6406_v53  ;;  %7697 = vmatprep.mubr.msk.f32.mxu0 %vm8826_vm2, %v8825_v16 }
 0x1fa   :  { %7740 = vmatprep.mubr.msk.f32.mxu1 %vm8826_vm2, %v8825_v16 }
 0x1fc   :  { %7698 = vmatmul.mubr.msk.f32.gmra.mxu0 %vm330_vm3, %v6379_v54 }
 0x1fd   :  { %7741 = vmatmul.mubr.msk.f32.gmra.mxu1 %vm330_vm3, %v6407_v55  ;;  %7700 = vmatprep.mubr.msk.f32.mxu0 %vm8826_vm2, %v8825_v16  ;;  %v6470_v55 = vld [vmem:[%s12232_s2 + $0x380] sm:$0xff] }
 0x1fe   :  { %7743 = vmatprep.mubr.msk.f32.mxu1 %vm8826_vm2, %v8825_v16 }
 0x200   :  { %7701 = vmatmul.mubr.msk.f32.gmra.mxu0 %vm330_vm3, %v6380_v56 }
 0x201   :  { %7744 = vmatmul.mubr.msk.f32.gmra.mxu1 %vm330_vm3, %v6408_v57  ;;  %7703 = vmatprep.mubr.msk.f32.mxu0 %vm8826_vm2, %v8825_v16 }
 0x202   :  { %7746 = vmatprep.mubr.msk.f32.mxu1 %vm8826_vm2, %v8825_v16 }
 0x204   :  { %7704 = vmatmul.mubr.msk.f32.gmra.mxu0 %vm330_vm3, %v6381_v58 }
 0x205   :  { %7747 = vmatmul.mubr.msk.f32.gmra.mxu1 %vm330_vm3, %v6409_v59  ;;  %7706 = vmatprep.mubr.msk.f32.mxu0 %vm8826_vm2, %v8825_v16  ;;  %v6443_v59 = vld [vmem:[%s12232_s2 + $0x320] sm:$0xff] }
 0x206   :  { %7749 = vmatprep.mubr.msk.f32.mxu1 %vm8826_vm2, %v8825_v16 }
 0x208   :  { %7707 = vmatmul.mubr.msk.f32.gmra.mxu0 %vm330_vm3, %v6382_v60 }
 0x209   :  { %7750 = vmatmul.mubr.msk.f32.gmra.mxu1 %vm330_vm3, %v6410_v61  ;;  %7709 = vmatprep.mubr.msk.f32.mxu0 %vm8826_vm2, %v8825_v16 }
 0x20a   :  { %7752 = vmatprep.mubr.msk.f32.mxu1 %vm8826_vm2, %v8825_v16 }
 0x20c   :  { %7710 = vmatmul.mubr.msk.f32.gmra.mxu0 %vm330_vm3, %v6383_v62  ;;  %v6471_v62 = vld [vmem:[%s12232_s2 + $0x388] sm:$0xff] }
 0x20d   :  { %7753 = vmatmul.mubr.msk.f32.gmra.mxu1 %vm330_vm3, %v6411_v63  ;;  %7712 = vmatprep.mubr.msk.f32.mxu0 %vm8826_vm2, %v8825_v16 }
 0x20e   :  { %7755 = vmatprep.mubr.msk.f32.mxu1 %vm8826_vm2, %v8825_v16 }
 0x210   :  { %7713 = vmatmul.mubr.msk.f32.gmra.mxu0 %vm330_vm3, %v6384_v0 }
 0x211   :  { %7756 = vmatmul.mubr.msk.f32.gmra.mxu1 %vm330_vm3, %v6412_v1  ;;  %7715 = vmatprep.mubr.msk.f32.mxu0 %vm8826_vm2, %v8825_v16 }
 0x212   :  { %7758 = vmatprep.mubr.msk.f32.mxu1 %vm8826_vm2, %v8825_v16 }
 0x214   :  { %7716 = vmatmul.mubr.msk.f32.gmra.mxu0 %vm330_vm3, %v6385_v2  ;;  %v6444_v2 = vld [vmem:[%s12232_s2 + $0x328] sm:$0xff] }
 0x215   :  { %7759 = vmatmul.mubr.msk.f32.gmra.mxu1 %vm330_vm3, %v6413_v3  ;;  %7718 = vmatprep.mubr.msk.f32.mxu0 %vm8826_vm2, %v8825_v16 }
 0x216   :  { %7761 = vmatprep.mubr.msk.f32.mxu1 %vm8826_vm2, %v8825_v16 }
 0x218   :  { %7719 = vmatmul.mubr.msk.f32.gmra.mxu0 %vm330_vm3, %v6386_v4 }
 0x219   :  { %7762 = vmatmul.mubr.msk.f32.gmra.mxu1 %vm330_vm3, %v6414_v5  ;;  %7721 = vmatprep.mubr.msk.f32.mxu0 %vm8826_vm2, %v8825_v16  ;;  %v6472_v5 = vld [vmem:[%s12232_s2 + $0x390] sm:$0xff] }
 0x21a   :  { %7764 = vmatprep.mubr.msk.f32.mxu1 %vm8826_vm2, %v8825_v16 }
 0x21c   :  { %7722 = vmatmul.mubr.msk.f32.gmra.mxu0 %vm330_vm3, %v6387_v6 }
 0x21d   :  { %7765 = vmatmul.mubr.msk.f32.gmra.mxu1 %vm330_vm3, %v6415_v7  ;;  %7777 = vmatprep.mubr.msk.f32.mxu0 %vm8826_vm2, %v8825_v16 }
 0x21e   :  { %7767 = vmatprep.mubr.msk.f32.mxu1 %vm8826_vm2, %v8825_v16 }
 0x220   :  { %7778 = vmatmul.mubr.msk.f32.vlgmr.msra.gmra.mxu0 %vm330_vm3, %v6433_v8 }
 0x221   :  { %7768 = vmatmul.mubr.msk.f32.gmra.mxu1 %vm330_vm3, %v6416_v9  ;;  %7872 = vmatpush3.msra.mxu0 %v2052_v10  ;;  %v6445_v9 = vld [vmem:[%s12232_s2 + $0x330] sm:$0xff] }
 0x222   :  { %7873 = vmatprep.subr.mxu0 %v8825_v16  ;;  %7770 = vmatprep.mubr.msk.f32.mxu1 %vm8826_vm2, %v8825_v16 }
 0x223   :  { %7874 = vmatpush3.msra.mxu0 %v2050_v12  ;;  %7780 = vmatprep.mubr.msk.f32.mxu0 %vm8826_vm2, %v8825_v16  ;;  %v6473_v12 = vld [vmem:[%s12232_s2 + $0x398] sm:$0xff] }
 0x224   :  { %7781 = vmatmul.mubr.msk.f32.gmra.mxu0 %vm330_vm3, %v6434_v11  ;;  %7969 = vmatprep.subr.mxu0 %v8825_v16 }
 0x225   :  { %7771 = vmatmul.mubr.msk.f32.gmra.mxu1 %vm330_vm3, %v6417_v13  ;;  %7783 = vmatprep.mubr.msk.f32.mxu0 %vm8826_vm2, %v8825_v16 }
 0x226   :  { %7826 = vmatprep.mubr.msk.f32.mxu1 %vm8826_vm2, %v8825_v16 }
 0x228   :  { %7784 = vmatmul.mubr.msk.f32.gmra.mxu0 %vm330_vm3, %v6435_v14 }
 0x229   :  { %7827 = vmatmul.mubr.msk.f32.vlgmr.msra.gmra.mxu1 %vm330_vm3, %v6463_v15  ;;  %7786 = vmatprep.mubr.msk.f32.mxu0 %vm8826_vm2, %v8825_v16 }
 0x22a   :  { %7921 = vmatpush3.msra.mxu1 %v2274_v17  ;;  %7829 = vmatprep.mubr.msk.f32.mxu1 %vm8826_vm2, %v8825_v16  ;;  %v6446_v17 = vld [vmem:[%s12232_s2 + $0x338] sm:$0xff] }
 0x22b   :  { %7922 = vmatprep.subr.mxu1 %v8825_v16 }
 0x22c   :  { %7923 = vmatpush3.msra.mxu1 %v2272_v20  ;;  %7787 = vmatmul.mubr.msk.f32.gmra.mxu0 %vm330_vm3, %v6436_v18  ;;  %v6474_v20 = vld [vmem:[%s12232_s2 + $0x3a0] sm:$0xff] }
 0x22d   :  { %7830 = vmatmul.mubr.msk.f32.gmra.mxu1 %vm330_vm3, %v6464_v19  ;;  %7789 = vmatprep.mubr.msk.f32.mxu0 %vm8826_vm2, %v8825_v16 }
 0x22e   :  { %7832 = vmatprep.mubr.msk.f32.mxu1 %vm8826_vm2, %v8825_v16  ;;  %v442_v22 = vpop.f32.mrf.mxu0  ;;  %v9801_v23 = vpop.f32.mrf.mxu1  ;;  %8018 = vmatprep.subr.mxu1 %v8825_v16 }
 0x230   :  { %7790 = vmatmul.mubr.msk.f32.gmra.mxu0 %vm330_vm3, %v6437_v21  ;;  %v7485_v25 = vpop.f32.mrf.mxu0  ;;  %v7527_v26 = vpop.f32.mrf.mxu1 }
 0x231   :  { %7833 = vmatmul.mubr.msk.f32.gmra.mxu1 %vm330_vm3, %v6465_v24  ;;  %7792 = vmatprep.mubr.msk.f32.mxu0 %vm8826_vm2, %v8825_v16  ;;  %v6447_v25 = vld [vmem:[%s12232_s2 + $0x340] sm:$0xff] }
 0x232   :  { %7835 = vmatprep.mubr.msk.f32.mxu1 %vm8826_vm2, %v8825_v16 }
 0x234   :  { %v447_v29 = vpop.f32.mrf.mxu0  ;;  %v627_v30 = vpop.f32.mrf.mxu1  ;;  %7793 = vmatmul.mubr.msk.f32.gmra.mxu0 %vm330_vm3, %v6438_v27 }
 0x235   :  { %v9820_v31 = vadd.f32 %v627_v30, %v442_v22  ;;  %7836 = vmatmul.mubr.msk.f32.gmra.mxu1 %vm330_vm3, %v6466_v28  ;;  %7795 = vmatprep.mubr.msk.f32.mxu0 %vm8826_vm2, %v8825_v16  ;;  %v6475_v28 = vld [vmem:[%s12232_s2 + $0x3a8] sm:$0xff] }
 0x236   :  { %v7488_v33 = vpop.f32.mrf.mxu0  ;;  %v7534_v34 = vpop.f32.mrf.mxu1  ;;  %7838 = vmatprep.mubr.msk.f32.mxu1 %vm8826_vm2, %v8825_v16 }
 0x237   :  { %v6493_v33 = vld [vmem:[%s12232_s2 + $0x3c0] sm:$0xff] }
 0x238   :  { %v452_v36 = vpop.f32.mrf.mxu0  ;;  %7796 = vmatmul.mubr.msk.f32.gmra.mxu0 %vm330_vm3, %v6439_v32 }
 0x239   :  { %v632_v37 = vpop.f32.mrf.mxu1  ;;  %7839 = vmatmul.mubr.msk.f32.gmra.mxu1 %vm330_vm3, %v6467_v35  ;;  %7798 = vmatprep.mubr.msk.f32.mxu0 %vm8826_vm2, %v8825_v16 }
 0x23a   :  { %v9840_v39 = vadd.f32 %v632_v37, %v447_v29  ;;  %v7491_v40 = vpop.f32.mrf.mxu0  ;;  %7841 = vmatprep.mubr.msk.f32.mxu1 %vm8826_vm2, %v8825_v16 }
 0x23b   :  { %v7537_v42 = vpop.f32.mrf.mxu1 }
 0x23c   :  { %v457_v43 = vpop.f32.mrf.mxu0  ;;  %7799 = vmatmul.mubr.msk.f32.gmra.mxu0 %vm330_vm3, %v6440_v38  ;;  %v2496_v38 = vpop.permute.xlu0 %2495  ;;  %v6494_v42 = vld [vmem:[%s12232_s2 + $0x3c8] sm:$0xff] }
 0x23d   :  { %v637_v44 = vpop.f32.mrf.mxu1  ;;  %7842 = vmatmul.mubr.msk.f32.gmra.mxu1 %vm330_vm3, %v6468_v41  ;;  %7801 = vmatprep.mubr.msk.f32.mxu0 %vm8826_vm2, %v8825_v16 }
 0x23e   :  { %v9854_v46 = vadd.f32 %v637_v44, %v452_v36  ;;  %v7494_v47 = vpop.f32.mrf.mxu0  ;;  %7844 = vmatprep.mubr.msk.f32.mxu1 %vm8826_vm2, %v8825_v16  ;;  %v6476_v36 = vld [vmem:[%s12232_s2 + $0x3b0] sm:$0xff] }
 0x23f   :  { %v7540_v49 = vpop.f32.mrf.mxu1  ;;  %v6477_v47 = vld [vmem:[%s12232_s2 + $0x3b8] sm:$0xff] }
 0x240   :  { %v462_v50 = vpop.f32.mrf.mxu0  ;;  %7802 = vmatmul.mubr.msk.f32.gmra.mxu0 %vm330_vm3, %v6441_v45 }
 0x241   :  { %v642_v51 = vpop.f32.mrf.mxu1  ;;  %7845 = vmatmul.mubr.msk.f32.gmra.mxu1 %vm330_vm3, %v6469_v48  ;;  %7804 = vmatprep.mubr.msk.f32.mxu0 %vm8826_vm2, %v8825_v16 }
 0x242   :  { %v9868_v53 = vadd.f32 %v642_v51, %v457_v43  ;;  %v7497_v54 = vpop.f32.mrf.mxu0  ;;  %7847 = vmatprep.mubr.msk.f32.mxu1 %vm8826_vm2, %v8825_v16  ;;  %v2494_v43 = vpop.permute.xlu1 %2493  ;;  %v6495_v51 = vld [vmem:[%s12232_s2 + $0x3d0] sm:$0xff] }
 0x243   :  { %v7543_v56 = vpop.f32.mrf.mxu1 }
 0x244   :  { %v467_v57 = vpop.f32.mrf.mxu0  ;;  %7805 = vmatmul.mubr.msk.f32.gmra.mxu0 %vm330_vm3, %v6442_v52 }
 0x245   :  { %v647_v58 = vpop.f32.mrf.mxu1  ;;  %7848 = vmatmul.mubr.msk.f32.gmra.mxu1 %vm330_vm3, %v6470_v55  ;;  %7807 = vmatprep.mubr.msk.f32.mxu0 %vm8826_vm2, %v8825_v16  ;;  %v6523_v55 = vld [vmem:[%s12232_s2 + $0x438] sm:$0xff] }
 0x246   :  { %v9882_v60 = vadd.f32 %v647_v58, %v462_v50  ;;  %v7500_v61 = vpop.f32.mrf.mxu0  ;;  %7850 = vmatprep.mubr.msk.f32.mxu1 %vm8826_vm2, %v8825_v16  ;;  %v2718_v58 = vpop.permute.xlu0 %2717 }
 0x247   :  { %v7546_v63 = vpop.f32.mrf.mxu1  ;;  %v6496_v61 = vld [vmem:[%s12232_s2 + $0x3d8] sm:$0xff] }
 0x248   :  { %v472_v0 = vpop.f32.mrf.mxu0  ;;  %7808 = vmatmul.mubr.msk.f32.gmra.mxu0 %vm330_vm3, %v6443_v59 }
 0x249   :  { %v652_v1 = vpop.f32.mrf.mxu1  ;;  %7851 = vmatmul.mubr.msk.f32.gmra.mxu1 %vm330_vm3, %v6471_v62  ;;  %7810 = vmatprep.mubr.msk.f32.mxu0 %vm8826_vm2, %v8825_v16 }
 0x24a   :  { %v9896_v3 = vadd.f32 %v652_v1, %v467_v57  ;;  %v7503_v4 = vpop.f32.mrf.mxu0  ;;  %7853 = vmatprep.mubr.msk.f32.mxu1 %vm8826_vm2, %v8825_v16  ;;  %v2716_v1 = vpop.permute.xlu1 %2715 }
 0x24b   :  { %v7549_v6 = vpop.f32.mrf.mxu1 }
 0x24c   :  { %v477_v7 = vpop.f32.mrf.mxu0  ;;  %7811 = vmatmul.mubr.msk.f32.gmra.mxu0 %vm330_vm3, %v6444_v2 }
 0x24d   :  { %v657_v8 = vpop.f32.mrf.mxu1  ;;  %7854 = vmatmul.mubr.msk.f32.gmra.mxu1 %vm330_vm3, %v6472_v5  ;;  %7813 = vmatprep.mubr.msk.f32.mxu0 %vm8826_vm2, %v8825_v16 }
 0x24e   :  { %v9910_v10 = vadd.f32 %v657_v8, %v472_v0  ;;  %v7506_v11 = vpop.f32.mrf.mxu0  ;;  %7856 = vmatprep.mubr.msk.f32.mxu1 %vm8826_vm2, %v8825_v16  ;;  %v6524_v0 = vld [vmem:[%s12232_s2 + $0x440] sm:$0xff] }
 0x24f   :  { %v7552_v13 = vpop.f32.mrf.mxu1  ;;  %v6525_v11 = vld [vmem:[%s12232_s2 + $0x448] sm:$0xff] }
 0x250   :  { %v482_v14 = vpop.f32.mrf.mxu0  ;;  %7814 = vmatmul.mubr.msk.f32.gmra.mxu0 %vm330_vm3, %v6445_v9 }
 0x251   :  { %v662_v15 = vpop.f32.mrf.mxu1  ;;  %7857 = vmatmul.mubr.msk.f32.gmra.mxu1 %vm330_vm3, %v6473_v12  ;;  %7816 = vmatprep.mubr.msk.f32.mxu0 %vm8826_vm2, %v8825_v16 }
 0x252   :  { %v9924_v18 = vadd.f32 %v662_v15, %v477_v7  ;;  %v7509_v19 = vpop.f32.mrf.mxu0  ;;  %7859 = vmatprep.mubr.msk.f32.mxu1 %vm8826_vm2, %v8825_v16  ;;  %v6497_v7 = vld [vmem:[%s12232_s2 + $0x3e0] sm:$0xff]  ;;  %v6498_v15 = vld [vmem:[%s12232_s2 + $0x3e8] sm:$0xff] }
 0x253   :  { %v7555_v21 = vpop.f32.mrf.mxu1 }
 0x254   :  { %v487_v22 = vpop.f32.mrf.mxu0  ;;  %7817 = vmatmul.mubr.msk.f32.gmra.mxu0 %vm330_vm3, %v6446_v17 }
 0x255   :  { %v667_v24 = vpop.f32.mrf.mxu1  ;;  %7860 = vmatmul.mubr.msk.f32.gmra.mxu1 %vm330_vm3, %v6474_v20  ;;  %7819 = vmatprep.mubr.msk.f32.mxu0 %vm8826_vm2, %v8825_v16 }
 0x256   :  { %v9938_v26 = vadd.f32 %v667_v24, %v482_v14  ;;  %v7512_v27 = vpop.f32.mrf.mxu0  ;;  %7862 = vmatprep.mubr.msk.f32.mxu1 %vm8826_vm2, %v8825_v16 }
 0x257   :  { %v7558_v29 = vpop.f32.mrf.mxu1 }
 0x258   :  { %v492_v30 = vpop.f32.mrf.mxu0  ;;  %7820 = vmatmul.mubr.msk.f32.gmra.mxu0 %vm330_vm3, %v6447_v25 }
 0x259   :  { %v672_v32 = vpop.f32.mrf.mxu1  ;;  %7863 = vmatmul.mubr.msk.f32.gmra.mxu1 %vm330_vm3, %v6475_v28  ;;  %7875 = vmatprep.mubr.msk.f32.mxu0 %vm8826_vm2, %v8825_v16 }
 0x25a   :  { %v9952_v34 = vadd.f32 %v672_v32, %v487_v22  ;;  %v7515_v35 = vpop.f32.mrf.mxu0  ;;  %7865 = vmatprep.mubr.msk.f32.mxu1 %vm8826_vm2, %v8825_v16 }
 0x25b   :  { %v7561_v37 = vpop.f32.mrf.mxu1 }
 0x25c   :  { %v497_v40 = vpop.f32.mrf.mxu0  ;;  %7876 = vmatmul.mubr.msk.f32.vlgmr.msra.gmra.mxu0 %vm330_vm3, %v6493_v33  ;;  %v6500_v33 = vld [vmem:[%s12232_s2 + $0x3f8] sm:$0xff] }
 0x25d   :  { %v677_v41 = vpop.f32.mrf.mxu1  ;;  %7866 = vmatmul.mubr.msk.f32.gmra.mxu1 %vm330_vm3, %v6476_v36  ;;  %7970 = vmatpush3.msra.mxu0 %v2496_v38 }
 0x25e   :  { %v9964_v44 = vadd.f32 %v677_v41, %v492_v30  ;;  %7971 = vmatprep.subr.mxu0 %v8825_v16  ;;  %v7518_v45 = vpop.f32.mrf.mxu0  ;;  %7868 = vmatprep.mubr.msk.f32.mxu1 %vm8826_vm2, %v8825_v16 }
 0x25f   :  { %v7564_v48 = vpop.f32.mrf.mxu1  ;;  %7972 = vmatpush3.msra.mxu0 %v2494_v43  ;;  %7878 = vmatprep.mubr.msk.f32.mxu0 %vm8826_vm2, %v8825_v16 }
 0x260   :  { %v502_v49 = vpop.f32.mrf.mxu0  ;;  %7879 = vmatmul.mubr.msk.f32.gmra.mxu0 %vm330_vm3, %v6494_v42  ;;  %8067 = vmatprep.subr.mxu0 %v8825_v16  ;;  %v6501_v42 = vld [vmem:[%s12232_s2 + $0x400] sm:$0xff] }
 0x261   :  { %v682_v50 = vpop.f32.mrf.mxu1  ;;  %7869 = vmatmul.mubr.msk.f32.gmra.mxu1 %vm330_vm3, %v6477_v47  ;;  %7881 = vmatprep.mubr.msk.f32.mxu0 %vm8826_vm2, %v8825_v16 }
 0x262   :  { %v9982_v52 = vadd.f32 %v682_v50, %v497_v40  ;;  %v7521_v54 = vpop.f32.mrf.mxu0  ;;  %7924 = vmatprep.mubr.msk.f32.mxu1 %vm8826_vm2, %v8825_v16 }
 0x263   :  { %v7567_v56 = vpop.f32.mrf.mxu1 }
 0x264   :  { %v507_v57 = vpop.f32.mrf.mxu0  ;;  %7882 = vmatmul.mubr.msk.f32.gmra.mxu0 %vm330_vm3, %v6495_v51  ;;  %v6502_v51 = vld [vmem:[%s12232_s2 + $0x408] sm:$0xff] }
 0x265   :  { %v687_v59 = vpop.f32.mrf.mxu1  ;;  %7925 = vmatmul.mubr.msk.f32.vlgmr.msra.gmra.mxu1 %vm330_vm3, %v6523_v55  ;;  %7884 = vmatprep.mubr.msk.f32.mxu0 %vm8826_vm2, %v8825_v16 }
 0x266   :  { %v9996_v62 = vadd.f32 %v687_v59, %v502_v49  ;;  %8019 = vmatpush3.msra.mxu1 %v2718_v58  ;;  %v7524_v63 = vpop.f32.mrf.mxu0  ;;  %7927 = vmatprep.mubr.msk.f32.mxu1 %vm8826_vm2, %v8825_v16 }
 0x267   :  { %8020 = vmatprep.subr.mxu1 %v8825_v16  ;;  %v7570_v2 = vpop.f32.mrf.mxu1 }
 0x268   :  { %8021 = vmatpush3.msra.mxu1 %v2716_v1  ;;  %v834_v4 = vpop.f32.mrf.mxu0  ;;  %7885 = vmatmul.mubr.msk.f32.gmra.mxu0 %vm330_vm3, %v6496_v61  ;;  %v6503_v61 = vld [vmem:[%s12232_s2 + $0x410] sm:$0xff] }
 0x269   :  { %v692_v5 = vpop.f32.mrf.mxu1  ;;  %v908_v6 = vadd.f32 %v834_v4, %v9820_v31  ;;  %7928 = vmatmul.mubr.msk.f32.gmra.mxu1 %vm330_vm3, %v6524_v0  ;;  %7887 = vmatprep.mubr.msk.f32.mxu0 %vm8826_vm2, %v8825_v16 }
 0x26a   :  { %v10012_v8 = vadd.f32 %v692_v5, %v507_v57  ;;  %v7583_v9 = vpop.f32.mrf.mxu0  ;;  %7930 = vmatprep.mubr.msk.f32.mxu1 %vm8826_vm2, %v8825_v16  ;;  %8116 = vmatprep.subr.mxu1 %v8825_v16 }
 0x26b   :  { %v7573_v31 = vpop.f32.mrf.mxu1 }
 0x26c   :  { %v839_v12 = vpop.f32.mrf.mxu0  ;;  %7888 = vmatmul.mubr.msk.f32.gmra.mxu0 %vm330_vm3, %v6497_v7 }
 0x26d   :  { %v697_v13 = vpop.f32.mrf.mxu1  ;;  %v909_v14 = vadd.f32 %v839_v12, %v9840_v39  ;;  %7931 = vmatmul.mubr.msk.f32.gmra.mxu1 %vm330_vm3, %v6525_v11  ;;  %7890 = vmatprep.mubr.msk.f32.mxu0 %vm8826_vm2, %v8825_v16  ;;  %v6526_v39 = vld [vmem:[%s12232_s2 + $0x450] sm:$0xff] }
 0x26e   :  { %v10029_v17 = vadd.f32 %v697_v13, %v9801_v23  ;;  %v7586_v19 = vpop.f32.mrf.mxu0  ;;  %7933 = vmatprep.mubr.msk.f32.mxu1 %vm8826_vm2, %v8825_v16  ;;  %v6499_v23 = vld [vmem:[%s12232_s2 + $0x3f0] sm:$0xff] }
 0x26f   :  { %v7576_v20 = vpop.f32.mrf.mxu1 }
 0x270   :  { %v844_v21 = vpop.f32.mrf.mxu0  ;;  %7891 = vmatmul.mubr.msk.f32.gmra.mxu0 %vm330_vm3, %v6498_v15 }
 0x271   :  { %v910_v22 = vadd.f32 %v844_v21, %v9854_v46  ;;  %v1056_v24 = vpop.f32.mrf.mxu1  ;;  %7934 = vmatmul.mubr.msk.f32.gmra.mxu1 %vm330_vm3, %v6526_v39  ;;  %7893 = vmatprep.mubr.msk.f32.mxu0 %vm8826_vm2, %v8825_v16  ;;  %v6527_v46 = vld [vmem:[%s12232_s2 + $0x458] sm:$0xff] }
 0x272   :  { %v10044_v25 = vadd.f32 %v1056_v24, %v908_v6  ;;  %v7589_v27 = vpop.f32.mrf.mxu0  ;;  %7936 = vmatprep.mubr.msk.f32.mxu1 %vm8826_vm2, %v8825_v16  ;;  %v6504_v6 = vld [vmem:[%s12232_s2 + $0x418] sm:$0xff]  ;;  %v6506_v24 = vld [vmem:[%s12232_s2 + $0x428] sm:$0xff] }
 0x273   :  { %v7632_v28 = vpop.f32.mrf.mxu1 }
 0x274   :  { %v849_v29 = vpop.f32.mrf.mxu0  ;;  %7894 = vmatmul.mubr.msk.f32.gmra.mxu0 %vm330_vm3, %v6499_v23 }
 0x275   :  { %v911_v30 = vadd.f32 %v849_v29, %v9868_v53  ;;  %v1061_v32 = vpop.f32.mrf.mxu1  ;;  %7937 = vmatmul.mubr.msk.f32.gmra.mxu1 %vm330_vm3, %v6527_v46  ;;  %7896 = vmatprep.mubr.msk.f32.mxu0 %vm8826_vm2, %v8825_v16  ;;  %v6528_v53 = vld [vmem:[%s12232_s2 + $0x460] sm:$0xff] }
 0x276   :  { %v10059_v35 = vadd.f32 %v1061_v32, %v909_v14  ;;  %v7592_v36 = vpop.f32.mrf.mxu0  ;;  %7939 = vmatprep.mubr.msk.f32.mxu1 %vm8826_vm2, %v8825_v16  ;;  %v6505_v14 = vld [vmem:[%s12232_s2 + $0x420] sm:$0xff]  ;;  %v6507_v32 = vld [vmem:[%s12232_s2 + $0x430] sm:$0xff] }
 0x277   :  { %v7635_v37 = vpop.f32.mrf.mxu1 }
 0x278   :  { %v854_v38 = vpop.f32.mrf.mxu0  ;;  %7897 = vmatmul.mubr.msk.f32.gmra.mxu0 %vm330_vm3, %v6500_v33 }
 0x279   :  { %v912_v40 = vadd.f32 %v854_v38, %v9882_v60  ;;  %v1066_v41 = vpop.f32.mrf.mxu1  ;;  %7940 = vmatmul.mubr.msk.f32.gmra.mxu1 %vm330_vm3, %v6528_v53  ;;  %7899 = vmatprep.mubr.msk.f32.mxu0 %vm8826_vm2, %v8825_v16  ;;  %v6529_v60 = vld [vmem:[%s12232_s2 + $0x468] sm:$0xff] }
 0x27a   :  { %v10074_v43 = vadd.f32 %v1066_v41, %v910_v22  ;;  %v7595_v45 = vpop.f32.mrf.mxu0  ;;  %7942 = vmatprep.mubr.msk.f32.mxu1 %vm8826_vm2, %v8825_v16  ;;  %v6553_v41 = vld [vmem:[%s12232_s2 + $0x4b0] sm:$0xff] }
 0x27b   :  { %v7638_v47 = vpop.f32.mrf.mxu1 }
 0x27c   :  { %v859_v48 = vpop.f32.mrf.mxu0  ;;  %7900 = vmatmul.mubr.msk.f32.gmra.mxu0 %vm330_vm3, %v6501_v42  ;;  %v2940_v47 = vpop.permute.xlu0 %2939 }
 0x27d   :  { %v913_v49 = vadd.f32 %v859_v48, %v9896_v3  ;;  %v1071_v50 = vpop.f32.mrf.mxu1  ;;  %7943 = vmatmul.mubr.msk.f32.gmra.mxu1 %vm330_vm3, %v6529_v60  ;;  %7902 = vmatprep.mubr.msk.f32.mxu0 %vm8826_vm2, %v8825_v16  ;;  %v6530_v3 = vld [vmem:[%s12232_s2 + $0x470] sm:$0xff] }
 0x27e   :  { %v10089_v54 = vadd.f32 %v1071_v50, %v911_v30  ;;  %v7598_v55 = vpop.f32.mrf.mxu0  ;;  %7945 = vmatprep.mubr.msk.f32.mxu1 %vm8826_vm2, %v8825_v16 }
 0x27f   :  { %v7641_v56 = vpop.f32.mrf.mxu1  ;;  %v2938_v55 = vpop.permute.xlu1 %2937 }
 0x280   :  { %v864_v57 = vpop.f32.mrf.mxu0  ;;  %7903 = vmatmul.mubr.msk.f32.gmra.mxu0 %vm330_vm3, %v6502_v51  ;;  %v6554_v51 = vld [vmem:[%s12232_s2 + $0x4b8] sm:$0xff] }
 0x281   :  { %v914_v58 = vadd.f32 %v864_v57, %v9910_v10  ;;  %v1076_v59 = vpop.f32.mrf.mxu1  ;;  %7946 = vmatmul.mubr.msk.f32.gmra.mxu1 %vm330_vm3, %v6530_v3  ;;  %7905 = vmatprep.mubr.msk.f32.mxu0 %vm8826_vm2, %v8825_v16  ;;  %v6531_v10 = vld [vmem:[%s12232_s2 + $0x478] sm:$0xff] }
 0x282   :  { %v10104_v63 = vadd.f32 %v1076_v59, %v912_v40  ;;  %v7601_v0 = vpop.f32.mrf.mxu0  ;;  %7948 = vmatprep.mubr.msk.f32.mxu1 %vm8826_vm2, %v8825_v16 }
 0x283   :  { %v7644_v1 = vpop.f32.mrf.mxu1  ;;  %v6555_v0 = vld [vmem:[%s12232_s2 + $0x4c0] sm:$0xff] }
 0x284   :  { %v869_v2 = vpop.f32.mrf.mxu0  ;;  %7906 = vmatmul.mubr.msk.f32.gmra.mxu0 %vm330_vm3, %v6503_v61 }
 0x285   :  { %v915_v4 = vadd.f32 %v869_v2, %v9924_v18  ;;  %v1081_v5 = vpop.f32.mrf.mxu1  ;;  %7949 = vmatmul.mubr.msk.f32.gmra.mxu1 %vm330_vm3, %v6531_v10  ;;  %7908 = vmatprep.mubr.msk.f32.mxu0 %vm8826_vm2, %v8825_v16  ;;  %v6532_v18 = vld [vmem:[%s12232_s2 + $0x480] sm:$0xff] }
 0x286   :  { %v10119_v7 = vadd.f32 %v1081_v5, %v913_v49  ;;  %v7604_v9 = vpop.f32.mrf.mxu0  ;;  %7951 = vmatprep.mubr.msk.f32.mxu1 %vm8826_vm2, %v8825_v16  ;;  %v3162_v5 = vpop.permute.xlu0 %3161 }
 0x287   :  { %v7647_v11 = vpop.f32.mrf.mxu1 }
 0x288   :  { %v874_v31 = vpop.f32.mrf.mxu0  ;;  %7909 = vmatmul.mubr.msk.f32.gmra.mxu0 %vm330_vm3, %v6504_v6 }
 0x289   :  { %v916_v12 = vadd.f32 %v874_v31, %v9938_v26  ;;  %v1086_v13 = vpop.f32.mrf.mxu1  ;;  %7952 = vmatmul.mubr.msk.f32.gmra.mxu1 %vm330_vm3, %v6532_v18  ;;  %7911 = vmatprep.mubr.msk.f32.mxu0 %vm8826_vm2, %v8825_v16  ;;  %v6533_v26 = vld [vmem:[%s12232_s2 + $0x488] sm:$0xff] }
 0x28a   :  { %v10134_v15 = vadd.f32 %v1086_v13, %v914_v58  ;;  %v7607_v19 = vpop.f32.mrf.mxu0  ;;  %7954 = vmatprep.mubr.msk.f32.mxu1 %vm8826_vm2, %v8825_v16  ;;  %v6556_v18 = vld [vmem:[%s12232_s2 + $0x4c8] sm:$0xff] }
 0x28b   :  { %v7650_v39 = vpop.f32.mrf.mxu1 }
 0x28c   :  { %v879_v20 = vpop.f32.mrf.mxu0  ;;  %7912 = vmatmul.mubr.msk.f32.gmra.mxu0 %vm330_vm3, %v6505_v14  ;;  %v6557_v39 = vld [vmem:[%s12232_s2 + $0x4d0] sm:$0xff] }
 0x28d   :  { %v917_v21 = vadd.f32 %v879_v20, %v9952_v34  ;;  %v1091_v22 = vpop.f32.mrf.mxu1  ;;  %7955 = vmatmul.mubr.msk.f32.gmra.mxu1 %vm330_vm3, %v6533_v26  ;;  %7914 = vmatprep.mubr.msk.f32.mxu0 %vm8826_vm2, %v8825_v16  ;;  %v6534_v34 = vld [vmem:[%s12232_s2 + $0x490] sm:$0xff] }
 0x28e   :  { %v10149_v23 = vadd.f32 %v1091_v22, %v915_v4  ;;  %v7610_v27 = vpop.f32.mrf.mxu0  ;;  %7957 = vmatprep.mubr.msk.f32.mxu1 %vm8826_vm2, %v8825_v16  ;;  %v6585_v22 = vld [vmem:[%s12232_s2 + $0x538] sm:$0xff] }
 0x28f   :  { %v7653_v46 = vpop.f32.mrf.mxu1 }
 0x290   :  { %v884_v28 = vpop.f32.mrf.mxu0  ;;  %7915 = vmatmul.mubr.msk.f32.gmra.mxu0 %vm330_vm3, %v6506_v24  ;;  %v6558_v46 = vld [vmem:[%s12232_s2 + $0x4d8] sm:$0xff] }
 0x291   :  { %v918_v29 = vadd.f32 %v884_v28, %v9964_v44  ;;  %v1096_v30 = vpop.f32.mrf.mxu1  ;;  %7958 = vmatmul.mubr.msk.f32.gmra.mxu1 %vm330_vm3, %v6534_v34  ;;  %7917 = vmatprep.mubr.msk.f32.mxu0 %vm8826_vm2, %v8825_v16  ;;  %v6535_v44 = vld [vmem:[%s12232_s2 + $0x498] sm:$0xff] }
 0x292   :  { %v10164_v33 = vadd.f32 %v1096_v30, %v916_v12  ;;  %v7613_v36 = vpop.f32.mrf.mxu0  ;;  %7960 = vmatprep.mubr.msk.f32.mxu1 %vm8826_vm2, %v8825_v16  ;;  %v3160_v12 = vpop.permute.xlu1 %3159  ;;  %v6586_v30 = vld [vmem:[%s12232_s2 + $0x540] sm:$0xff] }
 0x293   :  { %v7656_v53 = vpop.f32.mrf.mxu1 }
 0x294   :  { %v889_v37 = vpop.f32.mrf.mxu0  ;;  %7918 = vmatmul.mubr.msk.f32.gmra.mxu0 %vm330_vm3, %v6507_v32  ;;  %v6559_v53 = vld [vmem:[%s12232_s2 + $0x4e0] sm:$0xff] }
 0x295   :  { %v919_v38 = vadd.f32 %v889_v37, %v9982_v52  ;;  %v1101_v40 = vpop.f32.mrf.mxu1  ;;  %7961 = vmatmul.mubr.msk.f32.gmra.mxu1 %vm330_vm3, %v6535_v44  ;;  %7973 = vmatprep.mubr.msk.f32.mxu0 %vm8826_vm2, %v8825_v16  ;;  %v6536_v52 = vld [vmem:[%s12232_s2 + $0x4a0] sm:$0xff] }
 0x296   :  { %v10179_v42 = vadd.f32 %v1101_v40, %v917_v21  ;;  %v7616_v45 = vpop.f32.mrf.mxu0  ;;  %7963 = vmatprep.mubr.msk.f32.mxu1 %vm8826_vm2, %v8825_v16 }
 0x297   :  { %v7659_v60 = vpop.f32.mrf.mxu1 }
 0x298   :  { %v894_v48 = vpop.f32.mrf.mxu0  ;;  %7974 = vmatmul.mubr.msk.f32.vlgmr.msra.gmra.mxu0 %vm330_vm3, %v6553_v41  ;;  %v6560_v60 = vld [vmem:[%s12232_s2 + $0x4e8] sm:$0xff] }
 0x299   :  { %v920_v49 = vadd.f32 %v894_v48, %v9996_v62  ;;  %v1106_v50 = vpop.f32.mrf.mxu1  ;;  %7964 = vmatmul.mubr.msk.f32.gmra.mxu1 %vm330_vm3, %v6536_v52  ;;  %8068 = vmatpush3.msra.mxu0 %v2940_v47  ;;  %v6537_v62 = vld [vmem:[%s12232_s2 + $0x4a8] sm:$0xff] }
 0x29a   :  { %v10192_v3 = vadd.f32 %v1106_v50, %v918_v29  ;;  %8069 = vmatprep.subr.mxu0 %v8825_v16  ;;  %v7619_v56 = vpop.f32.mrf.mxu0  ;;  %7966 = vmatprep.mubr.msk.f32.mxu1 %vm8826_vm2, %v8825_v16 }
 0x29b   :  { %v7662_v57 = vpop.f32.mrf.mxu1  ;;  %8070 = vmatpush3.msra.mxu0 %v2938_v55  ;;  %7976 = vmatprep.mubr.msk.f32.mxu0 %vm8826_vm2, %v8825_v16  ;;  %v6561_v56 = vld [vmem:[%s12232_s2 + $0x4f0] sm:$0xff] }
 0x29c   :  { %v899_v58 = vpop.f32.mrf.mxu0  ;;  %7977 = vmatmul.mubr.msk.f32.gmra.mxu0 %vm330_vm3, %v6554_v51  ;;  %8165 = vmatprep.subr.mxu0 %v8825_v16 }
 0x29d   :  { %v921_v59 = vadd.f32 %v899_v58, %v10012_v8  ;;  %v1111_v61 = vpop.f32.mrf.mxu1  ;;  %7967 = vmatmul.mubr.msk.f32.gmra.mxu1 %vm330_vm3, %v6537_v62  ;;  %7979 = vmatprep.mubr.msk.f32.mxu0 %vm8826_vm2, %v8825_v16  ;;  %v6583_v8 = vld [vmem:[%s12232_s2 + $0x528] sm:$0xff] }
 0x29e   :  { %v10211_v10 = vadd.f32 %v1111_v61, %v919_v38  ;;  %v7622_v1 = vpop.f32.mrf.mxu0  ;;  %8022 = vmatprep.mubr.msk.f32.mxu1 %vm8826_vm2, %v8825_v16 }
 0x29f   :  { %v7665_v2 = vpop.f32.mrf.mxu1  ;;  %v6562_v1 = vld [vmem:[%s12232_s2 + $0x4f8] sm:$0xff] }
 0x2a0   :  { %v904_v4 = vpop.f32.mrf.mxu0  ;;  %7980 = vmatmul.mubr.msk.f32.gmra.mxu0 %vm330_vm3, %v6555_v0 }
 0x2a1   :  { %v922_v6 = vadd.f32 %v904_v4, %v10029_v17  ;;  %v1116_v9 = vpop.f32.mrf.mxu1  ;;  %8023 = vmatmul.mubr.msk.f32.vlgmr.msra.gmra.mxu1 %vm330_vm3, %v6583_v8  ;;  %7982 = vmatprep.mubr.msk.f32.mxu0 %vm8826_vm2, %v8825_v16  ;;  %v6584_v17 = vld [vmem:[%s12232_s2 + $0x530] sm:$0xff] }
 0x2a2   :  { %v10226_v11 = vadd.f32 %v1116_v9, %v920_v49  ;;  %8117 = vmatpush3.msra.mxu1 %v3162_v5  ;;  %v7625_v31 = vpop.f32.mrf.mxu0  ;;  %8025 = vmatprep.mubr.msk.f32.mxu1 %vm8826_vm2, %v8825_v16 }
 0x2a3   :  { %8118 = vmatprep.subr.mxu1 %v8825_v16  ;;  %v7668_v13 = vpop.f32.mrf.mxu1 }
 0x2a4   :  { %8119 = vmatpush3.msra.mxu1 %v3160_v12  ;;  %v1278_v14 = vpop.f32.mrf.mxu0  ;;  %7983 = vmatmul.mubr.msk.f32.gmra.mxu0 %vm330_vm3, %v6556_v18  ;;  %v6563_v18 = vld [vmem:[%s12232_s2 + $0x500] sm:$0xff] }
 0x2a5   :  { %v1121_v19 = vpop.f32.mrf.mxu1  ;;  %v1352_v26 = vadd.f32 %v1278_v14, %v10044_v25  ;;  %8026 = vmatmul.mubr.msk.f32.gmra.mxu1 %vm330_vm3, %v6584_v17  ;;  %7985 = vmatprep.mubr.msk.f32.mxu0 %vm8826_vm2, %v8825_v16 }
 0x2a6   :  { %v10242_v20 = vadd.f32 %v1121_v19, %v921_v59  ;;  %v7681_v21 = vpop.f32.mrf.mxu0  ;;  %8028 = vmatprep.mubr.msk.f32.mxu1 %vm8826_vm2, %v8825_v16  ;;  %8214 = vmatprep.subr.mxu1 %v8825_v16 }
 0x2a7   :  { %v7671_v25 = vpop.f32.mrf.mxu1 }
 0x2a8   :  { %v1283_v24 = vpop.f32.mrf.mxu0  ;;  %7986 = vmatmul.mubr.msk.f32.gmra.mxu0 %vm330_vm3, %v6557_v39 }
 0x2a9   :  { %v1126_v27 = vpop.f32.mrf.mxu1  ;;  %v1353_v34 = vadd.f32 %v1283_v24, %v10059_v35  ;;  %8029 = vmatmul.mubr.msk.f32.gmra.mxu1 %vm330_vm3, %v6585_v22  ;;  %7988 = vmatprep.mubr.msk.f32.mxu0 %vm8826_vm2, %v8825_v16 }
 0x2aa   :  { %v10258_v28 = vadd.f32 %v1126_v27, %v922_v6  ;;  %v7684_v29 = vpop.f32.mrf.mxu0  ;;  %8031 = vmatprep.mubr.msk.f32.mxu1 %vm8826_vm2, %v8825_v16 }
 0x2ab   :  { %v7674_v35 = vpop.f32.mrf.mxu1 }
 0x2ac   :  { %v1288_v32 = vpop.f32.mrf.mxu0  ;;  %7989 = vmatmul.mubr.msk.f32.gmra.mxu0 %vm330_vm3, %v6558_v46 }
 0x2ad   :  { %v1354_v36 = vadd.f32 %v1288_v32, %v10074_v43  ;;  %v1500_v44 = vpop.f32.mrf.mxu1  ;;  %8032 = vmatmul.mubr.msk.f32.gmra.mxu1 %vm330_vm3, %v6586_v30  ;;  %7991 = vmatprep.mubr.msk.f32.mxu0 %vm8826_vm2, %v8825_v16  ;;  %v6587_v43 = vld [vmem:[%s12232_s2 + $0x548] sm:$0xff] }
 0x2ae   :  { %v10273_v37 = vadd.f32 %v1500_v44, %v1352_v26  ;;  %v7687_v38 = vpop.f32.mrf.mxu0  ;;  %8034 = vmatprep.mubr.msk.f32.mxu1 %vm8826_vm2, %v8825_v16  ;;  %v6564_v26 = vld [vmem:[%s12232_s2 + $0x508] sm:$0xff]  ;;  %v6566_v44 = vld [vmem:[%s12232_s2 + $0x518] sm:$0xff] }
 0x2af   :  { %v7730_v40 = vpop.f32.mrf.mxu1 }
 0x2b0   :  { %v1293_v41 = vpop.f32.mrf.mxu0  ;;  %7992 = vmatmul.mubr.msk.f32.gmra.mxu0 %vm330_vm3, %v6559_v53 }
 0x2b1   :  { %v1355_v45 = vadd.f32 %v1293_v41, %v10089_v54  ;;  %v1505_v52 = vpop.f32.mrf.mxu1  ;;  %8035 = vmatmul.mubr.msk.f32.gmra.mxu1 %vm330_vm3, %v6587_v43  ;;  %7994 = vmatprep.mubr.msk.f32.mxu0 %vm8826_vm2, %v8825_v16  ;;  %v6588_v54 = vld [vmem:[%s12232_s2 + $0x550] sm:$0xff] }
 0x2b2   :  { %v10288_v47 = vadd.f32 %v1505_v52, %v1353_v34  ;;  %v7690_v48 = vpop.f32.mrf.mxu0  ;;  %8037 = vmatprep.mubr.msk.f32.mxu1 %vm8826_vm2, %v8825_v16  ;;  %v6565_v34 = vld [vmem:[%s12232_s2 + $0x510] sm:$0xff]  ;;  %v6567_v52 = vld [vmem:[%s12232_s2 + $0x520] sm:$0xff] }
 0x2b3   :  { %v7733_v49 = vpop.f32.mrf.mxu1 }
 0x2b4   :  { %v1298_v50 = vpop.f32.mrf.mxu0  ;;  %7995 = vmatmul.mubr.msk.f32.gmra.mxu0 %vm330_vm3, %v6560_v60 }
 0x2b5   :  { %v1356_v51 = vadd.f32 %v1298_v50, %v10104_v63  ;;  %v1510_v55 = vpop.f32.mrf.mxu1  ;;  %8038 = vmatmul.mubr.msk.f32.gmra.mxu1 %vm330_vm3, %v6588_v54  ;;  %7997 = vmatprep.mubr.msk.f32.mxu0 %vm8826_vm2, %v8825_v16  ;;  %v6589_v63 = vld [vmem:[%s12232_s2 + $0x558] sm:$0xff] }
 0x2b6   :  { %v10303_v62 = vadd.f32 %v1510_v55, %v1354_v36  ;;  %v7693_v57 = vpop.f32.mrf.mxu0  ;;  %8040 = vmatprep.mubr.msk.f32.mxu1 %vm8826_vm2, %v8825_v16  ;;  %v6613_v55 = vld [vmem:[%s12232_s2 + $0x5a0] sm:$0xff] }
 0x2b7   :  { %v7736_v58 = vpop.f32.mrf.mxu1 }
 0x2b8   :  { %v1303_v59 = vpop.f32.mrf.mxu0  ;;  %7998 = vmatmul.mubr.msk.f32.gmra.mxu0 %vm330_vm3, %v6561_v56  ;;  %v3384_v58 = vpop.permute.xlu0 %3383 }
 0x2b9   :  { %v1357_v61 = vadd.f32 %v1303_v59, %v10119_v7  ;;  %v1515_v0 = vpop.f32.mrf.mxu1  ;;  %8041 = vmatmul.mubr.msk.f32.gmra.mxu1 %vm330_vm3, %v6589_v63  ;;  %8000 = vmatprep.mubr.msk.f32.mxu0 %vm8826_vm2, %v8825_v16  ;;  %v6590_v7 = vld [vmem:[%s12232_s2 + $0x560] sm:$0xff] }
 0x2ba   :  { %v10318_v8 = vadd.f32 %v1515_v0, %v1355_v45  ;;  %v7696_v2 = vpop.f32.mrf.mxu0  ;;  %8043 = vmatprep.mubr.msk.f32.mxu1 %vm8826_vm2, %v8825_v16 }
 0x2bb   :  { %v7739_v4 = vpop.f32.mrf.mxu1  ;;  %v3382_v2 = vpop.permute.xlu1 %3381 }
 0x2bc   :  { %v1308_v5 = vpop.f32.mrf.mxu0  ;;  %8001 = vmatmul.mubr.msk.f32.gmra.mxu0 %vm330_vm3, %v6562_v1  ;;  %v6614_v1 = vld [vmem:[%s12232_s2 + $0x5a8] sm:$0xff] }
 0x2bd   :  { %v1358_v6 = vadd.f32 %v1308_v5, %v10134_v15  ;;  %v1520_v9 = vpop.f32.mrf.mxu1  ;;  %8044 = vmatmul.mubr.msk.f32.gmra.mxu1 %vm330_vm3, %v6590_v7  ;;  %8003 = vmatprep.mubr.msk.f32.mxu0 %vm8826_vm2, %v8825_v16  ;;  %v6591_v15 = vld [vmem:[%s12232_s2 + $0x568] sm:$0xff] }
 0x2be   :  { %v10333_v31 = vadd.f32 %v1520_v9, %v1356_v51  ;;  %v7699_v17 = vpop.f32.mrf.mxu0  ;;  %8046 = vmatprep.mubr.msk.f32.mxu1 %vm8826_vm2, %v8825_v16 }
 0x2bf   :  { %v7742_v12 = vpop.f32.mrf.mxu1  ;;  %v6615_v17 = vld [vmem:[%s12232_s2 + $0x5b0] sm:$0xff] }
 0x2c0   :  { %v1313_v13 = vpop.f32.mrf.mxu0  ;;  %8004 = vmatmul.mubr.msk.f32.gmra.mxu0 %vm330_vm3, %v6563_v18 }
 0x2c1   :  { %v1359_v14 = vadd.f32 %v1313_v13, %v10149_v23  ;;  %v1525_v19 = vpop.f32.mrf.mxu1  ;;  %8047 = vmatmul.mubr.msk.f32.gmra.mxu1 %vm330_vm3, %v6591_v15  ;;  %8006 = vmatprep.mubr.msk.f32.mxu0 %vm8826_vm2, %v8825_v16  ;;  %v6592_v23 = vld [vmem:[%s12232_s2 + $0x570] sm:$0xff] }
 0x2c2   :  { %v10348_v39 = vadd.f32 %v1525_v19, %v1357_v61  ;;  %v7702_v21 = vpop.f32.mrf.mxu0  ;;  %8049 = vmatprep.mubr.msk.f32.mxu1 %vm8826_vm2, %v8825_v16  ;;  %v3606_v19 = vpop.permute.xlu0 %3605 }
 0x2c3   :  { %v7745_v22 = vpop.f32.mrf.mxu1 }
 0x2c4   :  { %v1318_v25 = vpop.f32.mrf.mxu0  ;;  %8007 = vmatmul.mubr.msk.f32.gmra.mxu0 %vm330_vm3, %v6564_v26 }
 0x2c5   :  { %v1360_v24 = vadd.f32 %v1318_v25, %v10164_v33  ;;  %v1530_v27 = vpop.f32.mrf.mxu1  ;;  %8050 = vmatmul.mubr.msk.f32.gmra.mxu1 %vm330_vm3, %v6592_v23  ;;  %8009 = vmatprep.mubr.msk.f32.mxu0 %vm8826_vm2, %v8825_v16  ;;  %v6593_v33 = vld [vmem:[%s12232_s2 + $0x578] sm:$0xff] }
 0x2c6   :  { %v10363_v46 = vadd.f32 %v1530_v27, %v1358_v6  ;;  %v7705_v29 = vpop.f32.mrf.mxu0  ;;  %8052 = vmatprep.mubr.msk.f32.mxu1 %vm8826_vm2, %v8825_v16  ;;  %v6616_v23 = vld [vmem:[%s12232_s2 + $0x5b8] sm:$0xff] }
 0x2c7   :  { %v7748_v30 = vpop.f32.mrf.mxu1 }
 0x2c8   :  { %v1323_v35 = vpop.f32.mrf.mxu0  ;;  %8010 = vmatmul.mubr.msk.f32.gmra.mxu0 %vm330_vm3, %v6565_v34  ;;  %v6617_v30 = vld [vmem:[%s12232_s2 + $0x5c0] sm:$0xff] }
 0x2c9   :  { %v1361_v32 = vadd.f32 %v1323_v35, %v10179_v42  ;;  %v1535_v36 = vpop.f32.mrf.mxu1  ;;  %8053 = vmatmul.mubr.msk.f32.gmra.mxu1 %vm330_vm3, %v6593_v33  ;;  %8012 = vmatprep.mubr.msk.f32.mxu0 %vm8826_vm2, %v8825_v16  ;;  %v6594_v42 = vld [vmem:[%s12232_s2 + $0x580] sm:$0xff] }
 0x2ca   :  { %v10378_v53 = vadd.f32 %v1535_v36, %v1359_v14  ;;  %v7708_v38 = vpop.f32.mrf.mxu0  ;;  %8055 = vmatprep.mubr.msk.f32.mxu1 %vm8826_vm2, %v8825_v16  ;;  %v6645_v36 = vld [vmem:[%s12232_s2 + $0x628] sm:$0xff] }
 0x2cb   :  { %v7751_v43 = vpop.f32.mrf.mxu1 }
 0x2cc   :  { %v1328_v40 = vpop.f32.mrf.mxu0  ;;  %8013 = vmatmul.mubr.msk.f32.gmra.mxu0 %vm330_vm3, %v6566_v44  ;;  %v6618_v43 = vld [vmem:[%s12232_s2 + $0x5c8] sm:$0xff] }
 0x2cd   :  { %v1362_v41 = vadd.f32 %v1328_v40, %v10192_v3  ;;  %v1540_v45 = vpop.f32.mrf.mxu1  ;;  %8056 = vmatmul.mubr.msk.f32.gmra.mxu1 %vm330_vm3, %v6594_v42  ;;  %8015 = vmatprep.mubr.msk.f32.mxu0 %vm8826_vm2, %v8825_v16  ;;  %v6595_v3 = vld [vmem:[%s12232_s2 + $0x588] sm:$0xff] }
 0x2ce   :  { %v10393_v60 = vadd.f32 %v1540_v45, %v1360_v24  ;;  %v7711_v48 = vpop.f32.mrf.mxu0  ;;  %8058 = vmatprep.mubr.msk.f32.mxu1 %vm8826_vm2, %v8825_v16  ;;  %v3604_v24 = vpop.permute.xlu1 %3603  ;;  %v6646_v45 = vld [vmem:[%s12232_s2 + $0x630] sm:$0xff] }
 0x2cf   :  { %v7754_v54 = vpop.f32.mrf.mxu1 }
 0x2d0   :  { %v1333_v49 = vpop.f32.mrf.mxu0  ;;  %8016 = vmatmul.mubr.msk.f32.gmra.mxu0 %vm330_vm3, %v6567_v52  ;;  %v6619_v54 = vld [vmem:[%s12232_s2 + $0x5d0] sm:$0xff] }
 0x2d1   :  { %v1363_v50 = vadd.f32 %v1333_v49, %v10211_v10  ;;  %v1545_v51 = vpop.f32.mrf.mxu1  ;;  %8059 = vmatmul.mubr.msk.f32.gmra.mxu1 %vm330_vm3, %v6595_v3  ;;  %8071 = vmatprep.mubr.msk.f32.mxu0 %vm8826_vm2, %v8825_v16  ;;  %v6596_v10 = vld [vmem:[%s12232_s2 + $0x590] sm:$0xff] }
 0x2d2   :  { %v10408_v56 = vadd.f32 %v1545_v51, %v1361_v32  ;;  %v7714_v57 = vpop.f32.mrf.mxu0  ;;  %8061 = vmatprep.mubr.msk.f32.mxu1 %vm8826_vm2, %v8825_v16 }
 0x2d3   :  { %v7757_v63 = vpop.f32.mrf.mxu1 }
 0x2d4   :  { %v1338_v59 = vpop.f32.mrf.mxu0  ;;  %8072 = vmatmul.mubr.msk.f32.vlgmr.msra.gmra.mxu0 %vm330_vm3, %v6613_v55  ;;  %v6620_v63 = vld [vmem:[%s12232_s2 + $0x5d8] sm:$0xff] }
 0x2d5   :  { %v1364_v61 = vadd.f32 %v1338_v59, %v10226_v11  ;;  %v1550_v0 = vpop.f32.mrf.mxu1  ;;  %8062 = vmatmul.mubr.msk.f32.gmra.mxu1 %vm330_vm3, %v6596_v10  ;;  %8166 = vmatpush3.msra.mxu0 %v3384_v58  ;;  %v6597_v11 = vld [vmem:[%s12232_s2 + $0x598] sm:$0xff] }
 0x2d6   :  { %v10421_v7 = vadd.f32 %v1550_v0, %v1362_v41  ;;  %8167 = vmatprep.subr.mxu0 %v8825_v16  ;;  %v7717_v4 = vpop.f32.mrf.mxu0  ;;  %8064 = vmatprep.mubr.msk.f32.mxu1 %vm8826_vm2, %v8825_v16 }
 0x2d7   :  { %v7760_v5 = vpop.f32.mrf.mxu1  ;;  %8168 = vmatpush3.msra.mxu0 %v3382_v2  ;;  %8074 = vmatprep.mubr.msk.f32.mxu0 %vm8826_vm2, %v8825_v16  ;;  %v6621_v4 = vld [vmem:[%s12232_s2 + $0x5e0] sm:$0xff] }
 0x2d8   :  { %v1343_v6 = vpop.f32.mrf.mxu0  ;;  %8075 = vmatmul.mubr.msk.f32.gmra.mxu0 %vm330_vm3, %v6614_v1  ;;  %8263 = vmatprep.subr.mxu0 %v8825_v16 }
 0x2d9   :  { %v1365_v9 = vadd.f32 %v1343_v6, %v10242_v20  ;;  %v1555_v18 = vpop.f32.mrf.mxu1  ;;  %8065 = vmatmul.mubr.msk.f32.gmra.mxu1 %vm330_vm3, %v6597_v11  ;;  %8077 = vmatprep.mubr.msk.f32.mxu0 %vm8826_vm2, %v8825_v16  ;;  %v6643_v20 = vld [vmem:[%s12232_s2 + $0x618] sm:$0xff] }
 0x2da   :  { %v10440_v15 = vadd.f32 %v1555_v18, %v1363_v50  ;;  %v7720_v12 = vpop.f32.mrf.mxu0  ;;  %8120 = vmatprep.mubr.msk.f32.mxu1 %vm8826_vm2, %v8825_v16 }
 0x2db   :  { %v7763_v13 = vpop.f32.mrf.mxu1  ;;  %v6622_v12 = vld [vmem:[%s12232_s2 + $0x5e8] sm:$0xff] }
 0x2dc   :  { %v1348_v14 = vpop.f32.mrf.mxu0  ;;  %8078 = vmatmul.mubr.msk.f32.gmra.mxu0 %vm330_vm3, %v6615_v17 }
 0x2dd   :  { %v1366_v26 = vadd.f32 %v1348_v14, %v10258_v28  ;;  %v1560_v21 = vpop.f32.mrf.mxu1  ;;  %8121 = vmatmul.mubr.msk.f32.vlgmr.msra.gmra.mxu1 %vm330_vm3, %v6643_v20  ;;  %8080 = vmatprep.mubr.msk.f32.mxu0 %vm8826_vm2, %v8825_v16  ;;  %v6644_v28 = vld [vmem:[%s12232_s2 + $0x620] sm:$0xff] }
 0x2de   :  { %v10455_v22 = vadd.f32 %v1560_v21, %v1364_v61  ;;  %8215 = vmatpush3.msra.mxu1 %v3606_v19  ;;  %v7723_v25 = vpop.f32.mrf.mxu0  ;;  %8123 = vmatprep.mubr.msk.f32.mxu1 %vm8826_vm2, %v8825_v16 }
 0x2df   :  { %8216 = vmatprep.subr.mxu1 %v8825_v16  ;;  %v7766_v27 = vpop.f32.mrf.mxu1 }
 0x2e0   :  { %8217 = vmatpush3.msra.mxu1 %v3604_v24  ;;  %v1722_v34 = vpop.f32.mrf.mxu0  ;;  %8081 = vmatmul.mubr.msk.f32.gmra.mxu0 %vm330_vm3, %v6616_v23  ;;  %v6623_v23 = vld [vmem:[%s12232_s2 + $0x5f0] sm:$0xff] }
 0x2e1   :  { %v1565_v29 = vpop.f32.mrf.mxu1  ;;  %v1796_v33 = vadd.f32 %v1722_v34, %v10273_v37  ;;  %8124 = vmatmul.mubr.msk.f32.gmra.mxu1 %vm330_vm3, %v6644_v28  ;;  %8083 = vmatprep.mubr.msk.f32.mxu0 %vm8826_vm2, %v8825_v16 }
 0x2e2   :  { %v10471_v35 = vadd.f32 %v1565_v29, %v1365_v9  ;;  %v7779_v32 = vpop.f32.mrf.mxu0  ;;  %8126 = vmatprep.mubr.msk.f32.mxu1 %vm8826_vm2, %v8825_v16  ;;  %8312 = vmatprep.subr.mxu1 %v8825_v16 }
 0x2e3   :  { %v7769_v37 = vpop.f32.mrf.mxu1 }
 0x2e4   :  { %v1727_v44 = vpop.f32.mrf.mxu0  ;;  %8084 = vmatmul.mubr.msk.f32.gmra.mxu0 %vm330_vm3, %v6617_v30 }
 0x2e5   :  { %v1570_v38 = vpop.f32.mrf.mxu1  ;;  %v1797_v42 = vadd.f32 %v1727_v44, %v10288_v47  ;;  %8127 = vmatmul.mubr.msk.f32.gmra.mxu1 %vm330_vm3, %v6645_v36  ;;  %8086 = vmatprep.mubr.msk.f32.mxu0 %vm8826_vm2, %v8825_v16 }
 0x2e6   :  { %v10487_v40 = vadd.f32 %v1570_v38, %v1366_v26  ;;  %v7782_v41 = vpop.f32.mrf.mxu0  ;;  %8129 = vmatprep.mubr.msk.f32.mxu1 %vm8826_vm2, %v8825_v16 }
 0x2e7   :  { %v7772_v47 = vpop.f32.mrf.mxu1 }
 0x2e8   :  { %v1732_v52 = vpop.f32.mrf.mxu0  ;;  %8087 = vmatmul.mubr.msk.f32.gmra.mxu0 %vm330_vm3, %v6618_v43 }
 0x2e9   :  { %v1798_v48 = vadd.f32 %v1732_v52, %v10303_v62  ;;  %v1944_v3 = vpop.f32.mrf.mxu1  ;;  %8130 = vmatmul.mubr.msk.f32.gmra.mxu1 %vm330_vm3, %v6646_v45  ;;  %8089 = vmatprep.mubr.msk.f32.mxu0 %vm8826_vm2, %v8825_v16  ;;  %v6647_v62 = vld [vmem:[%s12232_s2 + $0x638] sm:$0xff] }
 0x2ea   :  { %v10502_v49 = vadd.f32 %v1944_v3, %v1796_v33  ;;  %v7785_v50 = vpop.f32.mrf.mxu0  ;;  %8132 = vmatprep.mubr.msk.f32.mxu1 %vm8826_vm2, %v8825_v16  ;;  %v6624_v33 = vld [vmem:[%s12232_s2 + $0x5f8] sm:$0xff]  ;;  %v6626_v3 = vld [vmem:[%s12232_s2 + $0x608] sm:$0xff] }
 0x2eb   :  { %v7828_v51 = vpop.f32.mrf.mxu1 }
 0x2ec   :  { %v1737_v55 = vpop.f32.mrf.mxu0  ;;  %8090 = vmatmul.mubr.msk.f32.gmra.mxu0 %vm330_vm3, %v6619_v54 }
 0x2ed   :  { %v1799_v57 = vadd.f32 %v1737_v55, %v10318_v8  ;;  %v1949_v10 = vpop.f32.mrf.mxu1  ;;  %8133 = vmatmul.mubr.msk.f32.gmra.mxu1 %vm330_vm3, %v6647_v62  ;;  %8092 = vmatprep.mubr.msk.f32.mxu0 %vm8826_vm2, %v8825_v16  ;;  %v6648_v8 = vld [vmem:[%s12232_s2 + $0x640] sm:$0xff] }
 0x2ee   :  { %v10517_v58 = vadd.f32 %v1949_v10, %v1797_v42  ;;  %v7788_v59 = vpop.f32.mrf.mxu0  ;;  %8135 = vmatprep.mubr.msk.f32.mxu1 %vm8826_vm2, %v8825_v16  ;;  %v6625_v42 = vld [vmem:[%s12232_s2 + $0x600] sm:$0xff]  ;;  %v6627_v10 = vld [vmem:[%s12232_s2 + $0x610] sm:$0xff] }
 0x2ef   :  { %v7831_v61 = vpop.f32.mrf.mxu1 }
 0x2f0   :  { %v1742_v0 = vpop.f32.mrf.mxu0  ;;  %8093 = vmatmul.mubr.msk.f32.gmra.mxu0 %vm330_vm3, %v6620_v63 }
 0x2f1   :  { %v1800_v1 = vadd.f32 %v1742_v0, %v10333_v31  ;;  %v1954_v2 = vpop.f32.mrf.mxu1  ;;  %8136 = vmatmul.mubr.msk.f32.gmra.mxu1 %vm330_vm3, %v6648_v8  ;;  %8095 = vmatprep.mubr.msk.f32.mxu0 %vm8826_vm2, %v8825_v16  ;;  %v6649_v31 = vld [vmem:[%s12232_s2 + $0x648] sm:$0xff] }
 0x2f2   :  { %v10532_v11 = vadd.f32 %v1954_v2, %v1798_v48  ;;  %v7791_v5 = vpop.f32.mrf.mxu0  ;;  %8138 = vmatprep.mubr.msk.f32.mxu1 %vm8826_vm2, %v8825_v16  ;;  %v6673_v2 = vld [vmem:[%s12232_s2 + $0x690] sm:$0xff] }
 0x2f3   :  { %v7834_v6 = vpop.f32.mrf.mxu1 }
 0x2f4   :  { %v1747_v9 = vpop.f32.mrf.mxu0  ;;  %8096 = vmatmul.mubr.msk.f32.gmra.mxu0 %vm330_vm3, %v6621_v4  ;;  %v3828_v6 = vpop.permute.xlu0 %3827 }
 0x2f5   :  { %v1801_v18 = vadd.f32 %v1747_v9, %v10348_v39  ;;  %v1959_v17 = vpop.f32.mrf.mxu1  ;;  %8139 = vmatmul.mubr.msk.f32.gmra.mxu1 %vm330_vm3, %v6649_v31  ;;  %8098 = vmatprep.mubr.msk.f32.mxu0 %vm8826_vm2, %v8825_v16  ;;  %v6650_v39 = vld [vmem:[%s12232_s2 + $0x650] sm:$0xff] }
 0x2f6   :  { %v10547_v20 = vadd.f32 %v1959_v17, %v1799_v57  ;;  %v7794_v13 = vpop.f32.mrf.mxu0  ;;  %8141 = vmatprep.mubr.msk.f32.mxu1 %vm8826_vm2, %v8825_v16 }
 0x2f7   :  { %v7837_v14 = vpop.f32.mrf.mxu1  ;;  %v3826_v13 = vpop.permute.xlu1 %3825 }
 0x2f8   :  { %v1752_v19 = vpop.f32.mrf.mxu0  ;;  %8099 = vmatmul.mubr.msk.f32.gmra.mxu0 %vm330_vm3, %v6622_v12  ;;  %v6674_v12 = vld [vmem:[%s12232_s2 + $0x698] sm:$0xff] }
 0x2f9   :  { %v1802_v26 = vadd.f32 %v1752_v19, %v10363_v46  ;;  %v1964_v21 = vpop.f32.mrf.mxu1  ;;  %8142 = vmatmul.mubr.msk.f32.gmra.mxu1 %vm330_vm3, %v6650_v39  ;;  %8101 = vmatprep.mubr.msk.f32.mxu0 %vm8826_vm2, %v8825_v16  ;;  %v6651_v46 = vld [vmem:[%s12232_s2 + $0x658] sm:$0xff] }
 0x2fa   :  { %v10562_v25 = vadd.f32 %v1964_v21, %v1800_v1  ;;  %v7797_v28 = vpop.f32.mrf.mxu0  ;;  %8144 = vmatprep.mubr.msk.f32.mxu1 %vm8826_vm2, %v8825_v16 }
 0x2fb   :  { %v7840_v24 = vpop.f32.mrf.mxu1  ;;  %v6675_v28 = vld [vmem:[%s12232_s2 + $0x6a0] sm:$0xff] }
 0x2fc   :  { %v1757_v27 = vpop.f32.mrf.mxu0  ;;  %8102 = vmatmul.mubr.msk.f32.gmra.mxu0 %vm330_vm3, %v6623_v23 }
 0x2fd   :  { %v1803_v34 = vadd.f32 %v1757_v27, %v10378_v53  ;;  %v1969_v29 = vpop.f32.mrf.mxu1  ;;  %8145 = vmatmul.mubr.msk.f32.gmra.mxu1 %vm330_vm3, %v6651_v46  ;;  %8104 = vmatprep.mubr.msk.f32.mxu0 %vm8826_vm2, %v8825_v16  ;;  %v6652_v53 = vld [vmem:[%s12232_s2 + $0x660] sm:$0xff] }
 0x2fe   :  { %v10577_v30 = vadd.f32 %v1969_v29, %v1801_v18  ;;  %v7800_v32 = vpop.f32.mrf.mxu0  ;;  %8147 = vmatprep.mubr.msk.f32.mxu1 %vm8826_vm2, %v8825_v16  ;;  %v4050_v29 = vpop.permute.xlu0 %4049 }
 0x2ff   :  { %v7843_v36 = vpop.f32.mrf.mxu1 }
 0x300   :  { %v1762_v37 = vpop.f32.mrf.mxu0  ;;  %8105 = vmatmul.mubr.msk.f32.gmra.mxu0 %vm330_vm3, %v6624_v33 }
 0x301   :  { %v1804_v44 = vadd.f32 %v1762_v37, %v10393_v60  ;;  %v1974_v38 = vpop.f32.mrf.mxu1  ;;  %8148 = vmatmul.mubr.msk.f32.gmra.mxu1 %vm330_vm3, %v6652_v53  ;;  %8107 = vmatprep.mubr.msk.f32.mxu0 %vm8826_vm2, %v8825_v16  ;;  %v6653_v60 = vld [vmem:[%s12232_s2 + $0x668] sm:$0xff] }
 0x302   :  { %v10592_v43 = vadd.f32 %v1974_v38, %v1802_v26  ;;  %v7803_v41 = vpop.f32.mrf.mxu0  ;;  %8150 = vmatprep.mubr.msk.f32.mxu1 %vm8826_vm2, %v8825_v16  ;;  %v6676_v53 = vld [vmem:[%s12232_s2 + $0x6a8] sm:$0xff] }
 0x303   :  { %v7846_v45 = vpop.f32.mrf.mxu1 }
 0x304   :  { %v1767_v47 = vpop.f32.mrf.mxu0  ;;  %8108 = vmatmul.mubr.msk.f32.gmra.mxu0 %vm330_vm3, %v6625_v42  ;;  %v6677_v45 = vld [vmem:[%s12232_s2 + $0x6b0] sm:$0xff] }
 0x305   :  { %v1805_v52 = vadd.f32 %v1767_v47, %v10408_v56  ;;  %v1979_v48 = vpop.f32.mrf.mxu1  ;;  %8151 = vmatmul.mubr.msk.f32.gmra.mxu1 %vm330_vm3, %v6653_v60  ;;  %8110 = vmatprep.mubr.msk.f32.mxu0 %vm8826_vm2, %v8825_v16  ;;  %v6654_v56 = vld [vmem:[%s12232_s2 + $0x670] sm:$0xff] }
 0x306   :  { %v10607_v54 = vadd.f32 %v1979_v48, %v1803_v34  ;;  %v7806_v50 = vpop.f32.mrf.mxu0  ;;  %8153 = vmatprep.mubr.msk.f32.mxu1 %vm8826_vm2, %v8825_v16  ;;  %v6705_v48 = vld [vmem:[%s12232_s2 + $0x718] sm:$0xff] }
 0x307   :  { %v7849_v62 = vpop.f32.mrf.mxu1 }
 0x308   :  { %v1772_v51 = vpop.f32.mrf.mxu0  ;;  %8111 = vmatmul.mubr.msk.f32.gmra.mxu0 %vm330_vm3, %v6626_v3  ;;  %v6678_v62 = vld [vmem:[%s12232_s2 + $0x6b8] sm:$0xff] }
 0x309   :  { %v1806_v55 = vadd.f32 %v1772_v51, %v10421_v7  ;;  %v1984_v57 = vpop.f32.mrf.mxu1  ;;  %8154 = vmatmul.mubr.msk.f32.gmra.mxu1 %vm330_vm3, %v6654_v56  ;;  %8113 = vmatprep.mubr.msk.f32.mxu0 %vm8826_vm2, %v8825_v16  ;;  %v6655_v7 = vld [vmem:[%s12232_s2 + $0x678] sm:$0xff] }
 0x30a   :  { %v10622_v63 = vadd.f32 %v1984_v57, %v1804_v44  ;;  %v7809_v59 = vpop.f32.mrf.mxu0  ;;  %8156 = vmatprep.mubr.msk.f32.mxu1 %vm8826_vm2, %v8825_v16  ;;  %v4048_v44 = vpop.permute.xlu1 %4047  ;;  %v6706_v57 = vld [vmem:[%s12232_s2 + $0x720] sm:$0xff] }
 0x30b   :  { %v7852_v8 = vpop.f32.mrf.mxu1 }
 0x30c   :  { %v1777_v61 = vpop.f32.mrf.mxu0  ;;  %8114 = vmatmul.mubr.msk.f32.gmra.mxu0 %vm330_vm3, %v6627_v10  ;;  %v6679_v8 = vld [vmem:[%s12232_s2 + $0x6c0] sm:$0xff] }
 0x30d   :  { %v1807_v0 = vadd.f32 %v1777_v61, %v10440_v15  ;;  %v1989_v1 = vpop.f32.mrf.mxu1  ;;  %8157 = vmatmul.mubr.msk.f32.gmra.mxu1 %vm330_vm3, %v6655_v7  ;;  %8169 = vmatprep.mubr.msk.f32.mxu0 %vm8826_vm2, %v8825_v16  ;;  %v6656_v15 = vld [vmem:[%s12232_s2 + $0x680] sm:$0xff] }
 0x30e   :  { %v10637_v4 = vadd.f32 %v1989_v1, %v1805_v52  ;;  %v7812_v5 = vpop.f32.mrf.mxu0  ;;  %8159 = vmatprep.mubr.msk.f32.mxu1 %vm8826_vm2, %v8825_v16 }
 0x30f   :  { %v7855_v31 = vpop.f32.mrf.mxu1 }
 0x310   :  { %v1782_v9 = vpop.f32.mrf.mxu0  ;;  %8170 = vmatmul.mubr.msk.f32.vlgmr.msra.gmra.mxu0 %vm330_vm3, %v6673_v2  ;;  %v6680_v31 = vld [vmem:[%s12232_s2 + $0x6c8] sm:$0xff] }
 0x311   :  { %v1808_v18 = vadd.f32 %v1782_v9, %v10455_v22  ;;  %v1994_v17 = vpop.f32.mrf.mxu1  ;;  %8160 = vmatmul.mubr.msk.f32.gmra.mxu1 %vm330_vm3, %v6656_v15  ;;  %8264 = vmatpush3.msra.mxu0 %v3828_v6  ;;  %v6657_v22 = vld [vmem:[%s12232_s2 + $0x688] sm:$0xff] }
 0x312   :  { %v10650_v39 = vadd.f32 %v1994_v17, %v1806_v55  ;;  %8265 = vmatprep.subr.mxu0 %v8825_v16  ;;  %v7815_v14 = vpop.f32.mrf.mxu0  ;;  %8162 = vmatprep.mubr.msk.f32.mxu1 %vm8826_vm2, %v8825_v16 }
 0x313   :  { %v7858_v19 = vpop.f32.mrf.mxu1  ;;  %8266 = vmatpush3.msra.mxu0 %v3826_v13  ;;  %8172 = vmatprep.mubr.msk.f32.mxu0 %vm8826_vm2, %v8825_v16  ;;  %v6681_v14 = vld [vmem:[%s12232_s2 + $0x6d0] sm:$0xff] }
 0x314   :  { %v1787_v26 = vpop.f32.mrf.mxu0  ;;  %8173 = vmatmul.mubr.msk.f32.gmra.mxu0 %vm330_vm3, %v6674_v12  ;;  %8361 = vmatprep.subr.mxu0 %v8825_v16 }
 0x315   :  { %v1809_v21 = vadd.f32 %v1787_v26, %v10471_v35  ;;  %v1999_v23 = vpop.f32.mrf.mxu1  ;;  %8163 = vmatmul.mubr.msk.f32.gmra.mxu1 %vm330_vm3, %v6657_v22  ;;  %8175 = vmatprep.mubr.msk.f32.mxu0 %vm8826_vm2, %v8825_v16  ;;  %v6703_v35 = vld [vmem:[%s12232_s2 + $0x708] sm:$0xff] }
 0x316   :  { %v10669_v46 = vadd.f32 %v1999_v23, %v1807_v0  ;;  %v7818_v24 = vpop.f32.mrf.mxu0  ;;  %8218 = vmatprep.mubr.msk.f32.mxu1 %vm8826_vm2, %v8825_v16 }
 0x317   :  { %v7861_v27 = vpop.f32.mrf.mxu1  ;;  %v6682_v24 = vld [vmem:[%s12232_s2 + $0x6d8] sm:$0xff] }
 0x318   :  { %v1792_v34 = vpop.f32.mrf.mxu0  ;;  %8176 = vmatmul.mubr.msk.f32.gmra.mxu0 %vm330_vm3, %v6675_v28 }
 0x319   :  { %v1810_v33 = vadd.f32 %v1792_v34, %v10487_v40  ;;  %v2004_v32 = vpop.f32.mrf.mxu1  ;;  %8219 = vmatmul.mubr.msk.f32.vlgmr.msra.gmra.mxu1 %vm330_vm3, %v6703_v35  ;;  %8178 = vmatprep.mubr.msk.f32.mxu0 %vm8826_vm2, %v8825_v16  ;;  %v6704_v40 = vld [vmem:[%s12232_s2 + $0x710] sm:$0xff] }
 0x31a   :  { %v10684_v36 = vadd.f32 %v2004_v32, %v1808_v18  ;;  %8313 = vmatpush3.msra.mxu1 %v4050_v29  ;;  %v7821_v37 = vpop.f32.mrf.mxu0  ;;  %8221 = vmatprep.mubr.msk.f32.mxu1 %vm8826_vm2, %v8825_v16 }
 0x31b   :  { %8314 = vmatprep.subr.mxu1 %v8825_v16  ;;  %v7864_v38 = vpop.f32.mrf.mxu1 }
 0x31c   :  { %8315 = vmatpush3.msra.mxu1 %v4048_v44  ;;  %v2166_v42 = vpop.f32.mrf.mxu0  ;;  %8179 = vmatmul.mubr.msk.f32.gmra.mxu0 %vm330_vm3, %v6676_v53  ;;  %v6683_v53 = vld [vmem:[%s12232_s2 + $0x6e0] sm:$0xff] }
 0x31d   :  { %v2009_v41 = vpop.f32.mrf.mxu1  ;;  %v2240_v60 = vadd.f32 %v2166_v42, %v10502_v49  ;;  %8222 = vmatmul.mubr.msk.f32.gmra.mxu1 %vm330_vm3, %v6704_v40  ;;  %8181 = vmatprep.mubr.msk.f32.mxu0 %vm8826_vm2, %v8825_v16 }
 0x31e   :  { %v10700_v47 = vadd.f32 %v2009_v41, %v1809_v21  ;;  %v7877_v52 = vpop.f32.mrf.mxu0  ;;  %8224 = vmatprep.mubr.msk.f32.mxu1 %vm8826_vm2, %v8825_v16  ;;  %8410 = vmatprep.subr.mxu1 %v8825_v16 }
 0x31f   :  { %v7867_v49 = vpop.f32.mrf.mxu1 }
 0x320   :  { %v2171_v3 = vpop.f32.mrf.mxu0  ;;  %8182 = vmatmul.mubr.msk.f32.gmra.mxu0 %vm330_vm3, %v6677_v45 }
 0x321   :  { %v2014_v50 = vpop.f32.mrf.mxu1  ;;  %v2241_v56 = vadd.f32 %v2171_v3, %v10517_v58  ;;  %8225 = vmatmul.mubr.msk.f32.gmra.mxu1 %vm330_vm3, %v6705_v48  ;;  %8184 = vmatprep.mubr.msk.f32.mxu0 %vm8826_vm2, %v8825_v16 }
 0x322   :  { %v10716_v51 = vadd.f32 %v2014_v50, %v1810_v33  ;;  %v7880_v55 = vpop.f32.mrf.mxu0  ;;  %8227 = vmatprep.mubr.msk.f32.mxu1 %vm8826_vm2, %v8825_v16 }
 0x323   :  { %v7870_v58 = vpop.f32.mrf.mxu1 }
 0x324   :  { %v2176_v10 = vpop.f32.mrf.mxu0  ;;  %8185 = vmatmul.mubr.msk.f32.gmra.mxu0 %vm330_vm3, %v6678_v62 }
 0x325   :  { %v2242_v59 = vadd.f32 %v2176_v10, %v10532_v11  ;;  %v2388_v7 = vpop.f32.mrf.mxu1  ;;  %8228 = vmatmul.mubr.msk.f32.gmra.mxu1 %vm330_vm3, %v6706_v57  ;;  %8187 = vmatprep.mubr.msk.f32.mxu0 %vm8826_vm2, %v8825_v16  ;;  %v6707_v11 = vld [vmem:[%s12232_s2 + $0x728] sm:$0xff] }
 0x326   :  { %v10731_v61 = vadd.f32 %v2388_v7, %v2240_v60  ;;  %v7883_v0 = vpop.f32.mrf.mxu0  ;;  %8230 = vmatprep.mubr.msk.f32.mxu1 %vm8826_vm2, %v8825_v16  ;;  %v6684_v60 = vld [vmem:[%s12232_s2 + $0x6e8] sm:$0xff]  ;;  %v6686_v7 = vld [vmem:[%s12232_s2 + $0x6f8] sm:$0xff] }
 0x327   :  { %v7926_v1 = vpop.f32.mrf.mxu1 }
 0x328   :  { %v2181_v2 = vpop.f32.mrf.mxu0  ;;  %8188 = vmatmul.mubr.msk.f32.gmra.mxu0 %vm330_vm3, %v6679_v8 }
 0x329   :  { %v2243_v5 = vadd.f32 %v2181_v2, %v10547_v20  ;;  %v2393_v15 = vpop.f32.mrf.mxu1  ;;  %8231 = vmatmul.mubr.msk.f32.gmra.mxu1 %vm330_vm3, %v6707_v11  ;;  %8190 = vmatprep.mubr.msk.f32.mxu0 %vm8826_vm2, %v8825_v16  ;;  %v6708_v20 = vld [vmem:[%s12232_s2 + $0x730] sm:$0xff] }
 0x32a   :  { %v10746_v6 = vadd.f32 %v2393_v15, %v2241_v56  ;;  %v7886_v9 = vpop.f32.mrf.mxu0  ;;  %8233 = vmatprep.mubr.msk.f32.mxu1 %vm8826_vm2, %v8825_v16  ;;  %v6685_v56 = vld [vmem:[%s12232_s2 + $0x6f0] sm:$0xff]  ;;  %v6687_v15 = vld [vmem:[%s12232_s2 + $0x700] sm:$0xff] }
 0x32b   :  { %v7929_v18 = vpop.f32.mrf.mxu1 }
 0x32c   :  { %v2186_v17 = vpop.f32.mrf.mxu0  ;;  %8191 = vmatmul.mubr.msk.f32.gmra.mxu0 %vm330_vm3, %v6680_v31 }
 0x32d   :  { %v2244_v12 = vadd.f32 %v2186_v17, %v10562_v25  ;;  %v2398_v13 = vpop.f32.mrf.mxu1  ;;  %8234 = vmatmul.mubr.msk.f32.gmra.mxu1 %vm330_vm3, %v6708_v20  ;;  %8193 = vmatprep.mubr.msk.f32.mxu0 %vm8826_vm2, %v8825_v16  ;;  %v6709_v25 = vld [vmem:[%s12232_s2 + $0x738] sm:$0xff] }
 0x32e   :  { %v10761_v22 = vadd.f32 %v2398_v13, %v2242_v59  ;;  %v7889_v19 = vpop.f32.mrf.mxu0  ;;  %8236 = vmatprep.mubr.msk.f32.mxu1 %vm8826_vm2, %v8825_v16  ;;  %v6733_v13 = vld [vmem:[%s12232_s2 + $0x780] sm:$0xff] }
 0x32f   :  { %v7932_v26 = vpop.f32.mrf.mxu1 }
 0x330   :  { %v2191_v21 = vpop.f32.mrf.mxu0  ;;  %8194 = vmatmul.mubr.msk.f32.gmra.mxu0 %vm330_vm3, %v6681_v14  ;;  %v4272_v26 = vpop.permute.xlu0 %4271 }
 0x331   :  { %v2245_v23 = vadd.f32 %v2191_v21, %v10577_v30  ;;  %v2403_v28 = vpop.f32.mrf.mxu1  ;;  %8237 = vmatmul.mubr.msk.f32.gmra.mxu1 %vm330_vm3, %v6709_v25  ;;  %8196 = vmatprep.mubr.msk.f32.mxu0 %vm8826_vm2, %v8825_v16  ;;  %v6710_v30 = vld [vmem:[%s12232_s2 + $0x740] sm:$0xff] }
 0x332   :  { %v10776_v35 = vadd.f32 %v2403_v28, %v2243_v5  ;;  %v7892_v27 = vpop.f32.mrf.mxu0  ;;  %8239 = vmatprep.mubr.msk.f32.mxu1 %vm8826_vm2, %v8825_v16 }
 0x333   :  { %v7935_v34 = vpop.f32.mrf.mxu1  ;;  %v4270_v27 = vpop.permute.xlu1 %4269 }
 0x334   :  { %v2196_v29 = vpop.f32.mrf.mxu0  ;;  %8197 = vmatmul.mubr.msk.f32.gmra.mxu0 %vm330_vm3, %v6682_v24  ;;  %v6734_v24 = vld [vmem:[%s12232_s2 + $0x788] sm:$0xff] }
 0x335   :  { %v2246_v33 = vadd.f32 %v2196_v29, %v10592_v43  ;;  %v2408_v32 = vpop.f32.mrf.mxu1  ;;  %8240 = vmatmul.mubr.msk.f32.gmra.mxu1 %vm330_vm3, %v6710_v30  ;;  %8199 = vmatprep.mubr.msk.f32.mxu0 %vm8826_vm2, %v8825_v16  ;;  %v6711_v43 = vld [vmem:[%s12232_s2 + $0x748] sm:$0xff] }
 0x336   :  { %v10791_v37 = vadd.f32 %v2408_v32, %v2244_v12  ;;  %v7895_v40 = vpop.f32.mrf.mxu0  ;;  %8242 = vmatprep.mubr.msk.f32.mxu1 %vm8826_vm2, %v8825_v16 }
 0x337   :  { %v7938_v44 = vpop.f32.mrf.mxu1  ;;  %v6735_v40 = vld [vmem:[%s12232_s2 + $0x790] sm:$0xff] }
 0x338   :  { %v2201_v38 = vpop.f32.mrf.mxu0  ;;  %8200 = vmatmul.mubr.msk.f32.gmra.mxu0 %vm330_vm3, %v6683_v53 }
 0x339   :  { %v2247_v42 = vadd.f32 %v2201_v38, %v10607_v54  ;;  %v2413_v41 = vpop.f32.mrf.mxu1  ;;  %8243 = vmatmul.mubr.msk.f32.gmra.mxu1 %vm330_vm3, %v6711_v43  ;;  %8202 = vmatprep.mubr.msk.f32.mxu0 %vm8826_vm2, %v8825_v16  ;;  %v6712_v54 = vld [vmem:[%s12232_s2 + $0x750] sm:$0xff] }
 0x33a   :  { %v10806_v45 = vadd.f32 %v2413_v41, %v2245_v23  ;;  %v7898_v52 = vpop.f32.mrf.mxu0  ;;  %8245 = vmatprep.mubr.msk.f32.mxu1 %vm8826_vm2, %v8825_v16  ;;  %v4494_v41 = vpop.permute.xlu0 %4493 }
 0x33b   :  { %v7941_v48 = vpop.f32.mrf.mxu1 }
 0x33c   :  { %v2206_v49 = vpop.f32.mrf.mxu0  ;;  %8203 = vmatmul.mubr.msk.f32.gmra.mxu0 %vm330_vm3, %v6684_v60 }
 0x33d   :  { %v2248_v3 = vadd.f32 %v2206_v49, %v10622_v63  ;;  %v2418_v50 = vpop.f32.mrf.mxu1  ;;  %8246 = vmatmul.mubr.msk.f32.gmra.mxu1 %vm330_vm3, %v6712_v54  ;;  %8205 = vmatprep.mubr.msk.f32.mxu0 %vm8826_vm2, %v8825_v16  ;;  %v6713_v63 = vld [vmem:[%s12232_s2 + $0x758] sm:$0xff] }
 0x33e   :  { %v10821_v62 = vadd.f32 %v2418_v50, %v2246_v33  ;;  %v7901_v55 = vpop.f32.mrf.mxu0  ;;  %8248 = vmatprep.mubr.msk.f32.mxu1 %vm8826_vm2, %v8825_v16  ;;  %v6736_v54 = vld [vmem:[%s12232_s2 + $0x798] sm:$0xff] }
 0x33f   :  { %v7944_v57 = vpop.f32.mrf.mxu1 }
 0x340   :  { %v2211_v58 = vpop.f32.mrf.mxu0  ;;  %8206 = vmatmul.mubr.msk.f32.gmra.mxu0 %vm330_vm3, %v6685_v56  ;;  %v6737_v57 = vld [vmem:[%s12232_s2 + $0x7a0] sm:$0xff] }
 0x341   :  { %v2249_v10 = vadd.f32 %v2211_v58, %v10637_v4  ;;  %v2423_v59 = vpop.f32.mrf.mxu1  ;;  %8249 = vmatmul.mubr.msk.f32.gmra.mxu1 %vm330_vm3, %v6713_v63  ;;  %8208 = vmatprep.mubr.msk.f32.mxu0 %vm8826_vm2, %v8825_v16  ;;  %v6714_v4 = vld [vmem:[%s12232_s2 + $0x760] sm:$0xff] }
 0x342   :  { %v10836_v8 = vadd.f32 %v2423_v59, %v2247_v42  ;;  %v7904_v0 = vpop.f32.mrf.mxu0  ;;  %8251 = vmatprep.mubr.msk.f32.mxu1 %vm8826_vm2, %v8825_v16  ;;  %v6765_v59 = vld [vmem:[%s12232_s2 + $0x808] sm:$0xff] }
 0x343   :  { %v7947_v11 = vpop.f32.mrf.mxu1 }
 0x344   :  { %v2216_v1 = vpop.f32.mrf.mxu0  ;;  %8209 = vmatmul.mubr.msk.f32.gmra.mxu0 %vm330_vm3, %v6686_v7  ;;  %v6738_v11 = vld [vmem:[%s12232_s2 + $0x7a8] sm:$0xff] }
 0x345   :  { %v2250_v2 = vadd.f32 %v2216_v1, %v10650_v39  ;;  %v2428_v5 = vpop.f32.mrf.mxu1  ;;  %8252 = vmatmul.mubr.msk.f32.gmra.mxu1 %vm330_vm3, %v6714_v4  ;;  %8211 = vmatprep.mubr.msk.f32.mxu0 %vm8826_vm2, %v8825_v16  ;;  %v6715_v39 = vld [vmem:[%s12232_s2 + $0x768] sm:$0xff] }
 0x346   :  { %v10851_v31 = vadd.f32 %v2428_v5, %v2248_v3  ;;  %v7907_v9 = vpop.f32.mrf.mxu0  ;;  %8254 = vmatprep.mubr.msk.f32.mxu1 %vm8826_vm2, %v8825_v16  ;;  %v4492_v3 = vpop.permute.xlu1 %4491  ;;  %v6766_v5 = vld [vmem:[%s12232_s2 + $0x810] sm:$0xff] }
 0x347   :  { %v7950_v20 = vpop.f32.mrf.mxu1 }
 0x348   :  { %v2221_v18 = vpop.f32.mrf.mxu0  ;;  %8212 = vmatmul.mubr.msk.f32.gmra.mxu0 %vm330_vm3, %v6687_v15  ;;  %v6739_v20 = vld [vmem:[%s12232_s2 + $0x7b0] sm:$0xff] }
 0x349   :  { %v2251_v17 = vadd.f32 %v2221_v18, %v10669_v46  ;;  %v2433_v12 = vpop.f32.mrf.mxu1  ;;  %8255 = vmatmul.mubr.msk.f32.gmra.mxu1 %vm330_vm3, %v6715_v39  ;;  %8267 = vmatprep.mubr.msk.f32.mxu0 %vm8826_vm2, %v8825_v16  ;;  %v6716_v46 = vld [vmem:[%s12232_s2 + $0x770] sm:$0xff] }
 0x34a   :  { %v10866_v14 = vadd.f32 %v2433_v12, %v2249_v10  ;;  %v7910_v19 = vpop.f32.mrf.mxu0  ;;  %8257 = vmatprep.mubr.msk.f32.mxu1 %vm8826_vm2, %v8825_v16 }
 0x34b   :  { %v7953_v25 = vpop.f32.mrf.mxu1 }
 0x34c   :  { %v2226_v21 = vpop.f32.mrf.mxu0  ;;  %8268 = vmatmul.mubr.msk.f32.vlgmr.msra.gmra.mxu0 %vm330_vm3, %v6733_v13  ;;  %v6740_v25 = vld [vmem:[%s12232_s2 + $0x7b8] sm:$0xff] }
 0x34d   :  { %v2252_v23 = vadd.f32 %v2226_v21, %v10684_v36  ;;  %v2438_v28 = vpop.f32.mrf.mxu1  ;;  %8258 = vmatmul.mubr.msk.f32.gmra.mxu1 %vm330_vm3, %v6716_v46  ;;  %8362 = vmatpush3.msra.mxu0 %v4272_v26  ;;  %v6717_v36 = vld [vmem:[%s12232_s2 + $0x778] sm:$0xff] }
 0x34e   :  { %v10879_v30 = vadd.f32 %v2438_v28, %v2250_v2  ;;  %8363 = vmatprep.subr.mxu0 %v8825_v16  ;;  %v7913_v34 = vpop.f32.mrf.mxu0  ;;  %8260 = vmatprep.mubr.msk.f32.mxu1 %vm8826_vm2, %v8825_v16 }
 0x34f   :  { %v7956_v29 = vpop.f32.mrf.mxu1  ;;  %8364 = vmatpush3.msra.mxu0 %v4270_v27  ;;  %8270 = vmatprep.mubr.msk.f32.mxu0 %vm8826_vm2, %v8825_v16  ;;  %v6741_v34 = vld [vmem:[%s12232_s2 + $0x7c0] sm:$0xff] }
 0x350   :  { %v2231_v33 = vpop.f32.mrf.mxu0  ;;  %8271 = vmatmul.mubr.msk.f32.gmra.mxu0 %vm330_vm3, %v6734_v24  ;;  %8459 = vmatprep.subr.mxu0 %v8825_v16 }
 0x351   :  { %v2253_v32 = vadd.f32 %v2231_v33, %v10700_v47  ;;  %v2443_v53 = vpop.f32.mrf.mxu1  ;;  %8261 = vmatmul.mubr.msk.f32.gmra.mxu1 %vm330_vm3, %v6717_v36  ;;  %8273 = vmatprep.mubr.msk.f32.mxu0 %vm8826_vm2, %v8825_v16  ;;  %v6763_v47 = vld [vmem:[%s12232_s2 + $0x7f8] sm:$0xff] }
 0x352   :  { %v10898_v43 = vadd.f32 %v2443_v53, %v2251_v17  ;;  %v7916_v44 = vpop.f32.mrf.mxu0  ;;  %8316 = vmatprep.mubr.msk.f32.mxu1 %vm8826_vm2, %v8825_v16 }
 0x353   :  { %v7959_v38 = vpop.f32.mrf.mxu1  ;;  %v6742_v44 = vld [vmem:[%s12232_s2 + $0x7c8] sm:$0xff] }
 0x354   :  { %v2236_v42 = vpop.f32.mrf.mxu0  ;;  %8274 = vmatmul.mubr.msk.f32.gmra.mxu0 %vm330_vm3, %v6735_v40 }
 0x355   :  { %v2254_v60 = vadd.f32 %v2236_v42, %v10716_v51  ;;  %v2448_v52 = vpop.f32.mrf.mxu1  ;;  %8317 = vmatmul.mubr.msk.f32.vlgmr.msra.gmra.mxu1 %vm330_vm3, %v6763_v47  ;;  %8276 = vmatprep.mubr.msk.f32.mxu0 %vm8826_vm2, %v8825_v16  ;;  %v6764_v51 = vld [vmem:[%s12232_s2 + $0x800] sm:$0xff] }
 0x356   :  { %v10913_v48 = vadd.f32 %v2448_v52, %v2252_v23  ;;  %8411 = vmatpush3.msra.mxu1 %v4494_v41  ;;  %v7919_v49 = vpop.f32.mrf.mxu0  ;;  %8319 = vmatprep.mubr.msk.f32.mxu1 %vm8826_vm2, %v8825_v16 }
 0x357   :  { %8412 = vmatprep.subr.mxu1 %v8825_v16  ;;  %v7962_v50 = vpop.f32.mrf.mxu1 }
 0x358   :  { %8413 = vmatpush3.msra.mxu1 %v4492_v3  ;;  %v2610_v56 = vpop.f32.mrf.mxu0  ;;  %8277 = vmatmul.mubr.msk.f32.gmra.mxu0 %vm330_vm3, %v6736_v54  ;;  %v6743_v54 = vld [vmem:[%s12232_s2 + $0x7d0] sm:$0xff] }
 0x359   :  { %v2453_v55 = vpop.f32.mrf.mxu1  ;;  %v2684_v63 = vadd.f32 %v2610_v56, %v10731_v61  ;;  %8320 = vmatmul.mubr.msk.f32.gmra.mxu1 %vm330_vm3, %v6764_v51  ;;  %8279 = vmatprep.mubr.msk.f32.mxu0 %vm8826_vm2, %v8825_v16 }
 0x35a   :  { %v10929_v58 = vadd.f32 %v2453_v55, %v2253_v32  ;;  %v7975_v10 = vpop.f32.mrf.mxu0  ;;  %8322 = vmatprep.mubr.msk.f32.mxu1 %vm8826_vm2, %v8825_v16  ;;  %8508 = vmatprep.subr.mxu1 %v8825_v16 }
 0x35b   :  { %v7965_v61 = vpop.f32.mrf.mxu1 }
 0x35c   :  { %v2615_v7 = vpop.f32.mrf.mxu0  ;;  %8280 = vmatmul.mubr.msk.f32.gmra.mxu0 %vm330_vm3, %v6737_v57 }
 0x35d   :  { %v2458_v0 = vpop.f32.mrf.mxu1  ;;  %v2685_v4 = vadd.f32 %v2615_v7, %v10746_v6  ;;  %8323 = vmatmul.mubr.msk.f32.gmra.mxu1 %vm330_vm3, %v6765_v59  ;;  %8282 = vmatprep.mubr.msk.f32.mxu0 %vm8826_vm2, %v8825_v16 }
 0x35e   :  { %v10945_v1 = vadd.f32 %v2458_v0, %v2254_v60  ;;  %v7978_v2 = vpop.f32.mrf.mxu0  ;;  %8325 = vmatprep.mubr.msk.f32.mxu1 %vm8826_vm2, %v8825_v16 }
 0x35f   :  { %v7968_v6 = vpop.f32.mrf.mxu1 }
 0x360   :  { %v2620_v15 = vpop.f32.mrf.mxu0  ;;  %8283 = vmatmul.mubr.msk.f32.gmra.mxu0 %vm330_vm3, %v6738_v11 }
 0x361   :  { %v2686_v9 = vadd.f32 %v2620_v15, %v10761_v22  ;;  %v2832_v39 = vpop.f32.mrf.mxu1  ;;  %8326 = vmatmul.mubr.msk.f32.gmra.mxu1 %vm330_vm3, %v6766_v5  ;;  %8285 = vmatprep.mubr.msk.f32.mxu0 %vm8826_vm2, %v8825_v16  ;;  %v6767_v22 = vld [vmem:[%s12232_s2 + $0x818] sm:$0xff] }
 0x362   :  { %v10960_v18 = vadd.f32 %v2832_v39, %v2684_v63  ;;  %v7981_v17 = vpop.f32.mrf.mxu0  ;;  %8328 = vmatprep.mubr.msk.f32.mxu1 %vm8826_vm2, %v8825_v16  ;;  %v6744_v63 = vld [vmem:[%s12232_s2 + $0x7d8] sm:$0xff]  ;;  %v6746_v39 = vld [vmem:[%s12232_s2 + $0x7e8] sm:$0xff] }
 0x363   :  { %v8024_v12 = vpop.f32.mrf.mxu1 }
 0x364   :  { %v2625_v13 = vpop.f32.mrf.mxu0  ;;  %8286 = vmatmul.mubr.msk.f32.gmra.mxu0 %vm330_vm3, %v6739_v20 }
 0x365   :  { %v2687_v19 = vadd.f32 %v2625_v13, %v10776_v35  ;;  %v2837_v46 = vpop.f32.mrf.mxu1  ;;  %8329 = vmatmul.mubr.msk.f32.gmra.mxu1 %vm330_vm3, %v6767_v22  ;;  %8288 = vmatprep.mubr.msk.f32.mxu0 %vm8826_vm2, %v8825_v16  ;;  %v6768_v35 = vld [vmem:[%s12232_s2 + $0x820] sm:$0xff] }
 0x366   :  { %v10975_v26 = vadd.f32 %v2837_v46, %v2685_v4  ;;  %v7984_v21 = vpop.f32.mrf.mxu0  ;;  %8331 = vmatprep.mubr.msk.f32.mxu1 %vm8826_vm2, %v8825_v16  ;;  %v6745_v4 = vld [vmem:[%s12232_s2 + $0x7e0] sm:$0xff]  ;;  %v6747_v46 = vld [vmem:[%s12232_s2 + $0x7f0] sm:$0xff] }
 0x367   :  { %v8027_v23 = vpop.f32.mrf.mxu1 }
 0x368   :  { %v2630_v28 = vpop.f32.mrf.mxu0  ;;  %8289 = vmatmul.mubr.msk.f32.gmra.mxu0 %vm330_vm3, %v6740_v25 }
 0x369   :  { %v2688_v24 = vadd.f32 %v2630_v28, %v10791_v37  ;;  %v2842_v27 = vpop.f32.mrf.mxu1  ;;  %8332 = vmatmul.mubr.msk.f32.gmra.mxu1 %vm330_vm3, %v6768_v35  ;;  %8291 = vmatprep.mubr.msk.f32.mxu0 %vm8826_vm2, %v8825_v16  ;;  %v6769_v37 = vld [vmem:[%s12232_s2 + $0x828] sm:$0xff] }
 0x36a   :  { %v10990_v36 = vadd.f32 %v2842_v27, %v2686_v9  ;;  %v7987_v29 = vpop.f32.mrf.mxu0  ;;  %8334 = vmatprep.mubr.msk.f32.mxu1 %vm8826_vm2, %v8825_v16  ;;  %v6793_v27 = vld [vmem:[%s12232_s2 + $0x870] sm:$0xff] }
 0x36b   :  { %v8030_v33 = vpop.f32.mrf.mxu1 }
 0x36c   :  { %v2635_v32 = vpop.f32.mrf.mxu0  ;;  %8292 = vmatmul.mubr.msk.f32.gmra.mxu0 %vm330_vm3, %v6741_v34  ;;  %v4716_v33 = vpop.permute.xlu0 %4715 }
 0x36d   :  { %v2689_v53 = vadd.f32 %v2635_v32, %v10806_v45  ;;  %v2847_v40 = vpop.f32.mrf.mxu1  ;;  %8335 = vmatmul.mubr.msk.f32.gmra.mxu1 %vm330_vm3, %v6769_v37  ;;  %8294 = vmatprep.mubr.msk.f32.mxu0 %vm8826_vm2, %v8825_v16  ;;  %v6770_v45 = vld [vmem:[%s12232_s2 + $0x830] sm:$0xff] }
 0x36e   :  { %v11005_v47 = vadd.f32 %v2847_v40, %v2687_v19  ;;  %v7990_v38 = vpop.f32.mrf.mxu0  ;;  %8337 = vmatprep.mubr.msk.f32.mxu1 %vm8826_vm2, %v8825_v16 }
 0x36f   :  { %v8033_v42 = vpop.f32.mrf.mxu1  ;;  %v4714_v38 = vpop.permute.xlu1 %4713 }
 0x370   :  { %v2640_v41 = vpop.f32.mrf.mxu0  ;;  %8295 = vmatmul.mubr.msk.f32.gmra.mxu0 %vm330_vm3, %v6742_v44  ;;  %v6794_v44 = vld [vmem:[%s12232_s2 + $0x878] sm:$0xff] }
 0x371   :  { %v2690_v60 = vadd.f32 %v2640_v41, %v10821_v62  ;;  %v2852_v52 = vpop.f32.mrf.mxu1  ;;  %8338 = vmatmul.mubr.msk.f32.gmra.mxu1 %vm330_vm3, %v6770_v45  ;;  %8297 = vmatprep.mubr.msk.f32.mxu0 %vm8826_vm2, %v8825_v16  ;;  %v6771_v62 = vld [vmem:[%s12232_s2 + $0x838] sm:$0xff] }
 0x372   :  { %v11020_v49 = vadd.f32 %v2852_v52, %v2688_v24  ;;  %v7993_v51 = vpop.f32.mrf.mxu0  ;;  %8340 = vmatprep.mubr.msk.f32.mxu1 %vm8826_vm2, %v8825_v16 }
 0x373   :  { %v8036_v3 = vpop.f32.mrf.mxu1  ;;  %v6795_v51 = vld [vmem:[%s12232_s2 + $0x880] sm:$0xff] }
 0x374   :  { %v2645_v50 = vpop.f32.mrf.mxu0  ;;  %8298 = vmatmul.mubr.msk.f32.gmra.mxu0 %vm330_vm3, %v6743_v54 }
 0x375   :  { %v2691_v56 = vadd.f32 %v2645_v50, %v10836_v8  ;;  %v2857_v55 = vpop.f32.mrf.mxu1  ;;  %8341 = vmatmul.mubr.msk.f32.gmra.mxu1 %vm330_vm3, %v6771_v62  ;;  %8300 = vmatprep.mubr.msk.f32.mxu0 %vm8826_vm2, %v8825_v16  ;;  %v6772_v8 = vld [vmem:[%s12232_s2 + $0x840] sm:$0xff] }
 0x376   :  { %v11035_v57 = vadd.f32 %v2857_v55, %v2689_v53  ;;  %v7996_v10 = vpop.f32.mrf.mxu0  ;;  %8343 = vmatprep.mubr.msk.f32.mxu1 %vm8826_vm2, %v8825_v16  ;;  %v4938_v55 = vpop.permute.xlu0 %4937 }
 0x377   :  { %v8039_v59 = vpop.f32.mrf.mxu1 }
 0x378   :  { %v2650_v61 = vpop.f32.mrf.mxu0  ;;  %8301 = vmatmul.mubr.msk.f32.gmra.mxu0 %vm330_vm3, %v6744_v63 }
 0x379   :  { %v2692_v7 = vadd.f32 %v2650_v61, %v10851_v31  ;;  %v2862_v0 = vpop.f32.mrf.mxu1  ;;  %8344 = vmatmul.mubr.msk.f32.gmra.mxu1 %vm330_vm3, %v6772_v8  ;;  %8303 = vmatprep.mubr.msk.f32.mxu0 %vm8826_vm2, %v8825_v16  ;;  %v6773_v31 = vld [vmem:[%s12232_s2 + $0x848] sm:$0xff] }
 0x37a   :  { %v11050_v11 = vadd.f32 %v2862_v0, %v2690_v60  ;;  %v7999_v2 = vpop.f32.mrf.mxu0  ;;  %8346 = vmatprep.mubr.msk.f32.mxu1 %vm8826_vm2, %v8825_v16  ;;  %v6796_v8 = vld [vmem:[%s12232_s2 + $0x888] sm:$0xff] }
 0x37b   :  { %v8042_v5 = vpop.f32.mrf.mxu1 }
 0x37c   :  { %v2655_v6 = vpop.f32.mrf.mxu0  ;;  %8304 = vmatmul.mubr.msk.f32.gmra.mxu0 %vm330_vm3, %v6745_v4  ;;  %v6797_v5 = vld [vmem:[%s12232_s2 + $0x890] sm:$0xff] }
 0x37d   :  { %v2693_v15 = vadd.f32 %v2655_v6, %v10866_v14  ;;  %v2867_v9 = vpop.f32.mrf.mxu1  ;;  %8347 = vmatmul.mubr.msk.f32.gmra.mxu1 %vm330_vm3, %v6773_v31  ;;  %8306 = vmatprep.mubr.msk.f32.mxu0 %vm8826_vm2, %v8825_v16  ;;  %v6774_v14 = vld [vmem:[%s12232_s2 + $0x850] sm:$0xff] }
 0x37e   :  { %v11065_v20 = vadd.f32 %v2867_v9, %v2691_v56  ;;  %v8002_v17 = vpop.f32.mrf.mxu0  ;;  %8349 = vmatprep.mubr.msk.f32.mxu1 %vm8826_vm2, %v8825_v16  ;;  %v6825_v9 = vld [vmem:[%s12232_s2 + $0x8f8] sm:$0xff] }
 0x37f   :  { %v8045_v22 = vpop.f32.mrf.mxu1 }
 0x380   :  { %v2660_v12 = vpop.f32.mrf.mxu0  ;;  %8307 = vmatmul.mubr.msk.f32.gmra.mxu0 %vm330_vm3, %v6746_v39  ;;  %v6798_v22 = vld [vmem:[%s12232_s2 + $0x898] sm:$0xff] }
 0x381   :  { %v2694_v13 = vadd.f32 %v2660_v12, %v10879_v30  ;;  %v2872_v19 = vpop.f32.mrf.mxu1  ;;  %8350 = vmatmul.mubr.msk.f32.gmra.mxu1 %vm330_vm3, %v6774_v14  ;;  %8309 = vmatprep.mubr.msk.f32.mxu0 %vm8826_vm2, %v8825_v16  ;;  %v6775_v30 = vld [vmem:[%s12232_s2 + $0x858] sm:$0xff] }
 0x382   :  { %v11080_v25 = vadd.f32 %v2872_v19, %v2692_v7  ;;  %v8005_v21 = vpop.f32.mrf.mxu0  ;;  %8352 = vmatprep.mubr.msk.f32.mxu1 %vm8826_vm2, %v8825_v16  ;;  %v4936_v7 = vpop.permute.xlu1 %4935  ;;  %v6826_v19 = vld [vmem:[%s12232_s2 + $0x900] sm:$0xff] }
 0x383   :  { %v8048_v35 = vpop.f32.mrf.mxu1 }
 0x384   :  { %v2665_v23 = vpop.f32.mrf.mxu0  ;;  %8310 = vmatmul.mubr.msk.f32.gmra.mxu0 %vm330_vm3, %v6747_v46  ;;  %v6799_v35 = vld [vmem:[%s12232_s2 + $0x8a0] sm:$0xff] }
 0x385   :  { %v2695_v28 = vadd.f32 %v2665_v23, %v10898_v43  ;;  %v2877_v24 = vpop.f32.mrf.mxu1  ;;  %8353 = vmatmul.mubr.msk.f32.gmra.mxu1 %vm330_vm3, %v6775_v30  ;;  %8365 = vmatprep.mubr.msk.f32.mxu0 %vm8826_vm2, %v8825_v16  ;;  %v6776_v43 = vld [vmem:[%s12232_s2 + $0x860] sm:$0xff] }
 0x386   :  { %v11095_v34 = vadd.f32 %v2877_v24, %v2693_v15  ;;  %v8008_v29 = vpop.f32.mrf.mxu0  ;;  %8355 = vmatprep.mubr.msk.f32.mxu1 %vm8826_vm2, %v8825_v16 }
 0x387   :  { %v8051_v37 = vpop.f32.mrf.mxu1 }
 0x388   :  { %v2670_v32 = vpop.f32.mrf.mxu0  ;;  %8366 = vmatmul.mubr.msk.f32.vlgmr.msra.gmra.mxu0 %vm330_vm3, %v6793_v27  ;;  %v6800_v37 = vld [vmem:[%s12232_s2 + $0x8a8] sm:$0xff] }
 0x389   :  { %v2696_v53 = vadd.f32 %v2670_v32, %v10913_v48  ;;  %v2882_v40 = vpop.f32.mrf.mxu1  ;;  %8356 = vmatmul.mubr.msk.f32.gmra.mxu1 %vm330_vm3, %v6776_v43  ;;  %8460 = vmatpush3.msra.mxu0 %v4716_v33  ;;  %v6777_v48 = vld [vmem:[%s12232_s2 + $0x868] sm:$0xff] }
 0x38a   :  { %v11108_v45 = vadd.f32 %v2882_v40, %v2694_v13  ;;  %8461 = vmatprep.subr.mxu0 %v8825_v16  ;;  %v8011_v42 = vpop.f32.mrf.mxu0  ;;  %8358 = vmatprep.mubr.msk.f32.mxu1 %vm8826_vm2, %v8825_v16 }
 0x38b   :  { %v8054_v41 = vpop.f32.mrf.mxu1  ;;  %8462 = vmatpush3.msra.mxu0 %v4714_v38  ;;  %8368 = vmatprep.mubr.msk.f32.mxu0 %vm8826_vm2, %v8825_v16  ;;  %v6801_v42 = vld [vmem:[%s12232_s2 + $0x8b0] sm:$0xff] }
 0x38c   :  { %v2675_v60 = vpop.f32.mrf.mxu0  ;;  %8369 = vmatmul.mubr.msk.f32.gmra.mxu0 %vm330_vm3, %v6794_v44  ;;  %8557 = vmatprep.subr.mxu0 %v8825_v16 }
 0x38d   :  { %v2697_v52 = vadd.f32 %v2675_v60, %v10929_v58  ;;  %v2887_v54 = vpop.f32.mrf.mxu1  ;;  %8359 = vmatmul.mubr.msk.f32.gmra.mxu1 %vm330_vm3, %v6777_v48  ;;  %8371 = vmatprep.mubr.msk.f32.mxu0 %vm8826_vm2, %v8825_v16  ;;  %v6823_v58 = vld [vmem:[%s12232_s2 + $0x8e8] sm:$0xff] }
 0x38e   :  { %v11127_v62 = vadd.f32 %v2887_v54, %v2695_v28  ;;  %v8014_v3 = vpop.f32.mrf.mxu0  ;;  %8414 = vmatprep.mubr.msk.f32.mxu1 %vm8826_vm2, %v8825_v16 }
 0x38f   :  { %v8057_v50 = vpop.f32.mrf.mxu1  ;;  %v6802_v3 = vld [vmem:[%s12232_s2 + $0x8b8] sm:$0xff] }
 0x390   :  { %v2680_v56 = vpop.f32.mrf.mxu0  ;;  %8372 = vmatmul.mubr.msk.f32.gmra.mxu0 %vm330_vm3, %v6795_v51 }
 0x391   :  { %v2698_v63 = vadd.f32 %v2680_v56, %v10945_v1  ;;  %v2892_v10 = vpop.f32.mrf.mxu1  ;;  %8415 = vmatmul.mubr.msk.f32.vlgmr.msra.gmra.mxu1 %vm330_vm3, %v6823_v58  ;;  %8374 = vmatprep.mubr.msk.f32.mxu0 %vm8826_vm2, %v8825_v16  ;;  %v6824_v1 = vld [vmem:[%s12232_s2 + $0x8f0] sm:$0xff] }
 0x392   :  { %v11142_v59 = vadd.f32 %v2892_v10, %v2696_v53  ;;  %8509 = vmatpush3.msra.mxu1 %v4938_v55  ;;  %v8017_v61 = vpop.f32.mrf.mxu0  ;;  %8417 = vmatprep.mubr.msk.f32.mxu1 %vm8826_vm2, %v8825_v16 }
 0x393   :  { %8510 = vmatprep.subr.mxu1 %v8825_v16  ;;  %v8060_v0 = vpop.f32.mrf.mxu1 }
 0x394   :  { %8511 = vmatpush3.msra.mxu1 %v4936_v7  ;;  %v3054_v4 = vpop.f32.mrf.mxu0  ;;  %8375 = vmatmul.mubr.msk.f32.gmra.mxu0 %vm330_vm3, %v6796_v8  ;;  %v6803_v8 = vld [vmem:[%s12232_s2 + $0x8c0] sm:$0xff] }
 0x395   :  { %v2897_v2 = vpop.f32.mrf.mxu1  ;;  %v3128_v31 = vadd.f32 %v3054_v4, %v10960_v18  ;;  %8418 = vmatmul.mubr.msk.f32.gmra.mxu1 %vm330_vm3, %v6824_v1  ;;  %8377 = vmatprep.mubr.msk.f32.mxu0 %vm8826_vm2, %v8825_v16 }
 0x396   :  { %v11158_v6 = vadd.f32 %v2897_v2, %v2697_v52  ;;  %v8073_v15 = vpop.f32.mrf.mxu0  ;;  %8420 = vmatprep.mubr.msk.f32.mxu1 %vm8826_vm2, %v8825_v16  ;;  %8606 = vmatprep.subr.mxu1 %v8825_v16 }
 0x397   :  { %v8063_v18 = vpop.f32.mrf.mxu1 }
 0x398   :  { %v3059_v39 = vpop.f32.mrf.mxu0  ;;  %8378 = vmatmul.mubr.msk.f32.gmra.mxu0 %vm330_vm3, %v6797_v5 }
 0x399   :  { %v2902_v17 = vpop.f32.mrf.mxu1  ;;  %v3129_v14 = vadd.f32 %v3059_v39, %v10975_v26  ;;  %8421 = vmatmul.mubr.msk.f32.gmra.mxu1 %vm330_vm3, %v6825_v9  ;;  %8380 = vmatprep.mubr.msk.f32.mxu0 %vm8826_vm2, %v8825_v16 }
 0x39a   :  { %v11174_v12 = vadd.f32 %v2902_v17, %v2698_v63  ;;  %v8076_v13 = vpop.f32.mrf.mxu0  ;;  %8423 = vmatprep.mubr.msk.f32.mxu1 %vm8826_vm2, %v8825_v16 }
 0x39b   :  { %v8066_v26 = vpop.f32.mrf.mxu1 }
 0x39c   :  { %v3064_v46 = vpop.f32.mrf.mxu0  ;;  %8381 = vmatmul.mubr.msk.f32.gmra.mxu0 %vm330_vm3, %v6798_v22 }
 0x39d   :  { %v3130_v21 = vadd.f32 %v3064_v46, %v10990_v36  ;;  %v3276_v30 = vpop.f32.mrf.mxu1  ;;  %8424 = vmatmul.mubr.msk.f32.gmra.mxu1 %vm330_vm3, %v6826_v19  ;;  %8383 = vmatprep.mubr.msk.f32.mxu0 %vm8826_vm2, %v8825_v16  ;;  %v6827_v36 = vld [vmem:[%s12232_s2 + $0x908] sm:$0xff] }
 0x39e   :  { %v11189_v23 = vadd.f32 %v3276_v30, %v3128_v31  ;;  %v8079_v28 = vpop.f32.mrf.mxu0  ;;  %8426 = vmatprep.mubr.msk.f32.mxu1 %vm8826_vm2, %v8825_v16  ;;  %v6804_v31 = vld [vmem:[%s12232_s2 + $0x8c8] sm:$0xff]  ;;  %v6806_v30 = vld [vmem:[%s12232_s2 + $0x8d8] sm:$0xff] }
 0x39f   :  { %v8122_v24 = vpop.f32.mrf.mxu1 }
 0x3a0   :  { %v3069_v27 = vpop.f32.mrf.mxu0  ;;  %8384 = vmatmul.mubr.msk.f32.gmra.mxu0 %vm330_vm3, %v6799_v35 }
 0x3a1   :  { %v3131_v29 = vadd.f32 %v3069_v27, %v11005_v47  ;;  %v3281_v43 = vpop.f32.mrf.mxu1  ;;  %8427 = vmatmul.mubr.msk.f32.gmra.mxu1 %vm330_vm3, %v6827_v36  ;;  %8386 = vmatprep.mubr.msk.f32.mxu0 %vm8826_vm2, %v8825_v16  ;;  %v6828_v47 = vld [vmem:[%s12232_s2 + $0x910] sm:$0xff] }
 0x3a2   :  { %v11204_v33 = vadd.f32 %v3281_v43, %v3129_v14  ;;  %v8082_v32 = vpop.f32.mrf.mxu0  ;;  %8429 = vmatprep.mubr.msk.f32.mxu1 %vm8826_vm2, %v8825_v16  ;;  %v6805_v14 = vld [vmem:[%s12232_s2 + $0x8d0] sm:$0xff]  ;;  %v6807_v43 = vld [vmem:[%s12232_s2 + $0x8e0] sm:$0xff] }
 0x3a3   :  { %v8125_v53 = vpop.f32.mrf.mxu1 }
 0x3a4   :  { %v3074_v40 = vpop.f32.mrf.mxu0  ;;  %8387 = vmatmul.mubr.msk.f32.gmra.mxu0 %vm330_vm3, %v6800_v37 }
 0x3a5   :  { %v3132_v44 = vadd.f32 %v3074_v40, %v11020_v49  ;;  %v3286_v38 = vpop.f32.mrf.mxu1  ;;  %8430 = vmatmul.mubr.msk.f32.gmra.mxu1 %vm330_vm3, %v6828_v47  ;;  %8389 = vmatprep.mubr.msk.f32.mxu0 %vm8826_vm2, %v8825_v16  ;;  %v6829_v49 = vld [vmem:[%s12232_s2 + $0x918] sm:$0xff] }
 0x3a6   :  { %v11219_v48 = vadd.f32 %v3286_v38, %v3130_v21  ;;  %v8085_v41 = vpop.f32.mrf.mxu0  ;;  %8432 = vmatprep.mubr.msk.f32.mxu1 %vm8826_vm2, %v8825_v16  ;;  %v6853_v38 = vld [vmem:[%s12232_s2 + $0x960] sm:$0xff] }
 0x3a7   :  { %v8128_v60 = vpop.f32.mrf.mxu1 }
 0x3a8   :  { %v3079_v52 = vpop.f32.mrf.mxu0  ;;  %8390 = vmatmul.mubr.msk.f32.gmra.mxu0 %vm330_vm3, %v6801_v42  ;;  %v5160_v60 = vpop.permute.xlu0 %5159 }
 0x3a9   :  { %v3133_v54 = vadd.f32 %v3079_v52, %v11035_v57  ;;  %v3291_v51 = vpop.f32.mrf.mxu1  ;;  %8433 = vmatmul.mubr.msk.f32.gmra.mxu1 %vm330_vm3, %v6829_v49  ;;  %8392 = vmatprep.mubr.msk.f32.mxu0 %vm8826_vm2, %v8825_v16  ;;  %v6830_v57 = vld [vmem:[%s12232_s2 + $0x920] sm:$0xff] }
 0x3aa   :  { %v11234_v58 = vadd.f32 %v3291_v51, %v3131_v29  ;;  %v8088_v50 = vpop.f32.mrf.mxu0  ;;  %8435 = vmatprep.mubr.msk.f32.mxu1 %vm8826_vm2, %v8825_v16 }
 0x3ab   :  { %v8131_v56 = vpop.f32.mrf.mxu1  ;;  %v5158_v50 = vpop.permute.xlu1 %5157 }
 0x3ac   :  { %v3084_v55 = vpop.f32.mrf.mxu0  ;;  %8393 = vmatmul.mubr.msk.f32.gmra.mxu0 %vm330_vm3, %v6802_v3  ;;  %v6854_v3 = vld [vmem:[%s12232_s2 + $0x968] sm:$0xff] }
 0x3ad   :  { %v3134_v63 = vadd.f32 %v3084_v55, %v11050_v11  ;;  %v3296_v10 = vpop.f32.mrf.mxu1  ;;  %8436 = vmatmul.mubr.msk.f32.gmra.mxu1 %vm330_vm3, %v6830_v57  ;;  %8395 = vmatprep.mubr.msk.f32.mxu0 %vm8826_vm2, %v8825_v16  ;;  %v6831_v11 = vld [vmem:[%s12232_s2 + $0x928] sm:$0xff] }
 0x3ae   :  { %v11249_v61 = vadd.f32 %v3296_v10, %v3132_v44  ;;  %v8091_v1 = vpop.f32.mrf.mxu0  ;;  %8438 = vmatprep.mubr.msk.f32.mxu1 %vm8826_vm2, %v8825_v16 }
 0x3af   :  { %v8134_v7 = vpop.f32.mrf.mxu1  ;;  %v6855_v1 = vld [vmem:[%s12232_s2 + $0x970] sm:$0xff] }
 0x3b0   :  { %v3089_v0 = vpop.f32.mrf.mxu0  ;;  %8396 = vmatmul.mubr.msk.f32.gmra.mxu0 %vm330_vm3, %v6803_v8 }
 0x3b1   :  { %v3135_v4 = vadd.f32 %v3089_v0, %v11065_v20  ;;  %v3301_v2 = vpop.f32.mrf.mxu1  ;;  %8439 = vmatmul.mubr.msk.f32.gmra.mxu1 %vm330_vm3, %v6831_v11  ;;  %8398 = vmatprep.mubr.msk.f32.mxu0 %vm8826_vm2, %v8825_v16  ;;  %v6832_v20 = vld [vmem:[%s12232_s2 + $0x930] sm:$0xff] }
 0x3b2   :  { %v11264_v5 = vadd.f32 %v3301_v2, %v3133_v54  ;;  %v8094_v15 = vpop.f32.mrf.mxu0  ;;  %8441 = vmatprep.mubr.msk.f32.mxu1 %vm8826_vm2, %v8825_v16  ;;  %v5382_v2 = vpop.permute.xlu0 %5381 }
 0x3b3   :  { %v8137_v9 = vpop.f32.mrf.mxu1 }
 0x3b4   :  { %v3094_v18 = vpop.f32.mrf.mxu0  ;;  %8399 = vmatmul.mubr.msk.f32.gmra.mxu0 %vm330_vm3, %v6804_v31 }
 0x3b5   :  { %v3136_v39 = vadd.f32 %v3094_v18, %v11080_v25  ;;  %v3306_v17 = vpop.f32.mrf.mxu1  ;;  %8442 = vmatmul.mubr.msk.f32.gmra.mxu1 %vm330_vm3, %v6832_v20  ;;  %8401 = vmatprep.mubr.msk.f32.mxu0 %vm8826_vm2, %v8825_v16  ;;  %v6833_v25 = vld [vmem:[%s12232_s2 + $0x938] sm:$0xff] }
 0x3b6   :  { %v11279_v22 = vadd.f32 %v3306_v17, %v3134_v63  ;;  %v8097_v13 = vpop.f32.mrf.mxu0  ;;  %8444 = vmatprep.mubr.msk.f32.mxu1 %vm8826_vm2, %v8825_v16  ;;  %v6856_v20 = vld [vmem:[%s12232_s2 + $0x978] sm:$0xff] }
 0x3b7   :  { %v8140_v19 = vpop.f32.mrf.mxu1 }
 0x3b8   :  { %v3099_v26 = vpop.f32.mrf.mxu0  ;;  %8402 = vmatmul.mubr.msk.f32.gmra.mxu0 %vm330_vm3, %v6805_v14  ;;  %v6857_v19 = vld [vmem:[%s12232_s2 + $0x980] sm:$0xff] }
 0x3b9   :  { %v3137_v46 = vadd.f32 %v3099_v26, %v11095_v34  ;;  %v3311_v21 = vpop.f32.mrf.mxu1  ;;  %8445 = vmatmul.mubr.msk.f32.gmra.mxu1 %vm330_vm3, %v6833_v25  ;;  %8404 = vmatprep.mubr.msk.f32.mxu0 %vm8826_vm2, %v8825_v16  ;;  %v6834_v34 = vld [vmem:[%s12232_s2 + $0x940] sm:$0xff] }
 0x3ba   :  { %v11294_v35 = vadd.f32 %v3311_v21, %v3135_v4  ;;  %v8100_v28 = vpop.f32.mrf.mxu0  ;;  %8447 = vmatprep.mubr.msk.f32.mxu1 %vm8826_vm2, %v8825_v16  ;;  %v6885_v21 = vld [vmem:[%s12232_s2 + $0x9e8] sm:$0xff] }
 0x3bb   :  { %v8143_v36 = vpop.f32.mrf.mxu1 }
 0x3bc   :  { %v3104_v24 = vpop.f32.mrf.mxu0  ;;  %8405 = vmatmul.mubr.msk.f32.gmra.mxu0 %vm330_vm3, %v6806_v30  ;;  %v6858_v36 = vld [vmem:[%s12232_s2 + $0x988] sm:$0xff] }
 0x3bd   :  { %v3138_v27 = vadd.f32 %v3104_v24, %v11108_v45  ;;  %v3316_v29 = vpop.f32.mrf.mxu1  ;;  %8448 = vmatmul.mubr.msk.f32.gmra.mxu1 %vm330_vm3, %v6834_v34  ;;  %8407 = vmatprep.mubr.msk.f32.mxu0 %vm8826_vm2, %v8825_v16  ;;  %v6835_v45 = vld [vmem:[%s12232_s2 + $0x948] sm:$0xff] }
 0x3be   :  { %v11309_v37 = vadd.f32 %v3316_v29, %v3136_v39  ;;  %v8103_v32 = vpop.f32.mrf.mxu0  ;;  %8450 = vmatprep.mubr.msk.f32.mxu1 %vm8826_vm2, %v8825_v16  ;;  %v5380_v39 = vpop.permute.xlu1 %5379  ;;  %v6886_v29 = vld [vmem:[%s12232_s2 + $0x9f0] sm:$0xff] }
 0x3bf   :  { %v8146_v47 = vpop.f32.mrf.mxu1 }
 0x3c0   :  { %v3109_v53 = vpop.f32.mrf.mxu0  ;;  %8408 = vmatmul.mubr.msk.f32.gmra.mxu0 %vm330_vm3, %v6807_v43  ;;  %v6859_v47 = vld [vmem:[%s12232_s2 + $0x990] sm:$0xff] }
 0x3c1   :  { %v3139_v40 = vadd.f32 %v3109_v53, %v11127_v62  ;;  %v3321_v44 = vpop.f32.mrf.mxu1  ;;  %8451 = vmatmul.mubr.msk.f32.gmra.mxu1 %vm330_vm3, %v6835_v45  ;;  %8463 = vmatprep.mubr.msk.f32.mxu0 %vm8826_vm2, %v8825_v16  ;;  %v6836_v62 = vld [vmem:[%s12232_s2 + $0x950] sm:$0xff] }
 0x3c2   :  { %v11324_v42 = vadd.f32 %v3321_v44, %v3137_v46  ;;  %v8106_v41 = vpop.f32.mrf.mxu0  ;;  %8453 = vmatprep.mubr.msk.f32.mxu1 %vm8826_vm2, %v8825_v16 }
 0x3c3   :  { %v8149_v49 = vpop.f32.mrf.mxu1 }
 0x3c4   :  { %v3114_v52 = vpop.f32.mrf.mxu0  ;;  %8464 = vmatmul.mubr.msk.f32.vlgmr.msra.gmra.mxu0 %vm330_vm3, %v6853_v38  ;;  %v6860_v49 = vld [vmem:[%s12232_s2 + $0x998] sm:$0xff] }
 0x3c5   :  { %v3140_v54 = vadd.f32 %v3114_v52, %v11142_v59  ;;  %v3326_v51 = vpop.f32.mrf.mxu1  ;;  %8454 = vmatmul.mubr.msk.f32.gmra.mxu1 %vm330_vm3, %v6836_v62  ;;  %8558 = vmatpush3.msra.mxu0 %v5160_v60  ;;  %v6837_v59 = vld [vmem:[%s12232_s2 + $0x958] sm:$0xff] }
 0x3c6   :  { %v11337_v57 = vadd.f32 %v3326_v51, %v3138_v27  ;;  %8559 = vmatprep.subr.mxu0 %v8825_v16  ;;  %v8109_v56 = vpop.f32.mrf.mxu0  ;;  %8456 = vmatprep.mubr.msk.f32.mxu1 %vm8826_vm2, %v8825_v16 }
 0x3c7   :  { %v8152_v55 = vpop.f32.mrf.mxu1  ;;  %8560 = vmatpush3.msra.mxu0 %v5158_v50  ;;  %8466 = vmatprep.mubr.msk.f32.mxu0 %vm8826_vm2, %v8825_v16  ;;  %v6861_v56 = vld [vmem:[%s12232_s2 + $0x9a0] sm:$0xff] }
 0x3c8   :  { %v3119_v63 = vpop.f32.mrf.mxu0  ;;  %8467 = vmatmul.mubr.msk.f32.gmra.mxu0 %vm330_vm3, %v6854_v3  ;;  %8655 = vmatprep.subr.mxu0 %v8825_v16 }
 0x3c9   :  { %v3141_v10 = vadd.f32 %v3119_v63, %v11158_v6  ;;  %v3331_v8 = vpop.f32.mrf.mxu1  ;;  %8457 = vmatmul.mubr.msk.f32.gmra.mxu1 %vm330_vm3, %v6837_v59  ;;  %8469 = vmatprep.mubr.msk.f32.mxu0 %vm8826_vm2, %v8825_v16  ;;  %v6883_v6 = vld [vmem:[%s12232_s2 + $0x9d8] sm:$0xff] }
 0x3ca   :  { %v11356_v11 = vadd.f32 %v3331_v8, %v3139_v40  ;;  %v8112_v7 = vpop.f32.mrf.mxu0  ;;  %8512 = vmatprep.mubr.msk.f32.mxu1 %vm8826_vm2, %v8825_v16 }
 0x3cb   :  { %v8155_v0 = vpop.f32.mrf.mxu1  ;;  %v6862_v7 = vld [vmem:[%s12232_s2 + $0x9a8] sm:$0xff] }
 0x3cc   :  { %v3124_v4 = vpop.f32.mrf.mxu0  ;;  %8470 = vmatmul.mubr.msk.f32.gmra.mxu0 %vm330_vm3, %v6855_v1 }
 0x3cd   :  { %v3142_v31 = vadd.f32 %v3124_v4, %v11174_v12  ;;  %v3336_v15 = vpop.f32.mrf.mxu1  ;;  %8513 = vmatmul.mubr.msk.f32.vlgmr.msra.gmra.mxu1 %vm330_vm3, %v6883_v6  ;;  %8472 = vmatprep.mubr.msk.f32.mxu0 %vm8826_vm2, %v8825_v16  ;;  %v6884_v12 = vld [vmem:[%s12232_s2 + $0x9e0] sm:$0xff] }
 0x3ce   :  { %v11371_v9 = vadd.f32 %v3336_v15, %v3140_v54  ;;  %8607 = vmatpush3.msra.mxu1 %v5382_v2  ;;  %v8115_v18 = vpop.f32.mrf.mxu0  ;;  %8515 = vmatprep.mubr.msk.f32.mxu1 %vm8826_vm2, %v8825_v16  ;;  %v8851_v2 = vmov 0   ;;  %v5820_v15 = vld [vmem:[%s12233_s3 + $0x68] sm:$0xff] }
 0x3cf   :  { %8608 = vmatprep.subr.mxu1 %v8825_v16  ;;  %v8158_v17 = vpop.f32.mrf.mxu1  ;;  %8824 = vset.pattern.permute.xlu1 %v8851_v2 }
 0x3d0   :  { %8609 = vmatpush3.msra.mxu1 %v5380_v39  ;;  %v3498_v14 = vpop.f32.mrf.mxu0  ;;  %8473 = vmatmul.mubr.msk.f32.gmra.mxu0 %vm330_vm3, %v6856_v20 }
 0x3d1   :  { %v3341_v13 = vpop.f32.mrf.mxu1  ;;  %v3572_v25 = vadd.f32 %v3498_v14, %v11189_v23  ;;  %8516 = vmatmul.mubr.msk.f32.gmra.mxu1 %vm330_vm3, %v6884_v12  ;;  %8475 = vmatprep.mubr.msk.f32.mxu0 %vm8826_vm2, %v8825_v16  ;;  %v6863_v12 = vld [vmem:[%s12232_s2 + $0x9b0] sm:$0xff] }
 0x3d2   :  { %v11387_v26 = vadd.f32 %v3341_v13, %v3141_v10  ;;  %v8171_v46 = vpop.f32.mrf.mxu0  ;;  %8518 = vmatprep.mubr.msk.f32.mxu1 %vm8826_vm2, %v8825_v16  ;;  %8704 = vmatprep.subr.mxu1 %v8825_v16  ;;  %v5819_v13 = vld [vmem:[%s12233_s3 + $0x60] sm:$0xff] }
 0x3d3   :  { %v8161_v23 = vpop.f32.mrf.mxu1  ;;  %8823 = vset.pattern.permute.xlu0 %v8851_v2  ;;  %5889 = vperm.xlu1 %8824, %v5820_v15  }
 0x3d4   :  { %v3503_v30 = vpop.f32.mrf.mxu0  ;;  %8476 = vmatmul.mubr.msk.f32.gmra.mxu0 %vm330_vm3, %v6857_v19 }
 0x3d5   :  { %v3346_v28 = vpop.f32.mrf.mxu1  ;;  %v3573_v34 = vadd.f32 %v3503_v30, %v11204_v33  ;;  %8519 = vmatmul.mubr.msk.f32.gmra.mxu1 %vm330_vm3, %v6885_v21  ;;  %8478 = vmatprep.mubr.msk.f32.mxu0 %vm8826_vm2, %v8825_v16  ;;  %v6864_v21 = vld [vmem:[%s12232_s2 + $0x9b8] sm:$0xff] }
 0x3d6   :  { %v11403_v24 = vadd.f32 %v3346_v28, %v3142_v31  ;;  %v8174_v27 = vpop.f32.mrf.mxu0  ;;  %8521 = vmatprep.mubr.msk.f32.mxu1 %vm8826_vm2, %v8825_v16 }
 0x3d7   :  { %v8164_v33 = vpop.f32.mrf.mxu1  ;;  %5884 = vperm.xlu1 %8824, %v5819_v13   ;;  %v5809_v13 = vld [vmem:[%s12233_s3 + $0x10] sm:$0xff] }
 0x3d8   :  { %v3508_v43 = vpop.f32.mrf.mxu0  ;;  %8479 = vmatmul.mubr.msk.f32.gmra.mxu0 %vm330_vm3, %v6858_v36  ;;  %v5821_v36 = vld [vmem:[%s12233_s3 + $0x70] sm:$0xff] }
 0x3d9   :  { %v3574_v32 = vadd.f32 %v3508_v43, %v11219_v48  ;;  %v3720_v45 = vpop.f32.mrf.mxu1  ;;  %8522 = vmatmul.mubr.msk.f32.gmra.mxu1 %vm330_vm3, %v6886_v29  ;;  %8481 = vmatprep.mubr.msk.f32.mxu0 %vm8826_vm2, %v8825_v16  ;;  %v6887_v48 = vld [vmem:[%s12232_s2 + $0x9f8] sm:$0xff]  ;;  %v6865_v43 = vld [vmem:[%s12232_s2 + $0x9c0] sm:$0xff] }
 0x3da   :  { %v11418_v53 = vadd.f32 %v3720_v45, %v3572_v25  ;;  %v8177_v40 = vpop.f32.mrf.mxu0  ;;  %8524 = vmatprep.mubr.msk.f32.mxu1 %vm8826_vm2, %v8825_v16  ;;  %5894 = vperm.xlu0 %8823, %v5821_v36   ;;  %v6915_v36 = vld [vmem:[%s12232_s2 + $0xa60] sm:$0xff] }
 0x3db   :  { %v8220_v44 = vpop.f32.mrf.mxu1  ;;  %v5815_v40 = vld [vmem:[%s12233_s3 + $0x40] sm:$0xff] }
 0x3dc   :  { %v3513_v38 = vpop.f32.mrf.mxu0  ;;  %8482 = vmatmul.mubr.msk.f32.gmra.mxu0 %vm330_vm3, %v6859_v47 }
 0x3dd   :  { %v3575_v41 = vadd.f32 %v3513_v38, %v11234_v58  ;;  %v3725_v62 = vpop.f32.mrf.mxu1  ;;  %8525 = vmatmul.mubr.msk.f32.gmra.mxu1 %vm330_vm3, %v6887_v48  ;;  %8484 = vmatprep.mubr.msk.f32.mxu0 %vm8826_vm2, %v8825_v16  ;;  %v6888_v58 = vld [vmem:[%s12232_s2 + $0xa00] sm:$0xff]  ;;  %v5818_v48 = vld [vmem:[%s12233_s3 + $0x58] sm:$0xff] }
 0x3de   :  { %v11433_v60 = vadd.f32 %v3725_v62, %v3573_v34  ;;  %v8180_v52 = vpop.f32.mrf.mxu0  ;;  %8527 = vmatprep.mubr.msk.f32.mxu1 %vm8826_vm2, %v8825_v16  ;;  %v5817_v34 = vld [vmem:[%s12233_s3 + $0x50] sm:$0xff]  ;;  %5879 = vperm.xlu0 %8823, %v5818_v48   ;;  %v6866_v62 = vld [vmem:[%s12232_s2 + $0x9c8] sm:$0xff] }
 0x3df   :  { %v8223_v54 = vpop.f32.mrf.mxu1  ;;  %5874 = vperm.xlu1 %8824, %v5817_v34   ;;  %v6916_v48 = vld [vmem:[%s12232_s2 + $0xa68] sm:$0xff] }
 0x3e0   :  { %v3518_v51 = vpop.f32.mrf.mxu0  ;;  %8485 = vmatmul.mubr.msk.f32.gmra.mxu0 %vm330_vm3, %v6860_v49  ;;  %v5813_v54 = vld [vmem:[%s12233_s3 + $0x30] sm:$0xff] }
 0x3e1   :  { %v3576_v3 = vadd.f32 %v3518_v51, %v11249_v61  ;;  %v3730_v50 = vpop.f32.mrf.mxu1  ;;  %8528 = vmatmul.mubr.msk.f32.gmra.mxu1 %vm330_vm3, %v6888_v58  ;;  %8487 = vmatprep.mubr.msk.f32.mxu0 %vm8826_vm2, %v8825_v16  ;;  %v6889_v61 = vld [vmem:[%s12232_s2 + $0xa08] sm:$0xff] }
 0x3e2   :  { %v11448_v59 = vadd.f32 %v3730_v50, %v3574_v32  ;;  %v8183_v55 = vpop.f32.mrf.mxu0  ;;  %8530 = vmatprep.mubr.msk.f32.mxu1 %vm8826_vm2, %v8825_v16  ;;  %v5816_v51 = vld [vmem:[%s12233_s3 + $0x48] sm:$0xff] }
 0x3e3   :  { %v8226_v63 = vpop.f32.mrf.mxu1  ;;  %5864 = vperm.xlu1 %8824, %v5815_v40   ;;  %5869 = vperm.xlu0 %8823, %v5816_v51   ;;  %v6867_v55 = vld [vmem:[%s12232_s2 + $0x9d0] sm:$0xff] }
 0x3e4   :  { %v3523_v10 = vpop.f32.mrf.mxu0  ;;  %8488 = vmatmul.mubr.msk.f32.gmra.mxu0 %vm330_vm3, %v6861_v56 }
 0x3e5   :  { %v3577_v8 = vadd.f32 %v3523_v10, %v11264_v5  ;;  %v3735_v1 = vpop.f32.mrf.mxu1  ;;  %8531 = vmatmul.mubr.msk.f32.gmra.mxu1 %vm330_vm3, %v6889_v61  ;;  %8490 = vmatprep.mubr.msk.f32.mxu0 %vm8826_vm2, %v8825_v16  ;;  %v6890_v5 = vld [vmem:[%s12232_s2 + $0xa10] sm:$0xff] }
 0x3e6   :  { %v11463_v6 = vadd.f32 %v3735_v1, %v3575_v41  ;;  %v8186_v0 = vpop.f32.mrf.mxu0  ;;  %8533 = vmatprep.mubr.msk.f32.mxu1 %vm8826_vm2, %v8825_v16  ;;  %v5814_v1 = vld [vmem:[%s12233_s3 + $0x38] sm:$0xff] }
 0x3e7   :  { %v8229_v4 = vpop.f32.mrf.mxu1  ;;  %5854 = vperm.xlu1 %8824, %v5813_v54   ;;  %5859 = vperm.xlu0 %8823, %v5814_v1  }
 0x3e8   :  { %v3528_v31 = vpop.f32.mrf.mxu0  ;;  %8491 = vmatmul.mubr.msk.f32.gmra.mxu0 %vm330_vm3, %v6862_v7  ;;  %v6913_v4 = vld [vmem:[%s12232_s2 + $0xa50] sm:$0xff] }
 0x3e9   :  { %v3578_v20 = vadd.f32 %v3528_v31, %v11279_v22  ;;  %v3740_v18 = vpop.f32.mrf.mxu1  ;;  %8534 = vmatmul.mubr.msk.f32.gmra.mxu1 %vm330_vm3, %v6890_v5  ;;  %8493 = vmatprep.mubr.msk.f32.mxu0 %vm8826_vm2, %v8825_v16  ;;  %v6891_v22 = vld [vmem:[%s12232_s2 + $0xa18] sm:$0xff] }
 0x3ea   :  { %v11481_v39 = vadd.f32 %v3740_v18, %v3576_v3  ;;  %v8189_v17 = vpop.f32.mrf.mxu0  ;;  %8536 = vmatprep.mubr.msk.f32.mxu1 %vm8826_vm2, %v8825_v16  ;;  %v5604_v18 = vpop.permute.xlu0 %5603 }
 0x3eb   :  { %v8232_v14 = vpop.f32.mrf.mxu1 }
 0x3ec   :  { %v3533_v25 = vpop.f32.mrf.mxu0  ;;  %8494 = vmatmul.mubr.msk.f32.gmra.mxu0 %vm330_vm3, %v6863_v12  ;;  %v6914_v14 = vld [vmem:[%s12232_s2 + $0xa58] sm:$0xff] }
 0x3ed   :  { %v3579_v19 = vadd.f32 %v3533_v25, %v11294_v35  ;;  %v3745_v46 = vpop.f32.mrf.mxu1  ;;  %8537 = vmatmul.mubr.msk.f32.gmra.mxu1 %vm330_vm3, %v6891_v22  ;;  %8496 = vmatprep.mubr.msk.f32.mxu0 %vm8826_vm2, %v8825_v16  ;;  %v6892_v35 = vld [vmem:[%s12232_s2 + $0xa20] sm:$0xff]  ;;  %v5602_v25 = vpop.permute.xlu1 %5601 }
 0x3ee   :  { %v11499_v23 = vadd.f32 %v3745_v46, %v3577_v8  ;;  %v8192_v30 = vpop.f32.mrf.mxu0  ;;  %8539 = vmatprep.mubr.msk.f32.mxu1 %vm8826_vm2, %v8825_v16  ;;  %v5811_v8 = vld [vmem:[%s12233_s3 + $0x20] sm:$0xff] }
 0x3ef   :  { %v8235_v28 = vpop.f32.mrf.mxu1  ;;  %5844 = vperm.xlu1 %8824, %v5811_v8   ;;  %v5810_v30 = vld [vmem:[%s12233_s3 + $0x18] sm:$0xff]  ;;  %v6946_v8 = vld [vmem:[%s12232_s2 + $0xae0] sm:$0xff] }
 0x3f0   :  { %v3538_v27 = vpop.f32.mrf.mxu0  ;;  %8497 = vmatmul.mubr.msk.f32.gmra.mxu0 %vm330_vm3, %v6864_v21 }
 0x3f1   :  { %v3580_v29 = vadd.f32 %v3538_v27, %v11309_v37  ;;  %v3750_v33 = vpop.f32.mrf.mxu1  ;;  %8540 = vmatmul.mubr.msk.f32.gmra.mxu1 %vm330_vm3, %v6892_v35  ;;  %8499 = vmatprep.mubr.msk.f32.mxu0 %vm8826_vm2, %v8825_v16  ;;  %v6893_v37 = vld [vmem:[%s12232_s2 + $0xa28] sm:$0xff]  ;;  %v5807_v27 = vld [vmem:[%s12233_s3] sm:$0xff] }
 0x3f2   :  { %v11520_v32 = vadd.f32 %v3750_v33, %v3578_v20  ;;  %v8195_v45 = vpop.f32.mrf.mxu0  ;;  %8542 = vmatprep.mubr.msk.f32.mxu1 %vm8826_vm2, %v8825_v16  ;;  %v5812_v20 = vld [vmem:[%s12233_s3 + $0x28] sm:$0xff] }
 0x3f3   :  { %v8238_v47 = vpop.f32.mrf.mxu1  ;;  %5849 = vperm.xlu0 %8823, %v5812_v20   ;;  %5834 = vperm.xlu1 %8824, %v5809_v13   ;;  %v5808_v45 = vld [vmem:[%s12233_s3 + $0x8] sm:$0xff] }
 0x3f4   :  { %v3543_v44 = vpop.f32.mrf.mxu0  ;;  %8500 = vmatmul.mubr.msk.f32.gmra.mxu0 %vm330_vm3, %v6865_v43 }
 0x3f5   :  { %v3581_v38 = vadd.f32 %v3543_v44, %v11324_v42  ;;  %v3755_v41 = vpop.f32.mrf.mxu1  ;;  %8543 = vmatmul.mubr.msk.f32.gmra.mxu1 %vm330_vm3, %v6893_v37  ;;  %8502 = vmatprep.mubr.msk.f32.mxu0 %vm8826_vm2, %v8825_v16  ;;  %v6894_v42 = vld [vmem:[%s12232_s2 + $0xa30] sm:$0xff] }
 0x3f6   :  { %v11541_v49 = vadd.f32 %v3755_v41, %v3579_v19  ;;  %v8198_v52 = vpop.f32.mrf.mxu0  ;;  %8545 = vmatprep.mubr.msk.f32.mxu1 %vm8826_vm2, %v8825_v16 }
 0x3f7   :  { %v8241_v58 = vpop.f32.mrf.mxu1  ;;  %5839 = vperm.xlu0 %8823, %v5810_v30   ;;  %5824 = vperm.xlu1 %8824, %v5807_v27   ;;  %v6922_v27 = vld [vmem:[%s12232_s2 + $0xa98] sm:$0xff] }
 0x3f8   :  { %v3548_v3 = vpop.f32.mrf.mxu0  ;;  %8503 = vmatmul.mubr.msk.f32.gmra.mxu0 %vm330_vm3, %v6866_v62  ;;  %v6917_v58 = vld [vmem:[%s12232_s2 + $0xa70] sm:$0xff] }
 0x3f9   :  { %v3582_v50 = vadd.f32 %v3548_v3, %v11337_v57  ;;  %v3760_v56 = vpop.f32.mrf.mxu1  ;;  %8546 = vmatmul.mubr.msk.f32.gmra.mxu1 %vm330_vm3, %v6894_v42  ;;  %8505 = vmatprep.mubr.msk.f32.mxu0 %vm8826_vm2, %v8825_v16  ;;  %v6895_v57 = vld [vmem:[%s12232_s2 + $0xa38] sm:$0xff] }
 0x3fa   :  { %v11562_v61 = vadd.f32 %v3760_v56, %v3580_v29  ;;  %v8201_v63 = vpop.f32.mrf.mxu0  ;;  %8548 = vmatprep.mubr.msk.f32.mxu1 %vm8826_vm2, %v8825_v16  ;;  %v6945_v3 = vld [vmem:[%s12232_s2 + $0xad8] sm:$0xff] }
 0x3fb   :  { %v8244_v10 = vpop.f32.mrf.mxu1  ;;  %5829 = vperm.xlu0 %8823, %v5808_v45   ;;  %v6918_v63 = vld [vmem:[%s12232_s2 + $0xa78] sm:$0xff] }
 0x3fc   :  { %v3553_v7 = vpop.f32.mrf.mxu0  ;;  %8506 = vmatmul.mubr.msk.f32.gmra.mxu0 %vm330_vm3, %v6867_v55 }
 0x3fd   :  { %v3583_v0 = vadd.f32 %v3553_v7, %v11356_v11  ;;  %v3765_v5 = vpop.f32.mrf.mxu1  ;;  %8549 = vmatmul.mubr.msk.f32.gmra.mxu1 %vm330_vm3, %v6895_v57  ;;  %8561 = vmatprep.mubr.msk.f32.mxu0 %vm8826_vm2, %v8825_v16  ;;  %v6896_v11 = vld [vmem:[%s12232_s2 + $0xa40] sm:$0xff] }
 0x3fe   :  { %v11583_v2 = vadd.f32 %v3765_v5, %v3581_v38  ;;  %v8204_v31 = vpop.f32.mrf.mxu0  ;;  %8551 = vmatprep.mubr.msk.f32.mxu1 %vm8826_vm2, %v8825_v16  ;;  %v6919_v5 = vld [vmem:[%s12232_s2 + $0xa80] sm:$0xff] }
 0x3ff   :  { %v8247_v15 = vpop.f32.mrf.mxu1 }
 0x400   :  { %v3558_v12 = vpop.f32.mrf.mxu0  ;;  %8562 = vmatmul.mubr.msk.f32.vlgmr.msra.gmra.mxu0 %vm330_vm3, %v6913_v4 }
 0x401   :  { %v3584_v17 = vadd.f32 %v3558_v12, %v11371_v9  ;;  %v3770_v22 = vpop.f32.mrf.mxu1  ;;  %8552 = vmatmul.mubr.msk.f32.gmra.mxu1 %vm330_vm3, %v6896_v11  ;;  %8656 = vmatpush3.msra.mxu0 %v5604_v18  ;;  %v6897_v9 = vld [vmem:[%s12232_s2 + $0xa48] sm:$0xff] }
 0x402   :  { %v11602_v19 = vadd.f32 %v3770_v22, %v3582_v50  ;;  %8657 = vmatprep.subr.mxu0 %v8825_v16  ;;  %v8207_v46 = vpop.f32.mrf.mxu0  ;;  %8554 = vmatprep.mubr.msk.f32.mxu1 %vm8826_vm2, %v8825_v16  ;;  %v6920_v12 = vld [vmem:[%s12232_s2 + $0xa88] sm:$0xff] }
 0x403   :  { %v8250_v21 = vpop.f32.mrf.mxu1  ;;  %8658 = vmatpush3.msra.mxu0 %v5602_v25  ;;  %8564 = vmatprep.mubr.msk.f32.mxu0 %vm8826_vm2, %v8825_v16 }
 0x404   :  { %v3563_v35 = vpop.f32.mrf.mxu0  ;;  %8565 = vmatmul.mubr.msk.f32.gmra.mxu0 %vm330_vm3, %v6914_v14 }
 0x405   :  { %v3585_v28 = vadd.f32 %v3563_v35, %v11387_v26  ;;  %v3775_v34 = vpop.f32.mrf.mxu1  ;;  %8555 = vmatmul.mubr.msk.f32.gmra.mxu1 %vm330_vm3, %v6897_v9  ;;  %8567 = vmatprep.mubr.msk.f32.mxu0 %vm8826_vm2, %v8825_v16  ;;  %v6943_v26 = vld [vmem:[%s12232_s2 + $0xac8] sm:$0xff]  ;;  %v6921_v9 = vld [vmem:[%s12232_s2 + $0xa90] sm:$0xff] }
 0x406   :  { %v11626_v29 = vadd.f32 %v3775_v34, %v3583_v0  ;;  %v8210_v33 = vpop.f32.mrf.mxu0  ;;  %8610 = vmatprep.mubr.msk.f32.mxu1 %vm8826_vm2, %v8825_v16 }
 0x407   :  { %v8253_v43 = vpop.f32.mrf.mxu1 }
 0x408   :  { %v3568_v37 = vpop.f32.mrf.mxu0  ;;  %8568 = vmatmul.mubr.msk.f32.gmra.mxu0 %vm330_vm3, %v6915_v36 }
 0x409   :  { %v3586_v47 = vadd.f32 %v3568_v37, %v11403_v24  ;;  %v3780_v40 = vpop.f32.mrf.mxu1  ;;  %8611 = vmatmul.mubr.msk.f32.vlgmr.msra.gmra.mxu1 %vm330_vm3, %v6943_v26  ;;  %8570 = vmatprep.mubr.msk.f32.mxu0 %vm8826_vm2, %v8825_v16  ;;  %v6944_v24 = vld [vmem:[%s12232_s2 + $0xad0] sm:$0xff] }
 0x40a   :  { %v11644_v44 = vadd.f32 %v3780_v40, %v3584_v17  ;;  %v8213_v38 = vpop.f32.mrf.mxu0  ;;  %8613 = vmatprep.mubr.msk.f32.mxu1 %vm8826_vm2, %v8825_v16  ;;  %v6923_v40 = vld [vmem:[%s12232_s2 + $0xaa0] sm:$0xff] }
 0x40b   :  { %v8256_v41 = vpop.f32.mrf.mxu1 }
 0x40c   :  { %v3942_v62 = vpop.f32.mrf.mxu0  ;;  %8571 = vmatmul.mubr.msk.f32.gmra.mxu0 %vm330_vm3, %v6916_v48 }
 0x40d   :  { %v3785_v52 = vpop.f32.mrf.mxu1  ;;  %v4016_v42 = vadd.f32 %v3942_v62, %v11418_v53  ;;  %8614 = vmatmul.mubr.msk.f32.gmra.mxu1 %vm330_vm3, %v6944_v24  ;;  %8573 = vmatprep.mubr.msk.f32.mxu0 %vm8826_vm2, %v8825_v16  ;;  %v5948_v62 = vld [vmem:[%s12234_s5 + $0x50] sm:$0xf] }
 0x40e   :  { %v11659_v54 = vadd.f32 %v3785_v52, %v3585_v28  ;;  %v8269_v51 = vpop.f32.mrf.mxu0  ;;  %8616 = vmatprep.mubr.msk.f32.mxu1 %vm8826_vm2, %v8825_v16  ;;  %v5947_v52 = vld [vmem:[%s12234_s5 + $0x48] sm:$0xff]  ;;  %6001 = vperm.xlu0 %8823, %v5948_v62  }
 0x40f   :  { %v8259_v53 = vpop.f32.mrf.mxu1  ;;  %v6924_v51 = vld [vmem:[%s12232_s2 + $0xaa8] sm:$0xff]  ;;  %5996 = vperm.xlu1 %8824, %v5947_v52  }
 0x410   :  { %v3947_v50 = vpop.f32.mrf.mxu0  ;;  %8574 = vmatmul.mubr.msk.f32.gmra.mxu0 %vm330_vm3, %v6917_v58 }
 0x411   :  { %v3790_v56 = vpop.f32.mrf.mxu1  ;;  %v4017_v55 = vadd.f32 %v3947_v50, %v11433_v60  ;;  %8617 = vmatmul.mubr.msk.f32.gmra.mxu1 %vm330_vm3, %v6945_v3  ;;  %8576 = vmatprep.mubr.msk.f32.mxu0 %vm8826_vm2, %v8825_v16 }
 0x412   :  { %v11674_v57 = vadd.f32 %v3790_v56, %v3586_v47  ;;  %v8272_v10 = vpop.f32.mrf.mxu0  ;;  %8619 = vmatprep.mubr.msk.f32.mxu1 %vm8826_vm2, %v8825_v16  ;;  %v5946_v56 = vld [vmem:[%s12234_s5 + $0x40] sm:$0xff] }
 0x413   :  { %v8262_v60 = vpop.f32.mrf.mxu1  ;;  %5991 = vperm.xlu0 %8823, %v5946_v56  }
 0x414   :  { %v3952_v1 = vpop.f32.mrf.mxu0  ;;  %8577 = vmatmul.mubr.msk.f32.gmra.mxu0 %vm330_vm3, %v6918_v63  ;;  %v5945_v63 = vld [vmem:[%s12234_s5 + $0x38] sm:$0xff]  ;;  %v6925_v60 = vld [vmem:[%s12232_s2 + $0xab0] sm:$0xff] }
 0x415   :  { %v4018_v7 = vadd.f32 %v3952_v1, %v11448_v59  ;;  %v4164_v0 = vpop.f32.mrf.mxu1  ;;  %8620 = vmatmul.mubr.msk.f32.gmra.mxu1 %vm330_vm3, %v6946_v8  ;;  %8579 = vmatprep.mubr.msk.f32.mxu0 %vm8826_vm2, %v8825_v16  ;;  %v6947_v59 = vld [vmem:[%s12232_s2 + $0xae8] sm:$0xff] }
 0x416   :  { %v11689_v4 = vadd.f32 %v4164_v0, %v4016_v42  ;;  %v8275_v31 = vpop.f32.mrf.mxu0  ;;  %8622 = vmatprep.mubr.msk.f32.mxu1 %vm8826_vm2, %v8825_v16  ;;  %5986 = vperm.xlu1 %8824, %v5945_v63  }
 0x417   :  { %v8318_v11 = vpop.f32.mrf.mxu1 }
 0x418   :  { %v3957_v15 = vpop.f32.mrf.mxu0  ;;  %8580 = vmatmul.mubr.msk.f32.gmra.mxu0 %vm330_vm3, %v6919_v5  ;;  %v5944_v5 = vld [vmem:[%s12234_s5 + $0x30] sm:$0xff] }
 0x419   :  { %v4019_v20 = vadd.f32 %v3957_v15, %v11463_v6  ;;  %v4169_v18 = vpop.f32.mrf.mxu1  ;;  %8623 = vmatmul.mubr.msk.f32.gmra.mxu1 %vm330_vm3, %v6947_v59  ;;  %8582 = vmatprep.mubr.msk.f32.mxu0 %vm8826_vm2, %v8825_v16  ;;  %v6948_v6 = vld [vmem:[%s12232_s2 + $0xaf0] sm:$0xff]  ;;  %v5943_v59 = vld [vmem:[%s12234_s5 + $0x28] sm:$0xff] }
 0x41a   :  { %v11704_v17 = vadd.f32 %v4169_v18, %v4017_v55  ;;  %v8278_v22 = vpop.f32.mrf.mxu0  ;;  %8625 = vmatprep.mubr.msk.f32.mxu1 %vm8826_vm2, %v8825_v16  ;;  %5981 = vperm.xlu0 %8823, %v5944_v5  }
 0x41b   :  { %v8321_v14 = vpop.f32.mrf.mxu1  ;;  %5976 = vperm.xlu1 %8824, %v5943_v59  }
 0x41c   :  { %v3962_v13 = vpop.f32.mrf.mxu0  ;;  %8583 = vmatmul.mubr.msk.f32.gmra.mxu0 %vm330_vm3, %v6920_v12 }
 0x41d   :  { %v4020_v25 = vadd.f32 %v3962_v13, %v11481_v39  ;;  %v4174_v46 = vpop.f32.mrf.mxu1  ;;  %8626 = vmatmul.mubr.msk.f32.gmra.mxu1 %vm330_vm3, %v6948_v6  ;;  %8585 = vmatprep.mubr.msk.f32.mxu0 %vm8826_vm2, %v8825_v16  ;;  %v6949_v39 = vld [vmem:[%s12232_s2 + $0xaf8] sm:$0xff]  ;;  %v5942_v6 = vld [vmem:[%s12234_s5 + $0x20] sm:$0xff] }
 0x41e   :  { %v11719_v21 = vadd.f32 %v4174_v46, %v4018_v7  ;;  %v8281_v30 = vpop.f32.mrf.mxu0  ;;  %8628 = vmatprep.mubr.msk.f32.mxu1 %vm8826_vm2, %v8825_v16  ;;  %v5941_v13 = vld [vmem:[%s12234_s5 + $0x18] sm:$0xff]  ;;  %5971 = vperm.xlu0 %8823, %v5942_v6  }
 0x41f   :  { %v8324_v35 = vpop.f32.mrf.mxu1  ;;  %5966 = vperm.xlu1 %8824, %v5941_v13  }
 0x420   :  { %v3967_v28 = vpop.f32.mrf.mxu0  ;;  %8586 = vmatmul.mubr.msk.f32.gmra.mxu0 %vm330_vm3, %v6921_v9  ;;  %v6927_v9 = vld [vmem:[%s12232_s2 + $0xac0] sm:$0xff] }
 0x421   :  { %v4021_v34 = vadd.f32 %v3967_v28, %v11499_v23  ;;  %v4179_v36 = vpop.f32.mrf.mxu1  ;;  %8629 = vmatmul.mubr.msk.f32.gmra.mxu1 %vm330_vm3, %v6949_v39  ;;  %8588 = vmatprep.mubr.msk.f32.mxu0 %vm8826_vm2, %v8825_v16  ;;  %v6950_v23 = vld [vmem:[%s12232_s2 + $0xb00] sm:$0xff]  ;;  %v5940_v28 = vld [vmem:[%s12234_s5 + $0x10] sm:$0xff] }
 0x422   :  { %v11734_v33 = vadd.f32 %v4179_v36, %v4019_v20  ;;  %v8284_v26 = vpop.f32.mrf.mxu0  ;;  %8631 = vmatprep.mubr.msk.f32.mxu1 %vm8826_vm2, %v8825_v16  ;;  %v6926_v20 = vld [vmem:[%s12232_s2 + $0xab8] sm:$0xff]  ;;  %v5939_v36 = vld [vmem:[%s12234_s5 + $0x8] sm:$0xff]  ;;  %5961 = vperm.xlu0 %8823, %v5940_v28  }
 0x423   :  { %v8327_v43 = vpop.f32.mrf.mxu1  ;;  %5956 = vperm.xlu1 %8824, %v5939_v36  }
 0x424   :  { %v3972_v45 = vpop.f32.mrf.mxu0  ;;  %8589 = vmatmul.mubr.msk.f32.gmra.mxu0 %vm330_vm3, %v6922_v27 }
 0x425   :  { %v4022_v37 = vadd.f32 %v3972_v45, %v11520_v32  ;;  %v4184_v47 = vpop.f32.mrf.mxu1  ;;  %8632 = vmatmul.mubr.msk.f32.gmra.mxu1 %vm330_vm3, %v6950_v23  ;;  %8591 = vmatprep.mubr.msk.f32.mxu0 %vm8826_vm2, %v8825_v16  ;;  %v6951_v32 = vld [vmem:[%s12232_s2 + $0xb08] sm:$0xff]  ;;  %v6973_v23 = vld [vmem:[%s12232_s2 + $0xb40] sm:$0xff] }
 0x426   :  { %v11749_v48 = vadd.f32 %v4184_v47, %v4020_v25  ;;  %v8287_v38 = vpop.f32.mrf.mxu0  ;;  %8634 = vmatprep.mubr.msk.f32.mxu1 %vm8826_vm2, %v8825_v16  ;;  %v5938_v47 = vld [vmem:[%s12234_s5] sm:$0xff] }
 0x427   :  { %v8330_v24 = vpop.f32.mrf.mxu1  ;;  %v6170_v38 = vld [vmem:[%s12235_s7] sm:$0x3]  ;;  %5951 = vperm.xlu0 %8823, %v5938_v47  }
 0x428   :  { %v3977_v41 = vpop.f32.mrf.mxu0  ;;  %8592 = vmatmul.mubr.msk.f32.gmra.mxu0 %vm330_vm3, %v6923_v40  ;;  %6173 = vperm.xlu1 %8824, %v6170_v38  }
 0x429   :  { %v4023_v42 = vadd.f32 %v3977_v41, %v11541_v49  ;;  %v4189_v58 = vpop.f32.mrf.mxu1  ;;  %8635 = vmatmul.mubr.msk.f32.gmra.mxu1 %vm330_vm3, %v6951_v32  ;;  %8594 = vmatprep.mubr.msk.f32.mxu0 %vm8826_vm2, %v8825_v16  ;;  %v6952_v49 = vld [vmem:[%s12232_s2 + $0xb10] sm:$0xff]  ;;  %v6974_v41 = vld [vmem:[%s12232_s2 + $0xb48] sm:$0xff] }
 0x42a   :  { %v11770_v3 = vadd.f32 %v4189_v58, %v4021_v34  ;;  %v8290_v53 = vpop.f32.mrf.mxu0  ;;  %8637 = vmatprep.mubr.msk.f32.mxu1 %vm8826_vm2, %v8825_v16 }
 0x42b   :  { %v8333_v50 = vpop.f32.mrf.mxu1 }
 0x42c   :  { %v3982_v55 = vpop.f32.mrf.mxu0  ;;  %8595 = vmatmul.mubr.msk.f32.gmra.mxu0 %vm330_vm3, %v6924_v51 }
 0x42d   :  { %v4024_v10 = vadd.f32 %v3982_v55, %v11562_v61  ;;  %v4194_v8 = vpop.f32.mrf.mxu1  ;;  %8638 = vmatmul.mubr.msk.f32.gmra.mxu1 %vm330_vm3, %v6952_v49  ;;  %8597 = vmatprep.mubr.msk.f32.mxu0 %vm8826_vm2, %v8825_v16  ;;  %v6953_v61 = vld [vmem:[%s12232_s2 + $0xb18] sm:$0xff]  ;;  %v6975_v49 = vld [vmem:[%s12232_s2 + $0xb50] sm:$0xff] }
 0x42e   :  { %v11791_v1 = vadd.f32 %v4194_v8, %v4022_v37  ;;  %v8293_v7 = vpop.f32.mrf.mxu0  ;;  %8640 = vmatprep.mubr.msk.f32.mxu1 %vm8826_vm2, %v8825_v16  ;;  %v6976_v8 = vld [vmem:[%s12232_s2 + $0xb58] sm:$0xff] }
 0x42f   :  { %v8336_v0 = vpop.f32.mrf.mxu1 }
 0x430   :  { %v3987_v31 = vpop.f32.mrf.mxu0  ;;  %8598 = vmatmul.mubr.msk.f32.gmra.mxu0 %vm330_vm3, %v6925_v60 }
 0x431   :  { %v4025_v11 = vadd.f32 %v3987_v31, %v11583_v2  ;;  %v4199_v15 = vpop.f32.mrf.mxu1  ;;  %8641 = vmatmul.mubr.msk.f32.gmra.mxu1 %vm330_vm3, %v6953_v61  ;;  %8600 = vmatprep.mubr.msk.f32.mxu0 %vm8826_vm2, %v8825_v16  ;;  %v6954_v2 = vld [vmem:[%s12232_s2 + $0xb20] sm:$0xff] }
 0x432   :  { %v11812_v18 = vadd.f32 %v4199_v15, %v4023_v42  ;;  %v8296_v12 = vpop.f32.mrf.mxu0  ;;  %8643 = vmatprep.mubr.msk.f32.mxu1 %vm8826_vm2, %v8825_v16 }
 0x433   :  { %v8339_v22 = vpop.f32.mrf.mxu1 }
 0x434   :  { %v3992_v14 = vpop.f32.mrf.mxu0  ;;  %8601 = vmatmul.mubr.msk.f32.gmra.mxu0 %vm330_vm3, %v6926_v20 }
 0x435   :  { %v4026_v25 = vadd.f32 %v3992_v14, %v11602_v19  ;;  %v4204_v46 = vpop.f32.mrf.mxu1  ;;  %8644 = vmatmul.mubr.msk.f32.gmra.mxu1 %vm330_vm3, %v6954_v2  ;;  %8603 = vmatprep.mubr.msk.f32.mxu0 %vm8826_vm2, %v8825_v16  ;;  %v6955_v19 = vld [vmem:[%s12232_s2 + $0xb28] sm:$0xff] }
 0x436   :  { %v11833_v30 = vadd.f32 %v4204_v46, %v4024_v10  ;;  %v8299_v39 = vpop.f32.mrf.mxu0  ;;  %8646 = vmatprep.mubr.msk.f32.mxu1 %vm8826_vm2, %v8825_v16 }
 0x437   :  { %v8342_v35 = vpop.f32.mrf.mxu1 }
 0x438   :  { %v3997_v34 = vpop.f32.mrf.mxu0  ;;  %8604 = vmatmul.mubr.msk.f32.gmra.mxu0 %vm330_vm3, %v6927_v9 }
 0x439   :  { %v4027_v27 = vadd.f32 %v3997_v34, %v11626_v29  ;;  %v4209_v26 = vpop.f32.mrf.mxu1  ;;  %8647 = vmatmul.mubr.msk.f32.gmra.mxu1 %vm330_vm3, %v6955_v19  ;;  %8659 = vmatprep.mubr.msk.f32.mxu0 %vm8826_vm2, %v8825_v16  ;;  %v6956_v29 = vld [vmem:[%s12232_s2 + $0xb30] sm:$0xff] }
 0x43a   :  { %v11854_v43 = vadd.f32 %v4209_v26, %v4025_v11  ;;  %v8302_v45 = vpop.f32.mrf.mxu0  ;;  %8649 = vmatprep.mubr.msk.f32.mxu1 %vm8826_vm2, %v8825_v16 }
 0x43b   :  { %v8345_v37 = vpop.f32.mrf.mxu1 }
 0x43c   :  { %v4002_v40 = vpop.f32.mrf.mxu0  ;;  %8660 = vmatmul.mubr.msk.f32.vlgmr.msra.gmra.mxu0 %vm330_vm3, %v6973_v23 }
 0x43d   :  { %v4028_v32 = vadd.f32 %v4002_v40, %v11644_v44  ;;  %v4214_v24 = vpop.f32.mrf.mxu1  ;;  %8650 = vmatmul.mubr.msk.f32.gmra.mxu1 %vm330_vm3, %v6956_v29  ;;  %8662 = vmatprep.mubr.msk.f32.mxu0 %vm8826_vm2, %v8825_v16  ;;  %v6957_v44 = vld [vmem:[%s12232_s2 + $0xb38] sm:$0xff] }
 0x43e   :  { %v11875_v62 = vadd.f32 %v4214_v24, %v4026_v25  ;;  %v8305_v52 = vpop.f32.mrf.mxu0  ;;  %8652 = vmatprep.mubr.msk.f32.mxu1 %vm8826_vm2, %v8825_v16 }
 0x43f   :  { %v8348_v42 = vpop.f32.mrf.mxu1 }
 0x440   :  { %v4007_v58 = vpop.f32.mrf.mxu0  ;;  %8663 = vmatmul.mubr.msk.f32.gmra.mxu0 %vm330_vm3, %v6974_v41 }
 0x441   :  { %v4029_v51 = vadd.f32 %v4007_v58, %v11659_v54  ;;  %v4219_v53 = vpop.f32.mrf.mxu1  ;;  %8653 = vmatmul.mubr.msk.f32.gmra.mxu1 %vm330_vm3, %v6957_v44  ;;  %8665 = vmatprep.mubr.msk.f32.mxu0 %vm8826_vm2, %v8825_v16 }
 0x442   :  { %v11890_v50 = vadd.f32 %v4219_v53, %v4027_v27  ;;  %v8308_v56 = vpop.f32.mrf.mxu0  ;;  %8734 = vmatprep.mubr.msk.f32.mxu1 %vm8826_vm2, %v8825_v16 }
 0x443   :  { %v8351_v55 = vpop.f32.mrf.mxu1 }
 0x444   :  { %v4012_v63 = vpop.f32.mrf.mxu0  ;;  %8666 = vmatmul.mubr.msk.f32.gmra.mxu0 %vm330_vm3, %v6975_v49 }
 0x445   :  { %v4030_v54 = vadd.f32 %v4012_v63, %v11674_v57  ;;  %v4224_v10 = vpop.f32.mrf.mxu1  ;;  %8668 = vmatprep.mubr.msk.f32.mxu0 %vm8826_vm2, %v8825_v16  ;;  %v6977_v57 = vld [vmem:[%s12232_s2 + $0xb60] sm:$0xff] }
 0x446   :  { %v11901_v60 = vadd.f32 %v4224_v10, %v4028_v32  ;;  %v8311_v7 = vpop.f32.mrf.mxu0 }
 0x447   :  { %v8354_v61 = vpop.f32.mrf.mxu1 }
 0x448   :  { %v4386_v0 = vpop.f32.mrf.mxu0  ;;  %8669 = vmatmul.mubr.msk.f32.gmra.mxu0 %vm330_vm3, %v6976_v8 }
 0x449   :  { %v4229_v5 = vpop.f32.mrf.mxu1  ;;  %v4460_v31 = vadd.f32 %v4386_v0, %v11689_v4  ;;  %8671 = vmatprep.mubr.msk.f32.mxu0 %vm8826_vm2, %v8825_v16  ;;  %v6978_v4 = vld [vmem:[%s12232_s2 + $0xb68] sm:$0xff] }
 0x44a   :  { %v11910_v59 = vadd.f32 %v4229_v5, %v4029_v51  ;;  %v8367_v11 = vpop.f32.mrf.mxu0 }
 0x44b   :  { %v8357_v15 = vpop.f32.mrf.mxu1 }
 0x44c   :  { %v4391_v20 = vpop.f32.mrf.mxu0  ;;  %8672 = vmatmul.mubr.msk.f32.gmra.mxu0 %vm330_vm3, %v6977_v57 }
 0x44d   :  { %v4234_v12 = vpop.f32.mrf.mxu1  ;;  %v4461_v2 = vadd.f32 %v4391_v20, %v11704_v17  ;;  %8674 = vmatprep.mubr.msk.f32.mxu0 %vm8826_vm2, %v8825_v16  ;;  %v6979_v17 = vld [vmem:[%s12232_s2 + $0xb70] sm:$0xff] }
 0x44e   :  { %v11919_v22 = vadd.f32 %v4234_v12, %v4030_v54  ;;  %v8370_v6 = vpop.f32.mrf.mxu0 }
 0x44f   :  { %v8360_v14 = vpop.f32.mrf.mxu1 }
 0x450   :  { %v4396_v13 = vpop.f32.mrf.mxu0  ;;  %8675 = vmatmul.mubr.msk.f32.gmra.mxu0 %vm330_vm3, %v6978_v4 }
 0x451   :  { %v4462_v25 = vadd.f32 %v4396_v13, %v11719_v21  ;;  %v4608_v46 = vpop.f32.mrf.mxu1  ;;  %8677 = vmatprep.mubr.msk.f32.mxu0 %vm8826_vm2, %v8825_v16  ;;  %v6980_v21 = vld [vmem:[%s12232_s2 + $0xb78] sm:$0xff] }
 0x452   :  { %v11928_v9 = vadd.f32 %v4608_v46, %v4460_v31  ;;  %v8373_v39 = vpop.f32.mrf.mxu0 }
 0x453   :  { %v8416_v19 = vpop.f32.mrf.mxu1 }
 0x454   :  { %v4401_v35 = vpop.f32.mrf.mxu0  ;;  %8678 = vmatmul.mubr.msk.f32.gmra.mxu0 %vm330_vm3, %v6979_v17 }
 0x455   :  { %v4463_v28 = vadd.f32 %v4401_v35, %v11734_v33  ;;  %v4613_v34 = vpop.f32.mrf.mxu1  ;;  %8680 = vmatprep.mubr.msk.f32.mxu0 %vm8826_vm2, %v8825_v16  ;;  %v6981_v33 = vld [vmem:[%s12232_s2 + $0xb80] sm:$0xff] }
 0x456   :  { %v11937_v36 = vadd.f32 %v4613_v34, %v4461_v2  ;;  %v8376_v27 = vpop.f32.mrf.mxu0 }
 0x457   :  { %v8419_v26 = vpop.f32.mrf.mxu1 }
 0x458   :  { %v4406_v23 = vpop.f32.mrf.mxu0  ;;  %8681 = vmatmul.mubr.msk.f32.gmra.mxu0 %vm330_vm3, %v6980_v21 }
 0x459   :  { %v4464_v45 = vadd.f32 %v4406_v23, %v11749_v48  ;;  %v4618_v29 = vpop.f32.mrf.mxu1  ;;  %8683 = vmatprep.mubr.msk.f32.mxu0 %vm8826_vm2, %v8825_v16  ;;  %v6982_v48 = vld [vmem:[%s12232_s2 + $0xb88] sm:$0xff] }
 0x45a   :  { %v11946_v37 = vadd.f32 %v4618_v29, %v4462_v25  ;;  %v8379_v47 = vpop.f32.mrf.mxu0 }
 0x45b   :  { %v8422_v40 = vpop.f32.mrf.mxu1 }
 0x45c   :  { %v4411_v38 = vpop.f32.mrf.mxu0  ;;  %8684 = vmatmul.mubr.msk.f32.gmra.mxu0 %vm330_vm3, %v6981_v33 }
 0x45d   :  { %v4465_v32 = vadd.f32 %v4411_v38, %v11770_v3  ;;  %v4623_v24 = vpop.f32.mrf.mxu1  ;;  %8686 = vmatprep.mubr.msk.f32.mxu0 %vm8826_vm2, %v8825_v16  ;;  %v6983_v3 = vld [vmem:[%s12232_s2 + $0xb90] sm:$0xff] }
 0x45e   :  { %v11955_v41 = vadd.f32 %v4623_v24, %v4463_v28  ;;  %v8382_v52 = vpop.f32.mrf.mxu0 }
 0x45f   :  { %v8425_v44 = vpop.f32.mrf.mxu1 }
 0x460   :  { %v4416_v42 = vpop.f32.mrf.mxu0  ;;  %8687 = vmatmul.mubr.msk.f32.gmra.mxu0 %vm330_vm3, %v6982_v48 }
 0x461   :  { %v4466_v58 = vadd.f32 %v4416_v42, %v11791_v1  ;;  %v4628_v51 = vpop.f32.mrf.mxu1  ;;  %8689 = vmatprep.mubr.msk.f32.mxu0 %vm8826_vm2, %v8825_v16  ;;  %v6984_v1 = vld [vmem:[%s12232_s2 + $0xb98] sm:$0xff] }
 0x462   :  { %v11964_v53 = vadd.f32 %v4628_v51, %v4464_v45  ;;  %v8385_v49 = vpop.f32.mrf.mxu0 }
 0x463   :  { %v8428_v56 = vpop.f32.mrf.mxu1 }
 0x464   :  { %v4421_v55 = vpop.f32.mrf.mxu0  ;;  %8690 = vmatmul.mubr.msk.f32.gmra.mxu0 %vm330_vm3, %v6983_v3 }
 0x465   :  { %v4467_v63 = vadd.f32 %v4421_v55, %v11812_v18  ;;  %v4633_v54 = vpop.f32.mrf.mxu1  ;;  %8692 = vmatprep.mubr.msk.f32.mxu0 %vm8826_vm2, %v8825_v16  ;;  %v6985_v18 = vld [vmem:[%s12232_s2 + $0xba0] sm:$0xff] }
 0x466   :  { %v11973_v10 = vadd.f32 %v4633_v54, %v4465_v32  ;;  %v8388_v8 = vpop.f32.mrf.mxu0 }
 0x467   :  { %v8431_v7 = vpop.f32.mrf.mxu1 }
 0x468   :  { %v4426_v61 = vpop.f32.mrf.mxu0  ;;  %8693 = vmatmul.mubr.msk.f32.gmra.mxu0 %vm330_vm3, %v6984_v1 }
 0x469   :  { %v4468_v0 = vadd.f32 %v4426_v61, %v11833_v30  ;;  %v4638_v5 = vpop.f32.mrf.mxu1  ;;  %8695 = vmatprep.mubr.msk.f32.mxu0 %vm8826_vm2, %v8825_v16  ;;  %v6986_v30 = vld [vmem:[%s12232_s2 + $0xba8] sm:$0xff] }
 0x46a   :  { %v11982_v31 = vadd.f32 %v4638_v5, %v4466_v58  ;;  %v8391_v57 = vpop.f32.mrf.mxu0 }
 0x46b   :  { %v8434_v11 = vpop.f32.mrf.mxu1 }
 0x46c   :  { %v4431_v15 = vpop.f32.mrf.mxu0  ;;  %8696 = vmatmul.mubr.msk.f32.gmra.mxu0 %vm330_vm3, %v6985_v18 }
 0x46d   :  { %v4469_v20 = vadd.f32 %v4431_v15, %v11854_v43  ;;  %v4643_v12 = vpop.f32.mrf.mxu1  ;;  %8698 = vmatprep.mubr.msk.f32.mxu0 %vm8826_vm2, %v8825_v16  ;;  %v6987_v43 = vld [vmem:[%s12232_s2 + $0xbb0] sm:$0xff] }
 0x46e   :  { %v11991_v2 = vadd.f32 %v4643_v12, %v4467_v63  ;;  %v8394_v4 = vpop.f32.mrf.mxu0 }
 0x46f   :  { %v8437_v6 = vpop.f32.mrf.mxu1 }
 0x470   :  { %v4436_v14 = vpop.f32.mrf.mxu0  ;;  %8699 = vmatmul.mubr.msk.f32.gmra.mxu0 %vm330_vm3, %v6986_v30 }
 0x471   :  { %v4470_v13 = vadd.f32 %v4436_v14, %v11875_v62  ;;  %v4648_v25 = vpop.f32.mrf.mxu1  ;;  %8701 = vmatprep.mubr.msk.f32.mxu0 %vm8826_vm2, %v8825_v16 }
 0x472   :  { %v12000_v46 = vadd.f32 %v4648_v25, %v4468_v0  ;;  %v8397_v17 = vpop.f32.mrf.mxu0 }
 0x473   :  { %v8440_v39 = vpop.f32.mrf.mxu1 }
 0x474   :  { %v4441_v19 = vpop.f32.mrf.mxu0  ;;  %8702 = vmatmul.mubr.msk.f32.gmra.mxu0 %vm330_vm3, %v6987_v43 }
 0x475   :  { %v4471_v35 = vadd.f32 %v4441_v19, %v11890_v50  ;;  %v4653_v28 = vpop.f32.mrf.mxu1 }
 0x476   :  { %v12004_v34 = vadd.f32 %v4653_v28, %v4469_v20  ;;  %v8400_v62 = vpop.f32.mrf.mxu0 }
 0x477   :  { %v8443_v21 = vpop.f32.mrf.mxu1 }
 0x478   :  { %v4446_v27 = vpop.f32.mrf.mxu0 }
 0x479   :  { %v4472_v26 = vadd.f32 %v4446_v27, %v11901_v60  ;;  %v4658_v23 = vpop.f32.mrf.mxu1 }
 0x47a   :  { %v12007_v45 = vadd.f32 %v4658_v23, %v4470_v13  ;;  %v8403_v29 = vpop.f32.mrf.mxu0 }
 0x47b   :  { %v8446_v33 = vpop.f32.mrf.mxu1 }
 0x47c   :  { %v4451_v47 = vpop.f32.mrf.mxu0 }
 0x47d   :  { %v4473_v40 = vadd.f32 %v4451_v47, %v11910_v59  ;;  %v4663_v38 = vpop.f32.mrf.mxu1 }
 0x47e   :  { %v12010_v32 = vadd.f32 %v4663_v38, %v4471_v35  ;;  %v8406_v50 = vpop.f32.mrf.mxu0 }
 0x47f   :  { %v8449_v24 = vpop.f32.mrf.mxu1 }
 0x480   :  { %v4456_v48 = vpop.f32.mrf.mxu0 }
 0x481   :  { %v4474_v52 = vadd.f32 %v4456_v48, %v11919_v22  ;;  %v4668_v44 = vpop.f32.mrf.mxu1 }
 0x482   :  { %v12013_v42 = vadd.f32 %v4668_v44, %v4472_v26  ;;  %v8409_v60 = vpop.f32.mrf.mxu0 }
 0x483   :  { %v8452_v58 = vpop.f32.mrf.mxu1 }
 0x484   :  { %v4830_v51 = vpop.f32.mrf.mxu0 }
 0x485   :  { %v4673_v3 = vpop.f32.mrf.mxu1  ;;  %v4904_v49 = vadd.f32 %v4830_v51, %v11928_v9 }
 0x486   :  { %v12016_v56 = vadd.f32 %v4673_v3, %v4473_v40  ;;  %v8465_v59 = vpop.f32.mrf.mxu0 }
 0x487   :  { %v8455_v55 = vpop.f32.mrf.mxu1 }
 0x488   :  { %v4835_v63 = vpop.f32.mrf.mxu0 }
 0x489   :  { %v4678_v54 = vpop.f32.mrf.mxu1  ;;  %v4905_v1 = vadd.f32 %v4835_v63, %v11937_v36 }
 0x48a   :  { %v12019_v8 = vadd.f32 %v4678_v54, %v4474_v52  ;;  %v8468_v22 = vpop.f32.mrf.mxu0 }
 0x48b   :  { %v8458_v7 = vpop.f32.mrf.mxu1 }
 0x48c   :  { %v4840_v61 = vpop.f32.mrf.mxu0 }
 0x48d   :  { %v4906_v0 = vadd.f32 %v4840_v61, %v11946_v37  ;;  %v5052_v5 = vpop.f32.mrf.mxu1 }
 0x48e   :  { %v12022_v18 = vadd.f32 %v5052_v5, %v4904_v49  ;;  %v8471_v57 = vpop.f32.mrf.mxu0 }
 0x48f   :  { %v8514_v9 = vpop.f32.mrf.mxu1 }
 0x490   :  { %v4845_v11 = vpop.f32.mrf.mxu0 }
 0x491   :  { %v4907_v15 = vadd.f32 %v4845_v11, %v11955_v41  ;;  %v5057_v20 = vpop.f32.mrf.mxu1 }
 0x492   :  { %v12025_v12 = vadd.f32 %v5057_v20, %v4905_v1  ;;  %v8474_v30 = vpop.f32.mrf.mxu0 }
 0x493   :  { %v8517_v36 = vpop.f32.mrf.mxu1 }
 0x494   :  { %v4850_v4 = vpop.f32.mrf.mxu0 }
 0x495   :  { %v4908_v6 = vadd.f32 %v4850_v4, %v11964_v53  ;;  %v5062_v14 = vpop.f32.mrf.mxu1 }
 0x496   :  { %v12028_v13 = vadd.f32 %v5062_v14, %v4906_v0  ;;  %v8477_v37 = vpop.f32.mrf.mxu0 }
 0x497   :  { %v8520_v25 = vpop.f32.mrf.mxu1 }
 0x498   :  { %v4855_v43 = vpop.f32.mrf.mxu0 }
 0x499   :  { %v4909_v17 = vadd.f32 %v4855_v43, %v11973_v10  ;;  %v5067_v39 = vpop.f32.mrf.mxu1 }
 0x49a   :  { %v12031_v19 = vadd.f32 %v5067_v39, %v4907_v15  ;;  %v8480_v41 = vpop.f32.mrf.mxu0 }
 0x49b   :  { %v8523_v35 = vpop.f32.mrf.mxu1 }
 0x49c   :  { %v4860_v28 = vpop.f32.mrf.mxu0 }
 0x49d   :  { %v4910_v62 = vadd.f32 %v4860_v28, %v11982_v31  ;;  %v5072_v21 = vpop.f32.mrf.mxu1 }
 0x49e   :  { %v12034_v27 = vadd.f32 %v5072_v21, %v4908_v6  ;;  %v8483_v53 = vpop.f32.mrf.mxu0 }
 0x49f   :  { %v8526_v26 = vpop.f32.mrf.mxu1 }
 0x4a0   :  { %v4865_v23 = vpop.f32.mrf.mxu0 }
 0x4a1   :  { %v4911_v29 = vadd.f32 %v4865_v23, %v11991_v2  ;;  %v5077_v33 = vpop.f32.mrf.mxu1 }
 0x4a2   :  { %v12037_v47 = vadd.f32 %v5077_v33, %v4909_v17  ;;  %v8486_v10 = vpop.f32.mrf.mxu0 }
 0x4a3   :  { %v8529_v40 = vpop.f32.mrf.mxu1 }
 0x4a4   :  { %v4870_v38 = vpop.f32.mrf.mxu0 }
 0x4a5   :  { %v4912_v50 = vadd.f32 %v4870_v38, %v12000_v46  ;;  %v5082_v24 = vpop.f32.mrf.mxu1 }
 0x4a6   :  { %v12040_v48 = vadd.f32 %v5082_v24, %v4910_v62  ;;  %v8489_v31 = vpop.f32.mrf.mxu0 }
 0x4a7   :  { %v8532_v52 = vpop.f32.mrf.mxu1 }
 0x4a8   :  { %v4875_v44 = vpop.f32.mrf.mxu0 }
 0x4a9   :  { %v4913_v60 = vadd.f32 %v4875_v44, %v12004_v34  ;;  %v5087_v58 = vpop.f32.mrf.mxu1 }
 0x4aa   :  { %v12043_v51 = vadd.f32 %v5087_v58, %v4911_v29  ;;  %v8492_v2 = vpop.f32.mrf.mxu0 }
 0x4ab   :  { %v8535_v3 = vpop.f32.mrf.mxu1 }
 0x4ac   :  { %v4880_v49 = vpop.f32.mrf.mxu0 }
 0x4ad   :  { %v4914_v59 = vadd.f32 %v4880_v49, %v12007_v45  ;;  %v5092_v55 = vpop.f32.mrf.mxu1 }
 0x4ae   :  { %v12046_v63 = vadd.f32 %v5092_v55, %v4912_v50  ;;  %v8495_v46 = vpop.f32.mrf.mxu0 }
 0x4af   :  { %v8538_v54 = vpop.f32.mrf.mxu1 }
 0x4b0   :  { %v4885_v1 = vpop.f32.mrf.mxu0 }
 0x4b1   :  { %v4915_v22 = vadd.f32 %v4885_v1, %v12010_v32  ;;  %v5097_v7 = vpop.f32.mrf.mxu1 }
 0x4b2   :  { %v12049_v61 = vadd.f32 %v5097_v7, %v4913_v60  ;;  %v8498_v34 = vpop.f32.mrf.mxu0 }
 0x4b3   :  { %v8541_v0 = vpop.f32.mrf.mxu1 }
 0x4b4   :  { %v4890_v5 = vpop.f32.mrf.mxu0 }
 0x4b5   :  { %v4916_v57 = vadd.f32 %v4890_v5, %v12013_v42  ;;  %v5102_v9 = vpop.f32.mrf.mxu1 }
 0x4b6   :  { %v12052_v11 = vadd.f32 %v5102_v9, %v4914_v59  ;;  %v8501_v45 = vpop.f32.mrf.mxu0 }
 0x4b7   :  { %v8544_v15 = vpop.f32.mrf.mxu1 }
 0x4b8   :  { %v4895_v20 = vpop.f32.mrf.mxu0 }
 0x4b9   :  { %v4917_v30 = vadd.f32 %v4895_v20, %v12016_v56  ;;  %v5107_v36 = vpop.f32.mrf.mxu1 }
 0x4ba   :  { %v12055_v4 = vadd.f32 %v5107_v36, %v4915_v22  ;;  %v8504_v32 = vpop.f32.mrf.mxu0 }
 0x4bb   :  { %v8547_v6 = vpop.f32.mrf.mxu1 }
 0x4bc   :  { %v4900_v14 = vpop.f32.mrf.mxu0 }
 0x4bd   :  { %v4918_v37 = vadd.f32 %v4900_v14, %v12019_v8  ;;  %v5112_v25 = vpop.f32.mrf.mxu1 }
 0x4be   :  { %v12058_v43 = vadd.f32 %v5112_v25, %v4916_v57  ;;  %v8507_v42 = vpop.f32.mrf.mxu0 }
 0x4bf   :  { %v8550_v17 = vpop.f32.mrf.mxu1 }
 0x4c0   :  { %v5274_v39 = vpop.f32.mrf.mxu0 }
 0x4c1   :  { %v5117_v41 = vpop.f32.mrf.mxu1  ;;  %v5348_v35 = vadd.f32 %v5274_v39, %v12022_v18 }
 0x4c2   :  { %v12061_v28 = vadd.f32 %v5117_v41, %v4917_v30  ;;  %v8563_v56 = vpop.f32.mrf.mxu0 }
 0x4c3   :  { %v8553_v62 = vpop.f32.mrf.mxu1 }
 0x4c4   :  { %v5279_v21 = vpop.f32.mrf.mxu0 }
 0x4c5   :  { %v5122_v53 = vpop.f32.mrf.mxu1  ;;  %v5349_v26 = vadd.f32 %v5279_v21, %v12025_v12 }
 0x4c6   :  { %v12064_v23 = vadd.f32 %v5122_v53, %v4918_v37  ;;  %v8566_v8 = vpop.f32.mrf.mxu0 }
 0x4c7   :  { %v8556_v29 = vpop.f32.mrf.mxu1 }
 0x4c8   :  { %v5284_v33 = vpop.f32.mrf.mxu0 }
 0x4c9   :  { %v5350_v10 = vadd.f32 %v5284_v33, %v12028_v13  ;;  %v5496_v40 = vpop.f32.mrf.mxu1 }
 0x4ca   :  { %v12067_v38 = vadd.f32 %v5496_v40, %v5348_v35  ;;  %v8569_v50 = vpop.f32.mrf.mxu0 }
 0x4cb   :  { %v8612_v18 = vpop.f32.mrf.mxu1 }
 0x4cc   :  { %v5289_v24 = vpop.f32.mrf.mxu0 }
 0x4cd   :  { %v5351_v31 = vadd.f32 %v5289_v24, %v12031_v19  ;;  %v5501_v52 = vpop.f32.mrf.mxu1 }
 0x4ce   :  { %v12070_v44 = vadd.f32 %v5501_v52, %v5349_v26  ;;  %v8572_v60 = vpop.f32.mrf.mxu0 }
 0x4cf   :  { %v8615_v12 = vpop.f32.mrf.mxu1 }
 0x4d0   :  { %v5294_v58 = vpop.f32.mrf.mxu0 }
 0x4d1   :  { %v5352_v2 = vadd.f32 %v5294_v58, %v12034_v27  ;;  %v5506_v3 = vpop.f32.mrf.mxu1 }
 0x4d2   :  { %v12073_v49 = vadd.f32 %v5506_v3, %v5350_v10  ;;  %v8575_v13 = vpop.f32.mrf.mxu0 }
 0x4d3   :  { %v8618_v59 = vpop.f32.mrf.mxu1 }
 0x4d4   :  { %v5299_v55 = vpop.f32.mrf.mxu0 }
 0x4d5   :  { %v5353_v46 = vadd.f32 %v5299_v55, %v12037_v47  ;;  %v5511_v54 = vpop.f32.mrf.mxu1 }
 0x4d6   :  { %v12076_v1 = vadd.f32 %v5511_v54, %v5351_v31  ;;  %v8578_v19 = vpop.f32.mrf.mxu0 }
 0x4d7   :  { %v8621_v22 = vpop.f32.mrf.mxu1 }
 0x4d8   :  { %v5304_v7 = vpop.f32.mrf.mxu0 }
 0x4d9   :  { %v5354_v34 = vadd.f32 %v5304_v7, %v12040_v48  ;;  %v5516_v0 = vpop.f32.mrf.mxu1 }
 0x4da   :  { %v12079_v5 = vadd.f32 %v5516_v0, %v5352_v2  ;;  %v8581_v27 = vpop.f32.mrf.mxu0 }
 0x4db   :  { %v8624_v57 = vpop.f32.mrf.mxu1 }
 0x4dc   :  { %v5309_v9 = vpop.f32.mrf.mxu0 }
 0x4dd   :  { %v5355_v45 = vadd.f32 %v5309_v9, %v12043_v51  ;;  %v5521_v15 = vpop.f32.mrf.mxu1 }
 0x4de   :  { %v12082_v20 = vadd.f32 %v5521_v15, %v5353_v46  ;;  %v8584_v47 = vpop.f32.mrf.mxu0 }
 0x4df   :  { %v8627_v30 = vpop.f32.mrf.mxu1 }
 0x4e0   :  { %v5314_v36 = vpop.f32.mrf.mxu0 }
 0x4e1   :  { %v5356_v32 = vadd.f32 %v5314_v36, %v12046_v63  ;;  %v5526_v6 = vpop.f32.mrf.mxu1 }
 0x4e2   :  { %v12085_v14 = vadd.f32 %v5526_v6, %v5354_v34  ;;  %v8587_v48 = vpop.f32.mrf.mxu0 }
 0x4e3   :  { %v8630_v37 = vpop.f32.mrf.mxu1 }
 0x4e4   :  { %v5319_v25 = vpop.f32.mrf.mxu0 }
 0x4e5   :  { %v5357_v42 = vadd.f32 %v5319_v25, %v12049_v61  ;;  %v5531_v17 = vpop.f32.mrf.mxu1 }
 0x4e6   :  { %v12088_v39 = vadd.f32 %v5531_v17, %v5355_v45  ;;  %v8590_v51 = vpop.f32.mrf.mxu0 }
 0x4e7   :  { %v8633_v41 = vpop.f32.mrf.mxu1 }
 0x4e8   :  { %v5324_v35 = vpop.f32.mrf.mxu0  ;;  %v5890_v41 = vpop.permute.xlu1 %5889 }
 0x4e9   :  { %v5358_v56 = vadd.f32 %v5324_v35, %v12052_v11  ;;  %v5536_v62 = vpop.f32.mrf.mxu1 }
 0x4ea   :  { %v12091_v21 = vadd.f32 %v5536_v62, %v5356_v32  ;;  %v8593_v63 = vpop.f32.mrf.mxu0 }
 0x4eb   :  { %v8636_v53 = vpop.f32.mrf.mxu1 }
 0x4ec   :  { %v5329_v26 = vpop.f32.mrf.mxu0  ;;  %v5885_v63 = vpop.permute.xlu1 %5884 }
 0x4ed   :  { %v5359_v8 = vadd.f32 %v5329_v26, %v12055_v4  ;;  %v5541_v29 = vpop.f32.mrf.mxu1 }
 0x4ee   :  { %v12094_v33 = vadd.f32 %v5541_v29, %v5357_v42  ;;  %v8596_v61 = vpop.f32.mrf.mxu0 }
 0x4ef   :  { %v8639_v10 = vpop.f32.mrf.mxu1 }
 0x4f0   :  { %v5334_v40 = vpop.f32.mrf.mxu0  ;;  %v5875_v10 = vpop.permute.xlu1 %5874 }
 0x4f1   :  { %v5360_v50 = vadd.f32 %v5334_v40, %v12058_v43  ;;  %v5546_v18 = vpop.f32.mrf.mxu1 }
 0x4f2   :  { %v12097_v24 = vadd.f32 %v5546_v18, %v5358_v56  ;;  %v8599_v11 = vpop.f32.mrf.mxu0 }
 0x4f3   :  { %v8642_v31 = vpop.f32.mrf.mxu1 }
 0x4f4   :  { %v5339_v52 = vpop.f32.mrf.mxu0 }
 0x4f5   :  { %v5551_v60 = vpop.f32.mrf.mxu1  ;;  %v5361_v61 = vadd.f32 %v5339_v52, %v12061_v28 }
 0x4f6   :  { %v5581_v12 = vadd.f32 %v5551_v60, %v5359_v8  ;;  %v8602_v58 = vpop.f32.mrf.mxu0 }
 0x4f7   :  { %v8645_v2 = vpop.f32.mrf.mxu1 }
 0x4f8   :  { %v5344_v3 = vpop.f32.mrf.mxu0 }
 0x4f9   :  { %v5556_v4 = vpop.f32.mrf.mxu1  ;;  %v5362_v18 = vadd.f32 %v5344_v3, %v12064_v23 }
 0x4fa   :  { %v8605_v13 = vpop.f32.mrf.mxu0  ;;  %v5582_v60 = vadd.f32 %v5556_v4, %v5360_v50 }
 0x4fb   :  { %v8648_v59 = vpop.f32.mrf.mxu1 }
 0x4fc   :  { %v5718_v55 = vpop.f32.mrf.mxu0 }
 0x4fd   :  { %v5561_v46 = vpop.f32.mrf.mxu1  ;;  %v12100_v54 = vadd.f32 %v5718_v55, %v12067_v38 }
 0x4fe   :  { %v8661_v43 = vpop.f32.mrf.mxu0  ;;  %v5583_v11 = vadd.f32 %v5561_v46, %v5361_v61  ;;  %v5929_v61 = vld [vmem:[%s12236_s4 + $0x10] sm:$0xff] }
 0x4ff   :  { %v8651_v19 = vpop.f32.mrf.mxu1 }
 0x500   :  { %v5723_v22 = vpop.f32.mrf.mxu0  ;;  %v5865_v19 = vpop.permute.xlu1 %5864 }
 0x501   :  { %v5566_v7 = vpop.f32.mrf.mxu1  ;;  %v12103_v34 = vadd.f32 %v5723_v22, %v12070_v44 }
 0x502   :  { %v8664_v0 = vpop.f32.mrf.mxu0  ;;  %v5584_v58 = vadd.f32 %v5566_v7, %v5362_v18  ;;  %v5932_v18 = vld [vmem:[%s12236_s4 + $0x28] sm:$0xff] }
 0x503   :  { %v8654_v27 = vpop.f32.mrf.mxu1 }
 0x504   :  { %v5728_v57 = vpop.f32.mrf.mxu0  ;;  %v5855_v4 = vpop.permute.xlu1 %5854 }
 0x505   :  { %v12106_v9 = vadd.f32 %v5728_v57, %v12073_v49 }
 0x506   :  { %v8667_v45 = vpop.f32.mrf.mxu0 }
 0x508   :  { %v5733_v15 = vpop.f32.mrf.mxu0 }
 0x509   :  { %v12109_v47 = vadd.f32 %v5733_v15, %v12076_v1  ;;  %v5895_v1 = vpop.permute.xlu0 %5894 }
 0x50a   :  { %v8670_v38 = vpop.f32.mrf.mxu0 }
 0x50c   :  { %v12111_v30 = vpop.f32.mrf.mxu0 }
 0x50d   :  { %v5880_v8 = vpop.permute.xlu0 %5879 }
 0x50e   :  { %v8673_v36 = vpop.f32.mrf.mxu0 }
 0x510   :  { %v12113_v32 = vpop.f32.mrf.mxu0 }
 0x511   :  { %v5870_v13 = vpop.permute.xlu0 %5869 }
 0x512   :  { %v8676_v6 = vpop.f32.mrf.mxu0 }
 0x514   :  { %v5748_v44 = vpop.f32.mrf.mxu0 }
 0x515   :  { %v5860_v15 = vpop.permute.xlu0 %5859 }
 0x516   :  { %v8679_v48 = vpop.f32.mrf.mxu0 }
 0x518   :  { %v5753_v37 = vpop.f32.mrf.mxu0 }
 0x519   :  { %v5850_v6 = vpop.permute.xlu0 %5849 }
 0x51a   :  { %v8682_v25 = vpop.f32.mrf.mxu0 }
 0x51c   :  { %v5758_v42 = vpop.f32.mrf.mxu0 }
 0x51d   :  { %v5800_v46 = vadd.f32 %v5758_v42, %v12091_v21  ;;  %v5797_v21 = vadd.f32 %v12113_v32, %v12082_v20 }
 0x51e   :  { %v8685_v17 = vpop.f32.mrf.mxu0 }
 0x51f   :  { %v5905_v48 = vadd.f32 %v5865_v19, %v5800_v46  ;;  %v5845_v17 = vpop.permute.xlu1 %5844 }
 0x520   :  { %v5763_v49 = vpop.f32.mrf.mxu0 }
 0x521   :  { %v5801_v23 = vadd.f32 %v5763_v49, %v12094_v33  ;;  %v5798_v33 = vadd.f32 %v5748_v44, %v12085_v14  ;;  %v5840_v14 = vpop.permute.xlu0 %5839  ;;  %v5902_v44 = vadd.f32 %v5850_v6, %v5797_v21 }
 0x522   :  { %v8688_v51 = vpop.f32.mrf.mxu0 }
 0x523   :  { %v5920_v51 = vmax.f32 %v5905_v48, 0.0 }
 0x524   :  { %v5768_v35 = vpop.f32.mrf.mxu0 }
 0x525   :  { %v5802_v28 = vadd.f32 %v5768_v35, %v12097_v24  ;;  %v5799_v24 = vadd.f32 %v5753_v37, %v12088_v39  ;;  %v5796_v39 = vadd.f32 %v12111_v30, %v12079_v5  ;;  %v5903_v37 = vadd.f32 %v5855_v4, %v5798_v33  ;;  %v5835_v35 = vpop.permute.xlu1 %5834  ;;  %v5830_v30 = vpop.permute.xlu0 %5829 }
 0x526   :  { %v8691_v56 = vpop.f32.mrf.mxu0  ;;  %v5917_v5 = vmax.f32 %v5902_v44, 0.0 }
 0x527   :  { %v5907_v7 = vadd.f32 %v5875_v10, %v5802_v28  ;;  %v5904_v42 = vadd.f32 %v5860_v15, %v5799_v24  ;;  %v5901_v20 = vadd.f32 %v5845_v17, %v5796_v39  ;;  %v5918_v32 = vmax.f32 %v5903_v37, 0.0  ;;  %v5930_v10 = vld [vmem:[%s12236_s4 + $0x18] sm:$0xff] }
 0x528   :  { %v5773_v62 = vpop.f32.mrf.mxu0  ;;  %v5900_v56 = vadd.f32 %v5840_v14, %v12109_v47 }
 0x529   :  { %v5803_v0 = vadd.f32 %v5773_v62, %v5581_v12  ;;  %v5906_v12 = vadd.f32 %v5870_v13, %v5801_v23  ;;  %v5922_v25 = vmax.f32 %v5907_v7, 0.0  ;;  %v5916_v62 = vmax.f32 %v5901_v20, 0.0 }
 0x52a   :  { %v8694_v53 = vpop.f32.mrf.mxu0 }
 0x52b   :  { %v5908_v3 = vadd.f32 %v5880_v8, %v5803_v0  ;;  %v5921_v49 = vmax.f32 %v5906_v12, 0.0  ;;  %v5898_v53 = vadd.f32 %v5830_v30, %v12103_v34  ;;  %v5927_v34 = vld [vmem:[%s12236_s4] sm:$0xff] }
 0x52c   :  { %v5778_v26 = vpop.f32.mrf.mxu0 }
 0x52d   :  { %v5804_v55 = vadd.f32 %v5778_v26, %v5582_v60  ;;  %v5923_v36 = vmax.f32 %v5908_v3, 0.0  ;;  %v5915_v26 = vmax.f32 %v5900_v56, 0.0  ;;  %v5935_v60 = vld [vmem:[%s12236_s4 + $0x40] sm:$0xff]  ;;  %v6002_v3 = vpop.permute.xlu0 %6001 }
 0x52e   :  { %v8697_v29 = vpop.f32.mrf.mxu0 }
 0x52f   :  { %v5909_v52 = vadd.f32 %v5885_v63, %v5804_v55  ;;  %v5825_v63 = vpop.permute.xlu1 %5824  ;;  %v5913_v29 = vmax.f32 %v5898_v53, 0.0 }
 0x530   :  { %v5783_v40 = vpop.f32.mrf.mxu0  ;;  %v5897_v47 = vadd.f32 %v5825_v63, %v12100_v54  ;;  %v5928_v54 = vld [vmem:[%s12236_s4 + $0x8] sm:$0xff] }
 0x531   :  { %v5805_v2 = vadd.f32 %v5783_v40, %v5583_v11  ;;  %v5924_v38 = vmax.f32 %v5909_v52, 0.0  ;;  %v5931_v40 = vld [vmem:[%s12236_s4 + $0x20] sm:$0xff]  ;;  %v5933_v11 = vld [vmem:[%s12236_s4 + $0x30] sm:$0xff] }
 0x532   :  { %v8700_v31 = vpop.f32.mrf.mxu0 }
 0x533   :  { %v5910_v27 = vadd.f32 %v5890_v41, %v5805_v2  ;;  %v5919_v41 = vmax.f32 %v5904_v42, 0.0  ;;  %v5934_v31 = vld [vmem:[%s12236_s4 + $0x38] sm:$0xff]  ;;  %v5937_v2 = vld [vmem:[%s12236_s4 + $0x50] sm:$0xf]  ;;  %v5997_v46 = vpop.permute.xlu1 %5996 }
 0x534   :  { %v5788_v59 = vpop.f32.mrf.mxu0 }
 0x535   :  { %v5806_v43 = vadd.f32 %v5788_v59, %v5584_v58  ;;  %v5925_v50 = vmax.f32 %v5910_v27, 0.0  ;;  %v5936_v58 = vld [vmem:[%s12236_s4 + $0x48] sm:$0xff] }
 0x536   :  { %v8703_v22 = vpop.f32.mrf.mxu0 }
 0x537   :  { %v5911_v57 = vadd.f32 %v5895_v1, %v5806_v43  ;;  %v5899_v1 = vadd.f32 %v5835_v35, %v12106_v9  ;;  %v5912_v9 = vmax.f32 %v5897_v47, 0.0 }
 0x539   :  { %v5926_v45 = vmax.f32 %v5911_v57, 0.0  ;;  %v5914_v8 = vmax.f32 %v5899_v1, 0.0 }
 0x53b   :  { %8705 = vmatpush3.msra.mxu1 %v5926_v45 }
 0x53c   :  { %8706 = vmatprep.subr.mxu1 %v8825_v16 }
 0x53d   :  { %8707 = vmatpush3.msra.mxu1 %v5925_v50 }
 0x53e   :  { %8708 = vmatprep.subr.mxu1 %v8825_v16 }
 0x53f   :  { %8709 = vmatpush3.msra.mxu1 %v5924_v38  ;;  %v5992_v38 = vpop.permute.xlu0 %5991 }
 0x540   :  { %8710 = vmatprep.subr.mxu1 %v8825_v16 }
 0x541   :  { %8711 = vmatpush3.msra.mxu1 %v5923_v36  ;;  %v5987_v36 = vpop.permute.xlu1 %5986 }
 0x542   :  { %8712 = vmatprep.subr.mxu1 %v8825_v16 }
 0x543   :  { %8713 = vmatpush3.msra.mxu1 %v5922_v25  ;;  %v5982_v33 = vpop.permute.xlu0 %5981 }
 0x544   :  { %8714 = vmatprep.subr.mxu1 %v8825_v16 }
 0x545   :  { %8715 = vmatpush3.msra.mxu1 %v5921_v49  ;;  %v5977_v39 = vpop.permute.xlu1 %5976 }
 0x546   :  { %8716 = vmatprep.subr.mxu1 %v8825_v16 }
 0x547   :  { %8717 = vmatpush3.msra.mxu1 %v5920_v51  ;;  %v5972_v14 = vpop.permute.xlu0 %5971 }
 0x548   :  { %8718 = vmatprep.subr.mxu1 %v8825_v16 }
 0x549   :  { %8719 = vmatpush3.msra.mxu1 %v5919_v41 }
 0x54a   :  { %8720 = vmatprep.subr.mxu1 %v8825_v16 }
 0x54b   :  { %8721 = vmatpush3.msra.mxu1 %v5918_v32  ;;  %v5967_v32 = vpop.permute.xlu1 %5966  ;;  %v5962_v30 = vpop.permute.xlu0 %5961 }
 0x54c   :  { %8722 = vmatprep.subr.mxu1 %v8825_v16 }
 0x54d   :  { %8723 = vmatpush3.msra.mxu1 %v5917_v5 }
 0x54e   :  { %8724 = vmatprep.subr.mxu1 %v8825_v16 }
 0x54f   :  { %8725 = vmatpush3.msra.mxu1 %v5916_v62 }
 0x550   :  { %8726 = vmatprep.subr.mxu1 %v8825_v16 }
 0x551   :  { %8727 = vmatpush3.msra.mxu1 %v5915_v26  ;;  %v5957_v26 = vpop.permute.xlu1 %5956 }
 0x552   :  { %8728 = vmatprep.subr.mxu1 %v8825_v16 }
 0x553   :  { %8729 = vmatpush3.msra.mxu1 %v5914_v8 }
 0x554   :  { %8730 = vmatprep.subr.mxu1 %v8825_v16 }
 0x555   :  { %8731 = vmatpush3.msra.mxu1 %v5913_v29  ;;  %v5952_v29 = vpop.permute.xlu0 %5951 }
 0x556   :  { %8732 = vmatprep.subr.mxu1 %v8825_v16 }
 0x557   :  { %8733 = vmatpush3.msra.mxu1 %v5912_v9 }
 0x558   :  { %8735 = vmatmul.mubr.msk.f32.vlgmr.msra.gmra.mxu1 %vm6004_vm4, %v5927_v34  ;;  %8767 = vmatprep.subr.mxu1 %v8825_v16 }
 0x559   :  { %8737 = vmatprep.mubr.msk.f32.mxu1 %vm8826_vm2, %v8825_v16 }
 0x55c   :  { %8738 = vmatmul.mubr.msk.f32.gmra.mxu1 %vm6004_vm4, %v5928_v54 }
 0x55d   :  { %8740 = vmatprep.mubr.msk.f32.mxu1 %vm8826_vm2, %v8825_v16 }
 0x560   :  { %8741 = vmatmul.mubr.msk.f32.gmra.mxu1 %vm6004_vm4, %v5929_v61 }
 0x561   :  { %8743 = vmatprep.mubr.msk.f32.mxu1 %vm8826_vm2, %v8825_v16 }
 0x564   :  { %8744 = vmatmul.mubr.msk.f32.gmra.mxu1 %vm6004_vm4, %v5930_v10  ;;  %v6169_v10 = vld [vmem:[%s12237_s6] sm:$0x3] }
 0x565   :  { %8746 = vmatprep.mubr.msk.f32.mxu1 %vm8826_vm2, %v8825_v16 }
 0x568   :  { %8747 = vmatmul.mubr.msk.f32.gmra.mxu1 %vm6004_vm4, %v5931_v40  ;;  %v6174_v40 = vpop.permute.xlu1 %6173 }
 0x569   :  { %8749 = vmatprep.mubr.msk.f32.mxu1 %vm8826_vm2, %v8825_v16 }
 0x56c   :  { %8750 = vmatmul.mubr.msk.f32.gmra.mxu1 %vm6004_vm4, %v5932_v18 }
 0x56d   :  { %8752 = vmatprep.mubr.msk.f32.mxu1 %vm8826_vm2, %v8825_v16 }
 0x570   :  { %8753 = vmatmul.mubr.msk.f32.gmra.mxu1 %vm6004_vm4, %v5933_v11 }
 0x571   :  { %8755 = vmatprep.mubr.msk.f32.mxu1 %vm8826_vm2, %v8825_v16 }
 0x574   :  { %8756 = vmatmul.mubr.msk.f32.gmra.mxu1 %vm6004_vm4, %v5934_v31 }
 0x575   :  { %8758 = vmatprep.mubr.msk.f32.mxu1 %vm8826_vm2, %v8825_v16 }
 0x578   :  { %8759 = vmatmul.mubr.msk.f32.gmra.mxu1 %vm6004_vm4, %v5935_v60 }
 0x579   :  { %8761 = vmatprep.mubr.msk.f32.mxu1 %vm8826_vm2, %v8825_v16 }
 0x57c   :  { %8762 = vmatmul.mubr.msk.f32.gmra.mxu1 %vm6004_vm4, %v5936_v58 }
 0x57d   :  { %8764 = vmatprep.mubr.msk.f32.mxu1 %vm8826_vm2, %v8825_v16 }
 0x580   :  { %8765 = vmatmul.mubr.msk.f32.gmra.mxu1 %vm6004_vm4, %v5937_v2 }
 0x581   :  { %8789 = vmatprep.mubr.msk.f32.mxu1 %vm8826_vm2, %v8825_v16 }
 0x618   :  { %v12211_v13 = vpop.f32.mrf.mxu1 }
 0x619   :  { %v6105_v9 = vadd.f32 %v12211_v13, %v5952_v29 }
 0x61a   :  { %v8736_v59 = vpop.f32.mrf.mxu1 }
 0x61b   :  { %v6158_v61 = vmax.f32 %v6105_v9, 0.0 }
 0x61c   :  { %v6109_v55 = vpop.f32.mrf.mxu1 }
 0x61d   :  { %v6110_v47 = vadd.f32 %v6109_v55, %v5957_v26 }
 0x61e   :  { %v8739_v43 = vpop.f32.mrf.mxu1 }
 0x61f   :  { %v6159_v54 = vmax.f32 %v6110_v47, 0.0 }
 0x620   :  { %v6114_v19 = vpop.f32.mrf.mxu1 }
 0x621   :  { %v6115_v63 = vadd.f32 %v6114_v19, %v5962_v30 }
 0x622   :  { %v8742_v22 = vpop.f32.mrf.mxu1 }
 0x623   :  { %v6160_v34 = vmax.f32 %v6115_v63, 0.0 }
 0x624   :  { %v6119_v0 = vpop.f32.mrf.mxu1 }
 0x625   :  { %v6120_v1 = vadd.f32 %v6119_v0, %v5967_v32 }
 0x626   :  { %v8745_v27 = vpop.f32.mrf.mxu1 }
 0x627   :  { %v6161_v8 = vmax.f32 %v6120_v1, 0.0 }
 0x628   :  { %v6124_v57 = vpop.f32.mrf.mxu1 }
 0x629   :  { %v6125_v56 = vadd.f32 %v6124_v57, %v5972_v14 }
 0x62a   :  { %v8748_v28 = vpop.f32.mrf.mxu1 }
 0x62b   :  { %v6162_v53 = vmax.f32 %v6125_v56, 0.0 }
 0x62c   :  { %v6129_v52 = vpop.f32.mrf.mxu1 }
 0x62d   :  { %v6130_v35 = vadd.f32 %v6129_v52, %v5977_v39 }
 0x62e   :  { %v8751_v45 = vpop.f32.mrf.mxu1 }
 0x62f   :  { %v6163_v62 = vmax.f32 %v6130_v35, 0.0 }
 0x630   :  { %v6134_v15 = vpop.f32.mrf.mxu1 }
 0x631   :  { %v6135_v44 = vadd.f32 %v6134_v15, %v5982_v33 }
 0x632   :  { %v8754_v23 = vpop.f32.mrf.mxu1 }
 0x633   :  { %v6164_v5 = vmax.f32 %v6135_v44, 0.0 }
 0x634   :  { %v6139_v50 = vpop.f32.mrf.mxu1 }
 0x635   :  { %v6140_v37 = vadd.f32 %v6139_v50, %v5987_v36 }
 0x636   :  { %v8757_v4 = vpop.f32.mrf.mxu1 }
 0x637   :  { %v6165_v20 = vmax.f32 %v6140_v37, 0.0 }
 0x638   :  { %v6144_v7 = vpop.f32.mrf.mxu1 }
 0x639   :  { %v6145_v42 = vadd.f32 %v6144_v7, %v5992_v38 }
 0x63a   :  { %v8760_v24 = vpop.f32.mrf.mxu1 }
 0x63b   :  { %v6166_v41 = vmax.f32 %v6145_v42, 0.0 }
 0x63c   :  { %v6149_v12 = vpop.f32.mrf.mxu1 }
 0x63d   :  { %v6150_v25 = vadd.f32 %v6149_v12, %v5997_v46 }
 0x63e   :  { %v8763_v6 = vpop.f32.mrf.mxu1 }
 0x63f   :  { %v6167_v51 = vmax.f32 %v6150_v25, 0.0 }
 0x640   :  { %v6154_v48 = vpop.f32.mrf.mxu1 }
 0x641   :  { %v6155_v17 = vadd.f32 %v6154_v48, %v6002_v3 }
 0x642   :  { %v8766_v21 = vpop.f32.mrf.mxu1 }
 0x643   :  { %v6168_v49 = vmax.f32 %v6155_v17, 0.0 }
 0x645   :  { %8768 = vmatpush3.msk.msra.mxu1 %vm6180_vm5, %v6168_v49 }
 0x646   :  { %8769 = vmatprep.subr.mxu1 %v8825_v16 }
 0x647   :  { %8770 = vmatpush3.msra.mxu1 %v6167_v51 }
 0x648   :  { %8771 = vmatprep.subr.mxu1 %v8825_v16 }
 0x649   :  { %8772 = vmatpush3.msra.mxu1 %v6166_v41 }
 0x64a   :  { %8773 = vmatprep.subr.mxu1 %v8825_v16 }
 0x64b   :  { %8774 = vmatpush3.msra.mxu1 %v6165_v20 }
 0x64c   :  { %8775 = vmatprep.subr.mxu1 %v8825_v16 }
 0x64d   :  { %8776 = vmatpush3.msra.mxu1 %v6164_v5 }
 0x64e   :  { %8777 = vmatprep.subr.mxu1 %v8825_v16 }
 0x64f   :  { %8778 = vmatpush3.msra.mxu1 %v6163_v62 }
 0x650   :  { %8779 = vmatprep.subr.mxu1 %v8825_v16 }
 0x651   :  { %8780 = vmatpush3.msra.mxu1 %v6162_v53 }
 0x652   :  { %8781 = vmatprep.subr.mxu1 %v8825_v16 }
 0x653   :  { %8782 = vmatpush3.msra.mxu1 %v6161_v8 }
 0x654   :  { %8783 = vmatprep.subr.mxu1 %v8825_v16 }
 0x655   :  { %8784 = vmatpush3.msra.mxu1 %v6160_v34 }
 0x656   :  { %8785 = vmatprep.subr.mxu1 %v8825_v16 }
 0x657   :  { %8786 = vmatpush3.msra.mxu1 %v6159_v54 }
 0x658   :  { %8787 = vmatprep.subr.mxu1 %v8825_v16 }
 0x659   :  { %8788 = vmatpush3.msra.mxu1 %v6158_v61 }
 0x65a   :  { %8790 = vmatmul.mubr.msk.f32.vlgmr.msra.gmra.mxu1 %vm6176_vm6, %v6169_v10 }
 0x71a   :  { %v6250_v18 = vpop.f32.mrf.mxu1 }
 0x71b   :  { %v6251_v11 = vadd.f32 %v6250_v18, %v6174_v40 }
 0x71c   :  { %v8791_v31 = vpop.f32.mrf.mxu1 }
 0x71d   :  { %6255 = vst.msk [vmem:[%s12238_s8] sm:$0x3] %vm6254_vm7, %v6251_v11 }

</bundles_post_ra>
